<compile_context>
chip_gen: v5e
topology: v5e:2x2
jax: 0.10.0
libtpu: 0.0.40
codegen_flags: <defaults>
</compile_context>

<pallas_src>
import functools

import jax
import jax.numpy as jnp
from jax import lax
from jax.experimental import pallas as pl
from jax.experimental.pallas import tpu as pltpu

LANE = 128
NEG_SLOPE = 0.01  # nn.LeakyReLU default


def _round_up(x, m):
    return (x + m - 1) // m * m


def _pad2d(a, rows, cols):
    r, c = a.shape
    return jnp.pad(a.astype(jnp.float32), ((0, rows - r), (0, cols - c)))


def _leaky(x):
    return jnp.where(x > 0, x, NEG_SLOPE * x)


# --------------------------------------------------------------------------
# Kernel 1: EdgeConvNoNodes — scatter-mean of (symmetrized) edge feats to nodes
# --------------------------------------------------------------------------
def _init_conv_kernel(dst_row_ref, ef_ref, inv_deg_ref, node_ref):
    i = pl.program_id(0)

    @pl.when(i == 0)
    def _():
        node_ref[...] = jnp.zeros_like(node_ref)

    NP = node_ref.shape[0]
    TE = ef_ref.shape[0]
    # in-register scatter one-hot (NP, TE): [n, e] = (dst[e] == n); padded edges
    # carry an out-of-range sentinel -> all-zero column -> no contribution.
    oh_s = (lax.broadcasted_iota(jnp.int32, (NP, TE), 0)
            == dst_row_ref[...]).astype(jnp.float32)
    node_ref[...] += jnp.dot(oh_s, ef_ref[...], preferred_element_type=jnp.float32)

    @pl.when(i == pl.num_programs(0) - 1)
    def _():
        node_ref[...] = node_ref[...] * inv_deg_ref[...]


# --------------------------------------------------------------------------
# Kernel 2: one residual NodeConv layer, fused
#   gather x_i (dst), x_j (src); h = LeakyReLU(x_i@W1t + x_j@W1b + b1);
#   msg = h@W2 + b2; node_out = node + mean-scatter(msg)
# --------------------------------------------------------------------------
def _node_conv_kernel(dst_col_ref, src_col_ref, dst_row_ref, node_ref, inv_deg_ref,
                      w1t_ref, w1b_ref, b1_ref, w2_ref, b2_ref, out_ref):
    i = pl.program_id(0)

    @pl.when(i == 0)
    def _():
        out_ref[...] = jnp.zeros_like(out_ref)

    NP = node_ref.shape[0]
    TE = dst_col_ref.shape[0]
    node = node_ref[...]

    lane_iota = lax.broadcasted_iota(jnp.int32, (TE, NP), 1)
    oh_i = (lane_iota == dst_col_ref[...]).astype(jnp.float32)   # (TE, NP)
    oh_j = (lane_iota == src_col_ref[...]).astype(jnp.float32)
    x_i = jnp.dot(oh_i, node, preferred_element_type=jnp.float32)  # (TE, CP)
    x_j = jnp.dot(oh_j, node, preferred_element_type=jnp.float32)

    h = (jnp.dot(x_i, w1t_ref[...], preferred_element_type=jnp.float32)
         + jnp.dot(x_j, w1b_ref[...], preferred_element_type=jnp.float32)
         + b1_ref[...])
    h = _leaky(h)
    msg = jnp.dot(h, w2_ref[...], preferred_element_type=jnp.float32) + b2_ref[...]

    oh_s = (lax.broadcasted_iota(jnp.int32, (NP, TE), 0)
            == dst_row_ref[...]).astype(jnp.float32)
    out_ref[...] += jnp.dot(oh_s, msg, preferred_element_type=jnp.float32)

    @pl.when(i == pl.num_programs(0) - 1)
    def _():
        out_ref[...] = node_ref[...] + inv_deg_ref[...] * out_ref[...]


# --------------------------------------------------------------------------
# Kernel 3: EdgeConv — forward/backward directed-edge MLP, symmetric fold,
#           side-loss (all fused, loss accumulated in a resident (1,1) block)
# --------------------------------------------------------------------------
def _edge_conv_kernel(dst_col_ref, src_col_ref, node_ref,
                      w1t_ref, w1b_ref, b1_ref, w2_ref, b2_ref,
                      edge_ref, loss_ref, *, inv_denom):
    i = pl.program_id(0)

    @pl.when(i == 0)
    def _():
        loss_ref[...] = jnp.zeros_like(loss_ref)

    NP = node_ref.shape[0]
    TE = dst_col_ref.shape[0]
    node = node_ref[...]

    lane_iota = lax.broadcasted_iota(jnp.int32, (TE, NP), 1)
    oh_d = (lane_iota == dst_col_ref[...]).astype(jnp.float32)
    oh_s = (lane_iota == src_col_ref[...]).astype(jnp.float32)
    x_d = jnp.dot(oh_d, node, preferred_element_type=jnp.float32)
    x_s = jnp.dot(oh_s, node, preferred_element_type=jnp.float32)

    xd_t = jnp.dot(x_d, w1t_ref[...], preferred_element_type=jnp.float32)
    xd_b = jnp.dot(x_d, w1b_ref[...], preferred_element_type=jnp.float32)
    xs_t = jnp.dot(x_s, w1t_ref[...], preferred_element_type=jnp.float32)
    xs_b = jnp.dot(x_s, w1b_ref[...], preferred_element_type=jnp.float32)

    h_f = _leaky(xd_t + xs_b + b1_ref[...])   # MLP(x_i || x_j)
    h_b = _leaky(xs_t + xd_b + b1_ref[...])   # MLP(x_j || x_i)
    m_f = jnp.dot(h_f, w2_ref[...], preferred_element_type=jnp.float32) + b2_ref[...]
    m_b = jnp.dot(h_b, w2_ref[...], preferred_element_type=jnp.float32) + b2_ref[...]

    edge_ref[...] = 0.5 * (m_f + m_b)
    diff = m_f - m_b                              # padded edges/lanes give exactly 0
    s = jnp.sum(diff * diff, axis=1, keepdims=True)
    s = jnp.sum(s, axis=0, keepdims=True)
    loss_ref[...] += s * inv_denom


# --------------------------------------------------------------------------
# Parameter init (deterministic, PyTorch-Linear-style uniform bounds)
# --------------------------------------------------------------------------
def _init_linear(key, fan_in, fan_out):
    k1, k2 = jax.random.split(key)
    bound = 1.0 / (fan_in ** 0.5)
    w = jax.random.uniform(k1, (fan_in, fan_out), jnp.float32, -bound, bound)
    b = jax.random.uniform(k2, (fan_out,), jnp.float32, -bound, bound)
    return w, b


def init_params(key, c_in, c_out, n_conv_its, hl_factor):
    keys = jax.random.split(key, n_conv_its + 1)
    node_convs = []
    for i in range(n_conv_its):
        k1, k2 = jax.random.split(keys[i])
        w1, b1 = _init_linear(k1, 2 * c_in, c_in * hl_factor)
        w2, b2 = _init_linear(k2, c_in * hl_factor, c_in)
        node_convs.append((w1, b1, w2, b2))
    ke1, ke2 = jax.random.split(keys[-1])
    we1, be1 = _init_linear(ke1, 2 * c_in, c_out * hl_factor)
    we2, be2 = _init_linear(ke2, c_out * hl_factor, c_out)
    return {"node_convs": node_convs, "edge_conv": (we1, be1, we2, be2)}


# --------------------------------------------------------------------------
# Forward pass
# --------------------------------------------------------------------------
def global_edge_gcnn_forward(params, edge_features, edge_index, *, n_nodes, te=128):
    E, c_in = edge_features.shape
    c_out = params["edge_conv"][3].shape[0]

    CP = _round_up(c_in, LANE)
    COP = _round_up(c_out, LANE)
    NP = _round_up(max(n_nodes, 8), 8)
    TE = te
    E2 = 2 * E
    E2P = _round_up(E2, TE)
    EP = _round_up(E, TE)

    ei = edge_index.astype(jnp.int32)
    src = jnp.concatenate([ei[0], ei[1]])     # symmetrized directed edges
    dst = jnp.concatenate([ei[1], ei[0]])

    # index preprocessing (once per forward): in-degree / inverse degree
    deg = jnp.zeros((NP,), jnp.float32).at[dst].add(1.0)
    inv_deg = jnp.where(deg > 0, 1.0 / deg, 0.0).reshape(NP, 1)

    sent = NP  # out-of-range sentinel: padded edges gather/scatter nothing
    dst_p = jnp.concatenate([dst, jnp.full((E2P - E2,), sent, jnp.int32)])
    src_p = jnp.concatenate([src, jnp.full((E2P - E2,), sent, jnp.int32)])
    dst_col = dst_p.reshape(E2P, 1)
    src_col = src_p.reshape(E2P, 1)
    dst_row = dst_p.reshape(1, E2P)

    dst_e = jnp.concatenate([ei[1], jnp.full((EP - E,), sent, jnp.int32)]).reshape(EP, 1)
    src_e = jnp.concatenate([ei[0], jnp.full((EP - E,), sent, jnp.int32)]).reshape(EP, 1)

    # edge features: symmetrize + pad once to a lane-dense (E2P, 128) slab
    ef2 = _pad2d(jnp.concatenate([edge_features, edge_features], axis=0), E2P, CP)

    arb = pltpu.CompilerParams(dimension_semantics=("arbitrary",))

    # ---- EdgeConvNoNodes: node feature = mean of incident edge features ----
    node = pl.pallas_call(
        _init_conv_kernel,
        out_shape=jax.ShapeDtypeStruct((NP, CP), jnp.float32),
        grid=(E2P // TE,),
        in_specs=[
            pl.BlockSpec((1, TE), lambda i: (0, i)),     # dst (lanes)
            pl.BlockSpec((TE, CP), lambda i: (i, 0)),    # edge features
            pl.BlockSpec((NP, 1), lambda i: (0, 0)),     # inv_deg
        ],
        out_specs=pl.BlockSpec((NP, CP), lambda i: (0, 0)),
        compiler_params=arb,
    )(dst_row, ef2, inv_deg)

    # ---- residual NodeConv stack (one fused kernel per layer) ----
    for (w1, b1, w2, b2) in params["node_convs"]:
        H1P = _round_up(w1.shape[1], LANE)
        w1t = _pad2d(w1[:c_in], CP, H1P)          # applied to x_i (dst gather)
        w1b = _pad2d(w1[c_in:], CP, H1P)          # applied to x_j (src gather)
        b1p = _pad2d(b1.reshape(1, -1), 1, H1P)
        w2p = _pad2d(w2, H1P, CP)
        b2p = _pad2d(b2.reshape(1, -1), 1, CP)
        node = pl.pallas_call(
            _node_conv_kernel,
            out_shape=jax.ShapeDtypeStruct((NP, CP), jnp.float32),
            grid=(E2P // TE,),
            in_specs=[
                pl.BlockSpec((TE, 1), lambda i: (i, 0)),    # dst (sublanes)
                pl.BlockSpec((TE, 1), lambda i: (i, 0)),    # src (sublanes)
                pl.BlockSpec((1, TE), lambda i: (0, i)),    # dst (lanes)
                pl.BlockSpec((NP, CP), lambda i: (0, 0)),   # node table (resident)
                pl.BlockSpec((NP, 1), lambda i: (0, 0)),    # inv_deg
                pl.BlockSpec((CP, H1P), lambda i: (0, 0)),  # W1 top
                pl.BlockSpec((CP, H1P), lambda i: (0, 0)),  # W1 bottom
                pl.BlockSpec((1, H1P), lambda i: (0, 0)),   # b1
                pl.BlockSpec((H1P, CP), lambda i: (0, 0)),  # W2
                pl.BlockSpec((1, CP), lambda i: (0, 0)),    # b2
            ],
            out_specs=pl.BlockSpec((NP, CP), lambda i: (0, 0)),
            compiler_params=arb,
        )(dst_col, src_col, dst_row, node, inv_deg, w1t, w1b, b1p, w2p, b2p)

    # ---- EdgeConv: directed-edge MLP + symmetric fold + side loss (fused) ----
    we1, be1, we2, be2 = params["edge_conv"]
    H2P = _round_up(we1.shape[1], LANE)
    w1t = _pad2d(we1[:c_in], CP, H2P)
    w1b = _pad2d(we1[c_in:], CP, H2P)
    b1p = _pad2d(be1.reshape(1, -1), 1, H2P)
    w2p = _pad2d(we2, H2P, COP)
    b2p = _pad2d(be2.reshape(1, -1), 1, COP)
    inv_denom = 1.0 / float(E * c_out)

    edge_out_p, loss = pl.pallas_call(
        functools.partial(_edge_conv_kernel, inv_denom=inv_denom),
        out_shape=(jax.ShapeDtypeStruct((EP, COP), jnp.float32),
                   jax.ShapeDtypeStruct((1, 1), jnp.float32)),
        grid=(EP // TE,),
        in_specs=[
            pl.BlockSpec((TE, 1), lambda i: (i, 0)),
            pl.BlockSpec((TE, 1), lambda i: (i, 0)),
            pl.BlockSpec((NP, CP), lambda i: (0, 0)),
            pl.BlockSpec((CP, H2P), lambda i: (0, 0)),
            pl.BlockSpec((CP, H2P), lambda i: (0, 0)),
            pl.BlockSpec((1, H2P), lambda i: (0, 0)),
            pl.BlockSpec((H2P, COP), lambda i: (0, 0)),
            pl.BlockSpec((1, COP), lambda i: (0, 0)),
        ],
        out_specs=[
            pl.BlockSpec((TE, COP), lambda i: (i, 0)),
            pl.BlockSpec((1, 1), lambda i: (0, 0)),
        ],
        compiler_params=arb,
    )(dst_e, src_e, node, w1t, w1b, b1p, w2p, b2p)

    return edge_out_p[:E, :c_out], loss[0, 0]


# --------------------------------------------------------------------------
if __name__ == "__main__":
    key = jax.random.PRNGKey(0)
    N_NODES, E = 16, 32
    C_IN, C_OUT = 16, 8
    N_CONV_ITS, HL_FACTOR = 3, 8

    k_ef, k_ei, k_p = jax.random.split(key, 3)
    edge_features = jax.random.normal(k_ef, (E, C_IN), jnp.float32)
    edge_index = jax.random.randint(k_ei, (2, E), 0, N_NODES, dtype=jnp.int32)
    params = init_params(k_p, C_IN, C_OUT, N_CONV_ITS, HL_FACTOR)

    fwd = jax.jit(functools.partial(global_edge_gcnn_forward, n_nodes=N_NODES))
    edge_out, side_loss = fwd(params, edge_features, edge_index)
    jax.block_until_ready((edge_out, side_loss))

    assert edge_out.shape == (E, C_OUT) and edge_out.dtype == jnp.float32
    assert bool(jnp.all(jnp.isfinite(edge_out)))
    assert side_loss.shape == () and bool(jnp.isfinite(side_loss))
    print("KERNEL_OK")
</pallas_src>

<mosaic_0001>
module attributes {stable_mosaic.version = 11 : i64} {
  func.func @_init_conv_kernel(%arg0: i32, %arg1: memref<1x128xi32, #tpu.memory_space<vmem>>, %arg2: memref<128x128xf32, #tpu.memory_space<vmem>>, %arg3: memref<16x1xf32, #tpu.memory_space<vmem>>, %arg4: memref<16x128xf32, #tpu.memory_space<vmem>>) attributes {dimension_semantics = [#tpu.dimension_semantics<arbitrary>], iteration_bounds = array<i64: 1>, scalar_prefetch = 0 : i64, scratch_operands = 0 : i64, tpu.core_type = #tpu.core_type<tc>, window_params = [{transform_indices = @transform_0, window_bounds = array<i64: 1, 128>}, {transform_indices = @transform_1, window_bounds = array<i64: 128, 128>}, {pipeline_mode = #tpu.pipeline_mode<synchronous>, transform_indices = @transform_2, window_bounds = array<i64: 16, 1>}, {pipeline_mode = #tpu.pipeline_mode<synchronous>, transform_indices = @transform_3, window_bounds = array<i64: 16, 128>}]} {
    %c0_i32 = arith.constant 0 : i32
    %0 = arith.cmpi eq, %arg0, %c0_i32 : i32
    %1 = arith.extui %0 : i1 to i32
    %c0_i32_0 = arith.constant 0 : i32
    %2 = arith.cmpi ne, %1, %c0_i32_0 : i32
    scf.if %2 {
      %cst_10 = arith.constant 0.000000e+00 : f32
      %17 = vector.broadcast %cst_10 : f32 to vector<16x128xf32>
      %c0_11 = arith.constant 0 : index
      %c0_12 = arith.constant 0 : index
      %18 = vector.load %arg4[%c0_11, %c0_12] : memref<16x128xf32, #tpu.memory_space<vmem>>, vector<16x128xf32>
      tpu.vector_store %arg4[%c0_11, %c0_12], %17 {strides = array<i32>} : memref<16x128xf32, #tpu.memory_space<vmem>>, vector<16x128xf32>,
    } else {
    }
    %3 = tpu.iota {dimensions = array<i32: 0>} : vector<16x128xi32>
    %c0 = arith.constant 0 : index
    %c0_1 = arith.constant 0 : index
    %4 = vector.load %arg1[%c0, %c0_1] : memref<1x128xi32, #tpu.memory_space<vmem>>, vector<1x128xi32>
    %5 = vector.broadcast %4 : vector<1x128xi32> to vector<16x128xi32>
    %6 = arith.cmpi eq, %3, %5 : vector<16x128xi32>
    %7 = arith.extui %6 : vector<16x128xi1> to vector<16x128xi32>
    %8 = arith.sitofp %7 : vector<16x128xi32> to vector<16x128xf32>
    %c0_2 = arith.constant 0 : index
    %c0_3 = arith.constant 0 : index
    %9 = vector.load %arg4[%c0_2, %c0_3] : memref<16x128xf32, #tpu.memory_space<vmem>>, vector<16x128xf32>
    %c0_4 = arith.constant 0 : index
    %c0_5 = arith.constant 0 : index
    %10 = vector.load %arg2[%c0_4, %c0_5] : memref<128x128xf32, #tpu.memory_space<vmem>>, vector<128x128xf32>
    %cst = arith.constant dense<0.000000e+00> : vector<16x128xf32>
    %11 = tpu.matmul %8, %10, %cst {dimension_numbers = #tpu.dot_dimension_numbers<[1], [0], [0], [1], [0, 0, 1, 1], [], []>} : vector<16x128xf32>, vector<128x128xf32>, vector<16x128xf32> -> vector<16x128xf32>
    %12 = arith.addf %9, %11 : vector<16x128xf32>
    %c0_6 = arith.constant 0 : index
    %c0_7 = arith.constant 0 : index
    %13 = vector.load %arg4[%c0_6, %c0_7] : memref<16x128xf32, #tpu.memory_space<vmem>>, vector<16x128xf32>
    tpu.vector_store %arg4[%c0_6, %c0_7], %12 {strides = array<i32>} : memref<16x128xf32, #tpu.memory_space<vmem>>, vector<16x128xf32>,
    %c0_i32_8 = arith.constant 0 : i32
    %14 = arith.cmpi eq, %arg0, %c0_i32_8 : i32
    %15 = arith.extui %14 : i1 to i32
    %c0_i32_9 = arith.constant 0 : i32
    %16 = arith.cmpi ne, %15, %c0_i32_9 : i32
    scf.if %16 {
      %c0_10 = arith.constant 0 : index
      %c0_11 = arith.constant 0 : index
      %17 = vector.load %arg4[%c0_10, %c0_11] : memref<16x128xf32, #tpu.memory_space<vmem>>, vector<16x128xf32>
      %c0_12 = arith.constant 0 : index
      %c0_13 = arith.constant 0 : index
      %18 = vector.load %arg3[%c0_12, %c0_13] : memref<16x1xf32, #tpu.memory_space<vmem>>, vector<16x1xf32>
      %19 = vector.broadcast %18 : vector<16x1xf32> to vector<16x128xf32>
      %20 = arith.mulf %17, %19 : vector<16x128xf32>
      %c0_14 = arith.constant 0 : index
      %c0_15 = arith.constant 0 : index
      %21 = vector.load %arg4[%c0_14, %c0_15] : memref<16x128xf32, #tpu.memory_space<vmem>>, vector<16x128xf32>
      tpu.vector_store %arg4[%c0_14, %c0_15], %20 {strides = array<i32>} : memref<16x128xf32, #tpu.memory_space<vmem>>, vector<16x128xf32>,
    } else {
    }
    return
  }
  func.func @transform_0(%arg0: i32) -> (i32, i32) {
    %c0_i32 = arith.constant 0 : i32
    %c0_i32_0 = arith.constant 0 : i32
    return %c0_i32, %arg0 : i32, i32
  }
  func.func @transform_1(%arg0: i32) -> (i32, i32) {
    %c0_i32 = arith.constant 0 : i32
    %c0_i32_0 = arith.constant 0 : i32
    return %arg0, %c0_i32 : i32, i32
  }
  func.func @transform_2(%arg0: i32) -> (i32, i32) {
    %c0_i32 = arith.constant 0 : i32
    %c0_i32_0 = arith.constant 0 : i32
    %c0_i32_1 = arith.constant 0 : i32
    return %c0_i32, %c0_i32_0 : i32, i32
  }
  func.func @transform_3(%arg0: i32) -> (i32, i32) {
    %c0_i32 = arith.constant 0 : i32
    %c0_i32_0 = arith.constant 0 : i32
    %c0_i32_1 = arith.constant 0 : i32
    return %c0_i32, %c0_i32_0 : i32, i32
  }
}

module attributes {stable_mosaic.version = 11 : i64} {
  func.func @_node_conv_kernel(%arg0: i32, %arg1: memref<128x1xi32, #tpu.memory_space<vmem>>, %arg2: memref<128x1xi32, #tpu.memory_space<vmem>>, %arg3: memref<1x128xi32, #tpu.memory_space<vmem>>, %arg4: memref<16x128xf32, #tpu.memory_space<vmem>>, %arg5: memref<16x1xf32, #tpu.memory_space<vmem>>, %arg6: memref<128x128xf32, #tpu.memory_space<vmem>>, %arg7: memref<128x128xf32, #tpu.memory_space<vmem>>, %arg8: memref<1x128xf32, #tpu.memory_space<vmem>>, %arg9: memref<128x128xf32, #tpu.memory_space<vmem>>, %arg10: memref<1x128xf32, #tpu.memory_space<vmem>>, %arg11: memref<16x128xf32, #tpu.memory_space<vmem>>) attributes {dimension_semantics = [#tpu.dimension_semantics<arbitrary>], iteration_bounds = array<i64: 1>, scalar_prefetch = 0 : i64, scratch_operands = 0 : i64, tpu.core_type = #tpu.core_type<tc>, window_params = [{transform_indices = @transform_0, window_bounds = array<i64: 128, 1>}, {transform_indices = @transform_1, window_bounds = array<i64: 128, 1>}, {transform_indices = @transform_2, window_bounds = array<i64: 1, 128>}, {pipeline_mode = #tpu.pipeline_mode<synchronous>, transform_indices = @transform_3, window_bounds = array<i64: 16, 128>}, {pipeline_mode = #tpu.pipeline_mode<synchronous>, transform_indices = @transform_4, window_bounds = array<i64: 16, 1>}, {pipeline_mode = #tpu.pipeline_mode<synchronous>, transform_indices = @transform_5, window_bounds = array<i64: 128, 128>}, {pipeline_mode = #tpu.pipeline_mode<synchronous>, transform_indices = @transform_6, window_bounds = array<i64: 128, 128>}, {pipeline_mode = #tpu.pipeline_mode<synchronous>, transform_indices = @transform_7, window_bounds = array<i64: 1, 128>}, {pipeline_mode = #tpu.pipeline_mode<synchronous>, transform_indices = @transform_8, window_bounds = array<i64: 128, 128>}, {pipeline_mode = #tpu.pipeline_mode<synchronous>, transform_indices = @transform_9, window_bounds = array<i64: 1, 128>}, {pipeline_mode = #tpu.pipeline_mode<synchronous>, transform_indices = @transform_10, window_bounds = array<i64: 16, 128>}]} {
    %c0_i32 = arith.constant 0 : i32
    %0 = arith.cmpi eq, %arg0, %c0_i32 : i32
    %1 = arith.extui %0 : i1 to i32
    %c0_i32_0 = arith.constant 0 : i32
    %2 = arith.cmpi ne, %1, %c0_i32_0 : i32
    scf.if %2 {
      %cst_31 = arith.constant 0.000000e+00 : f32
      %48 = vector.broadcast %cst_31 : f32 to vector<16x128xf32>
      %c0_32 = arith.constant 0 : index
      %c0_33 = arith.constant 0 : index
      %49 = vector.load %arg11[%c0_32, %c0_33] : memref<16x128xf32, #tpu.memory_space<vmem>>, vector<16x128xf32>
      tpu.vector_store %arg11[%c0_32, %c0_33], %48 {strides = array<i32>} : memref<16x128xf32, #tpu.memory_space<vmem>>, vector<16x128xf32>,
    } else {
    }
    %c0 = arith.constant 0 : index
    %c0_1 = arith.constant 0 : index
    %3 = vector.load %arg4[%c0, %c0_1] : memref<16x128xf32, #tpu.memory_space<vmem>>, vector<16x128xf32>
    %4 = tpu.iota {dimensions = array<i32: 1>} : vector<128x16xi32>
    %c0_2 = arith.constant 0 : index
    %c0_3 = arith.constant 0 : index
    %5 = vector.load %arg1[%c0_2, %c0_3] : memref<128x1xi32, #tpu.memory_space<vmem>>, vector<128x1xi32>
    %6 = vector.broadcast %5 : vector<128x1xi32> to vector<128x16xi32>
    %7 = arith.cmpi eq, %4, %6 : vector<128x16xi32>
    %8 = arith.extui %7 : vector<128x16xi1> to vector<128x16xi32>
    %9 = arith.sitofp %8 : vector<128x16xi32> to vector<128x16xf32>
    %c0_4 = arith.constant 0 : index
    %c0_5 = arith.constant 0 : index
    %10 = vector.load %arg2[%c0_4, %c0_5] : memref<128x1xi32, #tpu.memory_space<vmem>>, vector<128x1xi32>
    %11 = vector.broadcast %10 : vector<128x1xi32> to vector<128x16xi32>
    %12 = arith.cmpi eq, %4, %11 : vector<128x16xi32>
    %13 = arith.extui %12 : vector<128x16xi1> to vector<128x16xi32>
    %14 = arith.sitofp %13 : vector<128x16xi32> to vector<128x16xf32>
    %cst = arith.constant dense<0.000000e+00> : vector<128x128xf32>
    %15 = tpu.matmul %9, %3, %cst {dimension_numbers = #tpu.dot_dimension_numbers<[1], [0], [0], [1], [0, 0, 1, 1], [], []>} : vector<128x16xf32>, vector<16x128xf32>, vector<128x128xf32> -> vector<128x128xf32>
    %cst_6 = arith.constant dense<0.000000e+00> : vector<128x128xf32>
    %16 = tpu.matmul %14, %3, %cst_6 {dimension_numbers = #tpu.dot_dimension_numbers<[1], [0], [0], [1], [0, 0, 1, 1], [], []>} : vector<128x16xf32>, vector<16x128xf32>, vector<128x128xf32> -> vector<128x128xf32>
    %c0_7 = arith.constant 0 : index
    %c0_8 = arith.constant 0 : index
    %17 = vector.load %arg6[%c0_7, %c0_8] : memref<128x128xf32, #tpu.memory_space<vmem>>, vector<128x128xf32>
    %cst_9 = arith.constant dense<0.000000e+00> : vector<128x128xf32>
    %18 = tpu.matmul %15, %17, %cst_9 {dimension_numbers = #tpu.dot_dimension_numbers<[1], [0], [0], [1], [0, 0, 1, 1], [], []>} : vector<128x128xf32>, vector<128x128xf32>, vector<128x128xf32> -> vector<128x128xf32>
    %c0_10 = arith.constant 0 : index
    %c0_11 = arith.constant 0 : index
    %19 = vector.load %arg7[%c0_10, %c0_11] : memref<128x128xf32, #tpu.memory_space<vmem>>, vector<128x128xf32>
    %cst_12 = arith.constant dense<0.000000e+00> : vector<128x128xf32>
    %20 = tpu.matmul %16, %19, %cst_12 {dimension_numbers = #tpu.dot_dimension_numbers<[1], [0], [0], [1], [0, 0, 1, 1], [], []>} : vector<128x128xf32>, vector<128x128xf32>, vector<128x128xf32> -> vector<128x128xf32>
    %21 = arith.addf %18, %20 : vector<128x128xf32>
    %c0_13 = arith.constant 0 : index
    %c0_14 = arith.constant 0 : index
    %22 = vector.load %arg8[%c0_13, %c0_14] : memref<1x128xf32, #tpu.memory_space<vmem>>, vector<1x128xf32>
    %23 = vector.broadcast %22 : vector<1x128xf32> to vector<128x128xf32>
    %24 = arith.addf %21, %23 : vector<128x128xf32>
    %cst_15 = arith.constant 0.000000e+00 : f32
    %25 = vector.broadcast %cst_15 : f32 to vector<128x128xf32>
    %26 = arith.cmpf ogt, %24, %25 : vector<128x128xf32>
    %cst_16 = arith.constant 0.00999999977 : f32
    %27 = vector.broadcast %cst_16 : f32 to vector<128x128xf32>
    %28 = arith.mulf %27, %24 : vector<128x128xf32>
    %29 = arith.select %26, %24, %28 : vector<128x128xi1>, vector<128x128xf32>
    %c0_17 = arith.constant 0 : index
    %c0_18 = arith.constant 0 : index
    %30 = vector.load %arg9[%c0_17, %c0_18] : memref<128x128xf32, #tpu.memory_space<vmem>>, vector<128x128xf32>
    %cst_19 = arith.constant dense<0.000000e+00> : vector<128x128xf32>
    %31 = tpu.matmul %29, %30, %cst_19 {dimension_numbers = #tpu.dot_dimension_numbers<[1], [0], [0], [1], [0, 0, 1, 1], [], []>} : vector<128x128xf32>, vector<128x128xf32>, vector<128x128xf32> -> vector<128x128xf32>
    %c0_20 = arith.constant 0 : index
    %c0_21 = arith.constant 0 : index
    %32 = vector.load %arg10[%c0_20, %c0_21] : memref<1x128xf32, #tpu.memory_space<vmem>>, vector<1x128xf32>
    %33 = vector.broadcast %32 : vector<1x128xf32> to vector<128x128xf32>
    %34 = arith.addf %31, %33 : vector<128x128xf32>
    %35 = tpu.iota {dimensions = array<i32: 0>} : vector<16x128xi32>
    %c0_22 = arith.constant 0 : index
    %c0_23 = arith.constant 0 : index
    %36 = vector.load %arg3[%c0_22, %c0_23] : memref<1x128xi32, #tpu.memory_space<vmem>>, vector<1x128xi32>
    %37 = vector.broadcast %36 : vector<1x128xi32> to vector<16x128xi32>
    %38 = arith.cmpi eq, %35, %37 : vector<16x128xi32>
    %39 = arith.extui %38 : vector<16x128xi1> to vector<16x128xi32>
    %40 = arith.sitofp %39 : vector<16x128xi32> to vector<16x128xf32>
    %c0_24 = arith.constant 0 : index
    %c0_25 = arith.constant 0 : index
    %41 = vector.load %arg11[%c0_24, %c0_25] : memref<16x128xf32, #tpu.memory_space<vmem>>, vector<16x128xf32>
    %cst_26 = arith.constant dense<0.000000e+00> : vector<16x128xf32>
    %42 = tpu.matmul %40, %34, %cst_26 {dimension_numbers = #tpu.dot_dimension_numbers<[1], [0], [0], [1], [0, 0, 1, 1], [], []>} : vector<16x128xf32>, vector<128x128xf32>, vector<16x128xf32> -> vector<16x128xf32>
    %43 = arith.addf %41, %42 : vector<16x128xf32>
    %c0_27 = arith.constant 0 : index
    %c0_28 = arith.constant 0 : index
    %44 = vector.load %arg11[%c0_27, %c0_28] : memref<16x128xf32, #tpu.memory_space<vmem>>, vector<16x128xf32>
    tpu.vector_store %arg11[%c0_27, %c0_28], %43 {strides = array<i32>} : memref<16x128xf32, #tpu.memory_space<vmem>>, vector<16x128xf32>,
    %c0_i32_29 = arith.constant 0 : i32
    %45 = arith.cmpi eq, %arg0, %c0_i32_29 : i32
    %46 = arith.extui %45 : i1 to i32
    %c0_i32_30 = arith.constant 0 : i32
    %47 = arith.cmpi ne, %46, %c0_i32_30 : i32
    scf.if %47 {
      %c0_31 = arith.constant 0 : index
      %c0_32 = arith.constant 0 : index
      %48 = vector.load %arg4[%c0_31, %c0_32] : memref<16x128xf32, #tpu.memory_space<vmem>>, vector<16x128xf32>
      %c0_33 = arith.constant 0 : index
      %c0_34 = arith.constant 0 : index
      %49 = vector.load %arg5[%c0_33, %c0_34] : memref<16x1xf32, #tpu.memory_space<vmem>>, vector<16x1xf32>
      %c0_35 = arith.constant 0 : index
      %c0_36 = arith.constant 0 : index
      %50 = vector.load %arg11[%c0_35, %c0_36] : memref<16x128xf32, #tpu.memory_space<vmem>>, vector<16x128xf32>
      %51 = vector.broadcast %49 : vector<16x1xf32> to vector<16x128xf32>
      %52 = arith.mulf %51, %50 : vector<16x128xf32>
      %53 = arith.addf %48, %52 : vector<16x128xf32>
      %c0_37 = arith.constant 0 : index
      %c0_38 = arith.constant 0 : index
      %54 = vector.load %arg11[%c0_37, %c0_38] : memref<16x128xf32, #tpu.memory_space<vmem>>, vector<16x128xf32>
      tpu.vector_store %arg11[%c0_37, %c0_38], %53 {strides = array<i32>} : memref<16x128xf32, #tpu.memory_space<vmem>>, vector<16x128xf32>,
    } else {
    }
    return
  }
  func.func @transform_0(%arg0: i32) -> (i32, i32) {
    %c0_i32 = arith.constant 0 : i32
    %c0_i32_0 = arith.constant 0 : i32
    return %arg0, %c0_i32 : i32, i32
  }
  func.func @transform_1(%arg0: i32) -> (i32, i32) {
    %c0_i32 = arith.constant 0 : i32
    %c0_i32_0 = arith.constant 0 : i32
    return %arg0, %c0_i32 : i32, i32
  }
  func.func @transform_2(%arg0: i32) -> (i32, i32) {
    %c0_i32 = arith.constant 0 : i32
    %c0_i32_0 = arith.constant 0 : i32
    return %c0_i32, %arg0 : i32, i32
  }
  func.func @transform_3(%arg0: i32) -> (i32, i32) {
    %c0_i32 = arith.constant 0 : i32
    %c0_i32_0 = arith.constant 0 : i32
    %c0_i32_1 = arith.constant 0 : i32
    return %c0_i32, %c0_i32_0 : i32, i32
  }
  func.func @transform_4(%arg0: i32) -> (i32, i32) {
    %c0_i32 = arith.constant 0 : i32
    %c0_i32_0 = arith.constant 0 : i32
    %c0_i32_1 = arith.constant 0 : i32
    return %c0_i32, %c0_i32_0 : i32, i32
  }
  func.func @transform_5(%arg0: i32) -> (i32, i32) {
    %c0_i32 = arith.constant 0 : i32
    %c0_i32_0 = arith.constant 0 : i32
    %c0_i32_1 = arith.constant 0 : i32
    return %c0_i32, %c0_i32_0 : i32, i32
  }
  func.func @transform_6(%arg0: i32) -> (i32, i32) {
    %c0_i32 = arith.constant 0 : i32
    %c0_i32_0 = arith.constant 0 : i32
    %c0_i32_1 = arith.constant 0 : i32
    return %c0_i32, %c0_i32_0 : i32, i32
  }
  func.func @transform_7(%arg0: i32) -> (i32, i32) {
    %c0_i32 = arith.constant 0 : i32
    %c0_i32_0 = arith.constant 0 : i32
    %c0_i32_1 = arith.constant 0 : i32
    return %c0_i32, %c0_i32_0 : i32, i32
  }
  func.func @transform_8(%arg0: i32) -> (i32, i32) {
    %c0_i32 = arith.constant 0 : i32
    %c0_i32_0 = arith.constant 0 : i32
    %c0_i32_1 = arith.constant 0 : i32
    return %c0_i32, %c0_i32_0 : i32, i32
  }
  func.func @transform_9(%arg0: i32) -> (i32, i32) {
    %c0_i32 = arith.constant 0 : i32
    %c0_i32_0 = arith.constant 0 : i32
    %c0_i32_1 = arith.constant 0 : i32
    return %c0_i32, %c0_i32_0 : i32, i32
  }
  func.func @transform_10(%arg0: i32) -> (i32, i32) {
    %c0_i32 = arith.constant 0 : i32
    %c0_i32_0 = arith.constant 0 : i32
    %c0_i32_1 = arith.constant 0 : i32
    return %c0_i32, %c0_i32_0 : i32, i32
  }
}

module attributes {stable_mosaic.version = 11 : i64} {
  func.func @_edge_conv_kernel(%arg0: i32, %arg1: memref<128x1xi32, #tpu.memory_space<vmem>>, %arg2: memref<128x1xi32, #tpu.memory_space<vmem>>, %arg3: memref<16x128xf32, #tpu.memory_space<vmem>>, %arg4: memref<128x128xf32, #tpu.memory_space<vmem>>, %arg5: memref<128x128xf32, #tpu.memory_space<vmem>>, %arg6: memref<1x128xf32, #tpu.memory_space<vmem>>, %arg7: memref<128x128xf32, #tpu.memory_space<vmem>>, %arg8: memref<1x128xf32, #tpu.memory_space<vmem>>, %arg9: memref<128x128xf32, #tpu.memory_space<vmem>>, %arg10: memref<1x1xf32, #tpu.memory_space<vmem>>) attributes {dimension_semantics = [#tpu.dimension_semantics<arbitrary>], iteration_bounds = array<i64: 1>, scalar_prefetch = 0 : i64, scratch_operands = 0 : i64, tpu.core_type = #tpu.core_type<tc>, window_params = [{transform_indices = @transform_0, window_bounds = array<i64: 128, 1>}, {transform_indices = @transform_1, window_bounds = array<i64: 128, 1>}, {pipeline_mode = #tpu.pipeline_mode<synchronous>, transform_indices = @transform_2, window_bounds = array<i64: 16, 128>}, {pipeline_mode = #tpu.pipeline_mode<synchronous>, transform_indices = @transform_3, window_bounds = array<i64: 128, 128>}, {pipeline_mode = #tpu.pipeline_mode<synchronous>, transform_indices = @transform_4, window_bounds = array<i64: 128, 128>}, {pipeline_mode = #tpu.pipeline_mode<synchronous>, transform_indices = @transform_5, window_bounds = array<i64: 1, 128>}, {pipeline_mode = #tpu.pipeline_mode<synchronous>, transform_indices = @transform_6, window_bounds = array<i64: 128, 128>}, {pipeline_mode = #tpu.pipeline_mode<synchronous>, transform_indices = @transform_7, window_bounds = array<i64: 1, 128>}, {transform_indices = @transform_8, window_bounds = array<i64: 128, 128>}, {pipeline_mode = #tpu.pipeline_mode<synchronous>, transform_indices = @transform_9, window_bounds = array<i64: 1, 1>}]} {
    %c0_i32 = arith.constant 0 : i32
    %0 = arith.cmpi eq, %arg0, %c0_i32 : i32
    %1 = arith.extui %0 : i1 to i32
    %c0_i32_0 = arith.constant 0 : i32
    %2 = arith.cmpi ne, %1, %c0_i32_0 : i32
    scf.if %2 {
      %cst_47 = arith.constant 0.000000e+00 : f32
      %68 = vector.broadcast %cst_47 : f32 to vector<1x1xf32>
      %c0_48 = arith.constant 0 : index
      %c0_49 = arith.constant 0 : index
      %69 = vector.load %arg10[%c0_48, %c0_49] : memref<1x1xf32, #tpu.memory_space<vmem>>, vector<1x1xf32>
      tpu.vector_store %arg10[%c0_48, %c0_49], %68 {strides = array<i32>} : memref<1x1xf32, #tpu.memory_space<vmem>>, vector<1x1xf32>,
    } else {
    }
    %c0 = arith.constant 0 : index
    %c0_1 = arith.constant 0 : index
    %3 = vector.load %arg3[%c0, %c0_1] : memref<16x128xf32, #tpu.memory_space<vmem>>, vector<16x128xf32>
    %4 = tpu.iota {dimensions = array<i32: 1>} : vector<128x16xi32>
    %c0_2 = arith.constant 0 : index
    %c0_3 = arith.constant 0 : index
    %5 = vector.load %arg1[%c0_2, %c0_3] : memref<128x1xi32, #tpu.memory_space<vmem>>, vector<128x1xi32>
    %6 = vector.broadcast %5 : vector<128x1xi32> to vector<128x16xi32>
    %7 = arith.cmpi eq, %4, %6 : vector<128x16xi32>
    %8 = arith.extui %7 : vector<128x16xi1> to vector<128x16xi32>
    %9 = arith.sitofp %8 : vector<128x16xi32> to vector<128x16xf32>
    %c0_4 = arith.constant 0 : index
    %c0_5 = arith.constant 0 : index
    %10 = vector.load %arg2[%c0_4, %c0_5] : memref<128x1xi32, #tpu.memory_space<vmem>>, vector<128x1xi32>
    %11 = vector.broadcast %10 : vector<128x1xi32> to vector<128x16xi32>
    %12 = arith.cmpi eq, %4, %11 : vector<128x16xi32>
    %13 = arith.extui %12 : vector<128x16xi1> to vector<128x16xi32>
    %14 = arith.sitofp %13 : vector<128x16xi32> to vector<128x16xf32>
    %cst = arith.constant dense<0.000000e+00> : vector<128x128xf32>
    %15 = tpu.matmul %9, %3, %cst {dimension_numbers = #tpu.dot_dimension_numbers<[1], [0], [0], [1], [0, 0, 1, 1], [], []>} : vector<128x16xf32>, vector<16x128xf32>, vector<128x128xf32> -> vector<128x128xf32>
    %cst_6 = arith.constant dense<0.000000e+00> : vector<128x128xf32>
    %16 = tpu.matmul %14, %3, %cst_6 {dimension_numbers = #tpu.dot_dimension_numbers<[1], [0], [0], [1], [0, 0, 1, 1], [], []>} : vector<128x16xf32>, vector<16x128xf32>, vector<128x128xf32> -> vector<128x128xf32>
    %c0_7 = arith.constant 0 : index
    %c0_8 = arith.constant 0 : index
    %17 = vector.load %arg4[%c0_7, %c0_8] : memref<128x128xf32, #tpu.memory_space<vmem>>, vector<128x128xf32>
    %cst_9 = arith.constant dense<0.000000e+00> : vector<128x128xf32>
    %18 = tpu.matmul %15, %17, %cst_9 {dimension_numbers = #tpu.dot_dimension_numbers<[1], [0], [0], [1], [0, 0, 1, 1], [], []>} : vector<128x128xf32>, vector<128x128xf32>, vector<128x128xf32> -> vector<128x128xf32>
    %c0_10 = arith.constant 0 : index
    %c0_11 = arith.constant 0 : index
    %19 = vector.load %arg5[%c0_10, %c0_11] : memref<128x128xf32, #tpu.memory_space<vmem>>, vector<128x128xf32>
    %cst_12 = arith.constant dense<0.000000e+00> : vector<128x128xf32>
    %20 = tpu.matmul %15, %19, %cst_12 {dimension_numbers = #tpu.dot_dimension_numbers<[1], [0], [0], [1], [0, 0, 1, 1], [], []>} : vector<128x128xf32>, vector<128x128xf32>, vector<128x128xf32> -> vector<128x128xf32>
    %c0_13 = arith.constant 0 : index
    %c0_14 = arith.constant 0 : index
    %21 = vector.load %arg4[%c0_13, %c0_14] : memref<128x128xf32, #tpu.memory_space<vmem>>, vector<128x128xf32>
    %cst_15 = arith.constant dense<0.000000e+00> : vector<128x128xf32>
    %22 = tpu.matmul %16, %21, %cst_15 {dimension_numbers = #tpu.dot_dimension_numbers<[1], [0], [0], [1], [0, 0, 1, 1], [], []>} : vector<128x128xf32>, vector<128x128xf32>, vector<128x128xf32> -> vector<128x128xf32>
    %c0_16 = arith.constant 0 : index
    %c0_17 = arith.constant 0 : index
    %23 = vector.load %arg5[%c0_16, %c0_17] : memref<128x128xf32, #tpu.memory_space<vmem>>, vector<128x128xf32>
    %cst_18 = arith.constant dense<0.000000e+00> : vector<128x128xf32>
    %24 = tpu.matmul %16, %23, %cst_18 {dimension_numbers = #tpu.dot_dimension_numbers<[1], [0], [0], [1], [0, 0, 1, 1], [], []>} : vector<128x128xf32>, vector<128x128xf32>, vector<128x128xf32> -> vector<128x128xf32>
    %25 = arith.addf %18, %24 : vector<128x128xf32>
    %c0_19 = arith.constant 0 : index
    %c0_20 = arith.constant 0 : index
    %26 = vector.load %arg6[%c0_19, %c0_20] : memref<1x128xf32, #tpu.memory_space<vmem>>, vector<1x128xf32>
    %27 = vector.broadcast %26 : vector<1x128xf32> to vector<128x128xf32>
    %28 = arith.addf %25, %27 : vector<128x128xf32>
    %cst_21 = arith.constant 0.000000e+00 : f32
    %29 = vector.broadcast %cst_21 : f32 to vector<128x128xf32>
    %30 = arith.cmpf ogt, %28, %29 : vector<128x128xf32>
    %cst_22 = arith.constant 0.00999999977 : f32
    %31 = vector.broadcast %cst_22 : f32 to vector<128x128xf32>
    %32 = arith.mulf %31, %28 : vector<128x128xf32>
    %33 = arith.select %30, %28, %32 : vector<128x128xi1>, vector<128x128xf32>
    %34 = arith.addf %22, %20 : vector<128x128xf32>
    %c0_23 = arith.constant 0 : index
    %c0_24 = arith.constant 0 : index
    %35 = vector.load %arg6[%c0_23, %c0_24] : memref<1x128xf32, #tpu.memory_space<vmem>>, vector<1x128xf32>
    %36 = vector.broadcast %35 : vector<1x128xf32> to vector<128x128xf32>
    %37 = arith.addf %34, %36 : vector<128x128xf32>
    %cst_25 = arith.constant 0.000000e+00 : f32
    %38 = vector.broadcast %cst_25 : f32 to vector<128x128xf32>
    %39 = arith.cmpf ogt, %37, %38 : vector<128x128xf32>
    %cst_26 = arith.constant 0.00999999977 : f32
    %40 = vector.broadcast %cst_26 : f32 to vector<128x128xf32>
    %41 = arith.mulf %40, %37 : vector<128x128xf32>
    %42 = arith.select %39, %37, %41 : vector<128x128xi1>, vector<128x128xf32>
    %c0_27 = arith.constant 0 : index
    %c0_28 = arith.constant 0 : index
    %43 = vector.load %arg7[%c0_27, %c0_28] : memref<128x128xf32, #tpu.memory_space<vmem>>, vector<128x128xf32>
    %cst_29 = arith.constant dense<0.000000e+00> : vector<128x128xf32>
    %44 = tpu.matmul %33, %43, %cst_29 {dimension_numbers = #tpu.dot_dimension_numbers<[1], [0], [0], [1], [0, 0, 1, 1], [], []>} : vector<128x128xf32>, vector<128x128xf32>, vector<128x128xf32> -> vector<128x128xf32>
    %c0_30 = arith.constant 0 : index
    %c0_31 = arith.constant 0 : index
    %45 = vector.load %arg8[%c0_30, %c0_31] : memref<1x128xf32, #tpu.memory_space<vmem>>, vector<1x128xf32>
    %46 = vector.broadcast %45 : vector<1x128xf32> to vector<128x128xf32>
    %47 = arith.addf %44, %46 : vector<128x128xf32>
    %c0_32 = arith.constant 0 : index
    %c0_33 = arith.constant 0 : index
    %48 = vector.load %arg7[%c0_32, %c0_33] : memref<128x128xf32, #tpu.memory_space<vmem>>, vector<128x128xf32>
    %cst_34 = arith.constant dense<0.000000e+00> : vector<128x128xf32>
    %49 = tpu.matmul %42, %48, %cst_34 {dimension_numbers = #tpu.dot_dimension_numbers<[1], [0], [0], [1], [0, 0, 1, 1], [], []>} : vector<128x128xf32>, vector<128x128xf32>, vector<128x128xf32> -> vector<128x128xf32>
    %c0_35 = arith.constant 0 : index
    %c0_36 = arith.constant 0 : index
    %50 = vector.load %arg8[%c0_35, %c0_36] : memref<1x128xf32, #tpu.memory_space<vmem>>, vector<1x128xf32>
    %51 = vector.broadcast %50 : vector<1x128xf32> to vector<128x128xf32>
    %52 = arith.addf %49, %51 : vector<128x128xf32>
    %53 = arith.addf %47, %52 : vector<128x128xf32>
    %cst_37 = arith.constant 5.000000e-01 : f32
    %54 = vector.broadcast %cst_37 : f32 to vector<128x128xf32>
    %55 = arith.mulf %54, %53 : vector<128x128xf32>
    %c0_38 = arith.constant 0 : index
    %c0_39 = arith.constant 0 : index
    %56 = vector.load %arg9[%c0_38, %c0_39] : memref<128x128xf32, #tpu.memory_space<vmem>>, vector<128x128xf32>
    tpu.vector_store %arg9[%c0_38, %c0_39], %55 {strides = array<i32>} : memref<128x128xf32, #tpu.memory_space<vmem>>, vector<128x128xf32>,
    %57 = arith.subf %47, %52 : vector<128x128xf32>
    %58 = arith.mulf %57, %57 : vector<128x128xf32>
    %cst_40 = arith.constant dense<0.000000e+00> : vector<128xf32>
    %59 = vector.multi_reduction <add>, %58, %cst_40 [1] : vector<128x128xf32> to vector<128xf32>
    %60 = vector.shape_cast %59 : vector<128xf32> to vector<128x1xf32>
    %cst_41 = arith.constant dense<0.000000e+00> : vector<1xf32>
    %61 = vector.multi_reduction <add>, %60, %cst_41 [0] : vector<128x1xf32> to vector<1xf32>
    %62 = vector.shape_cast %61 : vector<1xf32> to vector<1x1xf32>
    %c0_42 = arith.constant 0 : index
    %c0_43 = arith.constant 0 : index
    %63 = vector.load %arg10[%c0_42, %c0_43] : memref<1x1xf32, #tpu.memory_space<vmem>>, vector<1x1xf32>
    %cst_44 = arith.constant 3.906250e-03 : f32
    %64 = vector.broadcast %cst_44 : f32 to vector<1x1xf32>
    %65 = arith.mulf %62, %64 : vector<1x1xf32>
    %66 = arith.addf %63, %65 : vector<1x1xf32>
    %c0_45 = arith.constant 0 : index
    %c0_46 = arith.constant 0 : index
    %67 = vector.load %arg10[%c0_45, %c0_46] : memref<1x1xf32, #tpu.memory_space<vmem>>, vector<1x1xf32>
    tpu.vector_store %arg10[%c0_45, %c0_46], %66 {strides = array<i32>} : memref<1x1xf32, #tpu.memory_space<vmem>>, vector<1x1xf32>,
    return
  }
  func.func @transform_0(%arg0: i32) -> (i32, i32) {
    %c0_i32 = arith.constant 0 : i32
    %c0_i32_0 = arith.constant 0 : i32
    return %arg0, %c0_i32 : i32, i32
  }
  func.func @transform_1(%arg0: i32) -> (i32, i32) {
    %c0_i32 = arith.constant 0 : i32
    %c0_i32_0 = arith.constant 0 : i32
    return %arg0, %c0_i32 : i32, i32
  }
  func.func @transform_2(%arg0: i32) -> (i32, i32) {
    %c0_i32 = arith.constant 0 : i32
    %c0_i32_0 = arith.constant 0 : i32
    %c0_i32_1 = arith.constant 0 : i32
    return %c0_i32, %c0_i32_0 : i32, i32
  }
  func.func @transform_3(%arg0: i32) -> (i32, i32) {
    %c0_i32 = arith.constant 0 : i32
    %c0_i32_0 = arith.constant 0 : i32
    %c0_i32_1 = arith.constant 0 : i32
    return %c0_i32, %c0_i32_0 : i32, i32
  }
  func.func @transform_4(%arg0: i32) -> (i32, i32) {
    %c0_i32 = arith.constant 0 : i32
    %c0_i32_0 = arith.constant 0 : i32
    %c0_i32_1 = arith.constant 0 : i32
    return %c0_i32, %c0_i32_0 : i32, i32
  }
  func.func @transform_5(%arg0: i32) -> (i32, i32) {
    %c0_i32 = arith.constant 0 : i32
    %c0_i32_0 = arith.constant 0 : i32
    %c0_i32_1 = arith.constant 0 : i32
    return %c0_i32, %c0_i32_0 : i32, i32
  }
  func.func @transform_6(%arg0: i32) -> (i32, i32) {
    %c0_i32 = arith.constant 0 : i32
    %c0_i32_0 = arith.constant 0 : i32
    %c0_i32_1 = arith.constant 0 : i32
    return %c0_i32, %c0_i32_0 : i32, i32
  }
  func.func @transform_7(%arg0: i32) -> (i32, i32) {
    %c0_i32 = arith.constant 0 : i32
    %c0_i32_0 = arith.constant 0 : i32
    %c0_i32_1 = arith.constant 0 : i32
    return %c0_i32, %c0_i32_0 : i32, i32
  }
  func.func @transform_8(%arg0: i32) -> (i32, i32) {
    %c0_i32 = arith.constant 0 : i32
    %c0_i32_0 = arith.constant 0 : i32
    return %arg0, %c0_i32 : i32, i32
  }
  func.func @transform_9(%arg0: i32) -> (i32, i32) {
    %c0_i32 = arith.constant 0 : i32
    %c0_i32_0 = arith.constant 0 : i32
    %c0_i32_1 = arith.constant 0 : i32
    return %c0_i32, %c0_i32_0 : i32, i32
  }
}

</mosaic_0001>

<bundles_post_ra>
// kernel: global_edge_gcnn_forward.5
= control target key start
LH: loop header
LB: loop body
LE: loop exit
PB: predicated region body
PF: predicated region fallthrough
CT: control target
= control target key end

     0   :  { %v126_v2 = vmov 0   ;;  %v20_v13 = vlaneseq  ;;  %v127_v23 = vmov 1.0   ;;  %s211_s1 = inlined_call_operand.vmem [shape: f32[128,128], index: 1, kind: input, shape index: {}]   ;;  %s212_s2 = inlined_call_operand.vmem [shape: f32[16,1], index: 2, kind: input, shape index: {}]   ;;  %s213_s0 = inlined_call_operand.vmem [shape: s32[1,128], index: 0, kind: input, shape index: {}]   ;;  %s214_s3 = inlined_call_operand.vmem [shape: f32[16,128], index: 3, kind: output, shape index: {}]  }
   0x1   :  { %v48_v0 = vld [vmem:[%s211_s1 + $0x78] sm:$0xff]  ;;  %v47_v1 = vld [vmem:[%s211_s1 + $0x70] sm:$0xff]  ;;  %124 = vset.pattern.permute.xlu0 %v126_v2  ;;  %v46_v3 = vld [vmem:[%s211_s1 + $0x68] sm:$0xff] }
   0x2   :  { %49 = vmatpush.msra.mxu0 %v48_v0  ;;  %105 = vmatpush.msra.mxu1 %v48_v0  ;;  %v45_v4 = vld [vmem:[%s211_s1 + $0x60] sm:$0xff]  ;;  %v44_v5 = vld [vmem:[%s211_s1 + $0x58] sm:$0xff]  ;;  %v43_v7 = vld [vmem:[%s211_s1 + $0x50] sm:$0xff]  ;;  %v21_v16 = vshrl.u32 %v20_v13, 7 }
   0x3   :  { %v81_v6 = vld [vmem:[%s212_s2] sm:$0xff]  ;;  %v42_v8 = vld [vmem:[%s211_s1 + $0x48] sm:$0xff]  ;;  %v40_v11 = vld [vmem:[%s211_s1 + $0x38] sm:$0xff] }
   0x4   :  { %50 = vmatpush.msra.mxu0 %v47_v1  ;;  %106 = vmatpush.msra.mxu1 %v47_v1  ;;  %v41_v9 = vld [vmem:[%s211_s1 + $0x40] sm:$0xff]  ;;  %v82_v10 = vld [vmem:[%s212_s2 + $0x8] sm:$0xff]  ;;  %v39_v12 = vld [vmem:[%s211_s1 + $0x30] sm:$0xff]  ;;  %v22_v20 = vadd.s32 8, %v21_v16 }
   0x5   :  { %85 = vperm.xlu0 %124, %v81_v6   ;;  %v38_v14 = vld [vmem:[%s211_s1 + $0x28] sm:$0xff]  ;;  %v37_v15 = vld [vmem:[%s211_s1 + $0x20] sm:$0xff]  ;;  %v36_v17 = vld [vmem:[%s211_s1 + $0x18] sm:$0xff] }
   0x6   :  { %51 = vmatpush.msra.mxu0 %v46_v3  ;;  %107 = vmatpush.msra.mxu1 %v46_v3  ;;  %v35_v18 = vld [vmem:[%s211_s1 + $0x10] sm:$0xff]  ;;  %v125_v19 = vld [vmem:[%s213_s0] ss:$0 sm:$0xff]  ;;  %v34_v21 = vld [vmem:[%s211_s1 + $0x8] sm:$0xff] }
   0x7   :  { %v33_v22 = vld [vmem:[%s211_s1] sm:$0xff]  ;;  %vm25_vm0 = vcmp.eq.s32.totalorder %v21_v16, %v125_v19  ;;  %vm26_vm1 = vcmp.eq.s32.totalorder %v22_v20, %v125_v19 }
   0x8   :  { %52 = vmatpush.msra.mxu0 %v45_v4  ;;  %108 = vmatpush.msra.mxu1 %v45_v4 }
   0xa   :  { %53 = vmatpush.msra.mxu0 %v44_v5  ;;  %109 = vmatpush.msra.mxu1 %v44_v5 }
   0xc   :  { %54 = vmatpush.msra.mxu0 %v43_v7  ;;  %110 = vmatpush.msra.mxu1 %v43_v7 }
   0xd   :  { %90 = vperm.xlu0 %124, %v82_v10  }
   0xe   :  { %55 = vmatpush.msra.mxu0 %v42_v8  ;;  %111 = vmatpush.msra.mxu1 %v42_v8 }
  0x10   :  { %56 = vmatpush.msra.mxu0 %v41_v9  ;;  %112 = vmatpush.msra.mxu1 %v41_v9 }
  0x12   :  { %57 = vmatpush.msra.mxu0 %v40_v11  ;;  %113 = vmatpush.msra.mxu1 %v40_v11 }
  0x14   :  { %58 = vmatpush.msra.mxu0 %v39_v12  ;;  %114 = vmatpush.msra.mxu1 %v39_v12 }
  0x16   :  { %59 = vmatpush.msra.mxu0 %v38_v14  ;;  %115 = vmatpush.msra.mxu1 %v38_v14 }
  0x18   :  { %60 = vmatpush.msra.mxu0 %v37_v15  ;;  %116 = vmatpush.msra.mxu1 %v37_v15 }
  0x1a   :  { %61 = vmatpush.msra.mxu0 %v36_v17  ;;  %117 = vmatpush.msra.mxu1 %v36_v17 }
  0x1c   :  { %62 = vmatpush.msra.mxu0 %v35_v18  ;;  %118 = vmatpush.msra.mxu1 %v35_v18 }
  0x1e   :  { %63 = vmatpush.msra.mxu0 %v34_v21  ;;  %119 = vmatpush.msra.mxu1 %v34_v21 }
  0x20   :  { %64 = vmatpush.msra.mxu0 %v33_v22  ;;  %120 = vmatpush.msra.mxu1 %v33_v22 }
  0x21   :  { %103 = vmatmul.msk.f32.vlgmr.msra.gmra.mxu0 %vm25_vm0, %v127_v23  ;;  %104 = vmatmul.msk.f32.vlgmr.msra.gmra.mxu1 %vm26_vm1, %v127_v23 }
  0x77   :  { %v86_v24 = vpop.permute.xlu0 %85 }
  0x7f   :  { %v91_v27 = vpop.permute.xlu0 %90 }
  0x9e   :  { %v66_v25 = vpop.f32.mrf.mxu0  ;;  %v69_v26 = vpop.f32.mrf.mxu1 }
  0x9f   :  { %v93_v28 = vmul.f32 %v86_v24, %v66_v25  ;;  %v94_v29 = vmul.f32 %v91_v27, %v69_v26 }
  0xa1   :  { %95 = vst [vmem:[%s214_s3] sm:$0xff] %v93_v28 }
  0xa2   :  { %96 = vst [vmem:[%s214_s3 + $0x8] sm:$0xff] %v94_v29 }

// kernel: global_edge_gcnn_forward.6
= control target key start
LH: loop header
LB: loop body
LE: loop exit
PB: predicated region body
PF: predicated region fallthrough
CT: control target
= control target key end

     0   :  { %v981_v0 = vmov 0   ;;  %v43_v37 = vlaneseq  ;;  %v982_v40 = vmov 0.0   ;;  %vm269_vm1 = vcmask 130048   ;;  %s1457_s0 = inlined_call_operand.vmem [shape: s32[128,1], index: 0, kind: input, shape index: {}]   ;;  %s1458_s1 = inlined_call_operand.vmem [shape: s32[128,1], index: 1, kind: input, shape index: {}]   ;;  %s1459_s3 = inlined_call_operand.vmem [shape: f32[16,128], index: 3, kind: input, shape index: {}]   ;;  %s1460_s4 = inlined_call_operand.vmem [shape: f32[16,1], index: 4, kind: input, shape index: {}]   ;;  %s1461_s5 = inlined_call_operand.vmem [shape: f32[128,128], index: 5, kind: input, shape index: {}]   ;;  %s1462_s6 = inlined_call_operand.vmem [shape: f32[128,128], index: 6, kind: input, shape index: {}]   ;;  %s1463_s7 = inlined_call_operand.vmem [shape: f32[1,128], index: 7, kind: input, shape index: {}]   ;;  %s1464_s8 = inlined_call_operand.vmem [shape: f32[128,128], index: 8, kind: input, shape index: {}]   ;;  %s1465_s9 = inlined_call_operand.vmem [shape: f32[1,128], index: 9, kind: input, shape index: {}]   ;;  %s1466_s2 = inlined_call_operand.vmem [shape: s32[1,128], index: 2, kind: input, shape index: {}]   ;;  %s1467_s10 = inlined_call_operand.vmem [shape: f32[16,128], index: 10, kind: output, shape index: {}]  }
   0x1   :  { %975 = vset.pattern.permute.xlu2 %v981_v0  ;;  %974 = vset.pattern.permute.xlu1 %v981_v0  ;;  %v51_v1 = vld [vmem:[%s1457_s0 + $0x30] sm:$0xff]  ;;  %v49_v2 = vld [vmem:[%s1457_s0 + $0x20] sm:$0xff]  ;;  %v52_v4 = vld [vmem:[%s1457_s0 + $0x38] sm:$0xff] }
   0x2   :  { %v45_v3 = vld [vmem:[%s1457_s0] sm:$0xff]  ;;  %973 = vset.pattern.permute.xlu0 %v981_v0  ;;  %80 = vperm.xlu1 %974, %v51_v1   ;;  %v50_v5 = vld [vmem:[%s1457_s0 + $0x28] sm:$0xff]  ;;  %v47_v9 = vld [vmem:[%s1457_s0 + $0x10] sm:$0xff]  ;;  %v1148_v38 = vand.u32 127, %v43_v37 }
   0x3   :  { %74 = vperm.xlu0 %973, %v49_v2   ;;  %62 = vperm.xlu2 %975, %v45_v3   ;;  %v157_v6 = vld [vmem:[%s1458_s1] sm:$0xff]  ;;  %v158_v7 = vld [vmem:[%s1458_s1 + $0x8] sm:$0xff]  ;;  %v48_v10 = vld [vmem:[%s1457_s0 + $0x18] sm:$0xff] }
   0x4   :  { %v46_v8 = vld [vmem:[%s1457_s0 + $0x8] sm:$0xff]  ;;  %v159_v11 = vld [vmem:[%s1458_s1 + $0x10] sm:$0xff]  ;;  %v160_v12 = vld [vmem:[%s1458_s1 + $0x18] sm:$0xff] }
   0x5   :  { %v162_v13 = vld [vmem:[%s1458_s1 + $0x28] sm:$0xff]  ;;  %v161_v14 = vld [vmem:[%s1458_s1 + $0x20] sm:$0xff]  ;;  %v163_v15 = vld [vmem:[%s1458_s1 + $0x30] sm:$0xff] }
   0x6   :  { %v53_v16 = vld [vmem:[%s1457_s0 + $0x40] sm:$0xff]  ;;  %v164_v17 = vld [vmem:[%s1458_s1 + $0x38] sm:$0xff]  ;;  %v166_v19 = vld [vmem:[%s1458_s1 + $0x48] sm:$0xff] }
   0x7   :  { %v165_v18 = vld [vmem:[%s1458_s1 + $0x40] sm:$0xff]  ;;  %v54_v20 = vld [vmem:[%s1457_s0 + $0x48] sm:$0xff]  ;;  %v55_v21 = vld [vmem:[%s1457_s0 + $0x50] sm:$0xff] }
   0x8   :  { %v56_v22 = vld [vmem:[%s1457_s0 + $0x58] sm:$0xff]  ;;  %v167_v23 = vld [vmem:[%s1458_s1 + $0x50] sm:$0xff]  ;;  %v169_v25 = vld [vmem:[%s1458_s1 + $0x60] sm:$0xff] }
   0x9   :  { %v168_v24 = vld [vmem:[%s1458_s1 + $0x58] sm:$0xff]  ;;  %v57_v26 = vld [vmem:[%s1457_s0 + $0x60] sm:$0xff]  ;;  %v58_v27 = vld [vmem:[%s1457_s0 + $0x68] sm:$0xff] }
   0xa   :  { %83 = vperm.xlu1 %974, %v52_v4   ;;  %v59_v28 = vld [vmem:[%s1457_s0 + $0x70] sm:$0xff]  ;;  %v170_v29 = vld [vmem:[%s1458_s1 + $0x68] sm:$0xff]  ;;  %v172_v31 = vld [vmem:[%s1458_s1 + $0x78] sm:$0xff] }
   0xb   :  { %77 = vperm.xlu0 %973, %v50_v5   ;;  %174 = vperm.xlu2 %975, %v157_v6   ;;  %v171_v30 = vld [vmem:[%s1458_s1 + $0x70] sm:$0xff]  ;;  %v42_v32 = vld [vmem:[%s1459_s3 + $0x8] sm:$0xff]  ;;  %v854_v33 = vld [vmem:[%s1459_s3] sm:$0xff] }
   0xc   :  { %v60_v34 = vld [vmem:[%s1457_s0 + $0x78] sm:$0xff]  ;;  %v856_v35 = vld [vmem:[%s1460_s4] sm:$0xff]  ;;  %948 = vmatpush.msra.mxu1 %v42_v32  ;;  %332 = vmatpush.msra.mxu0 %v42_v32  ;;  %v857_v36 = vld [vmem:[%s1460_s4 + $0x8] sm:$0xff] }
   0xd   :  { %949 = vmatpush.msra.mxu2 %v42_v32  ;;  %950 = vmatpush.msra.mxu3 %v42_v32 }
   0xe   :  { %951 = vmatpush.msra.mxu1 %v854_v33  ;;  %333 = vmatpush.msra.mxu0 %v854_v33 }
   0xf   :  { %952 = vmatpush.msra.mxu2 %v854_v33  ;;  %953 = vmatpush.msra.mxu3 %v854_v33 }
  0x10   :  { %445 = vmatpush.msrb.mxu1 %v42_v32 }
  0x12   :  { %177 = vperm.xlu1 %974, %v158_v7   ;;  %446 = vmatpush.msrb.mxu1 %v854_v33 }
  0x13   :  { %65 = vperm.xlu0 %973, %v46_v8   ;;  %68 = vperm.xlu2 %975, %v47_v9  }
  0x1a   :  { %71 = vperm.xlu1 %974, %v48_v10  }
  0x1b   :  { %180 = vperm.xlu0 %973, %v159_v11   ;;  %183 = vperm.xlu2 %975, %v160_v12  }
  0x22   :  { %189 = vperm.xlu1 %974, %v162_v13  }
  0x23   :  { %186 = vperm.xlu0 %973, %v161_v14   ;;  %192 = vperm.xlu2 %975, %v163_v15  }
  0x2a   :  { %86 = vperm.xlu1 %974, %v53_v16  }
  0x2b   :  { %195 = vperm.xlu0 %973, %v164_v17   ;;  %198 = vperm.xlu2 %975, %v165_v18  }
  0x32   :  { %201 = vperm.xlu1 %974, %v166_v19  }
  0x33   :  { %89 = vperm.xlu0 %973, %v54_v20   ;;  %92 = vperm.xlu2 %975, %v55_v21   ;;  %v511_v21 = vld [vmem:[%s1461_s5 + $0x78] sm:$0xff] }
  0x34   :  { %593 = vmatpush.msrb.mxu3 %v511_v21 }
  0x3a   :  { %95 = vperm.xlu1 %974, %v56_v22  }
  0x3b   :  { %204 = vperm.xlu0 %973, %v167_v23   ;;  %207 = vperm.xlu2 %975, %v168_v24  }
  0x42   :  { %210 = vperm.xlu1 %974, %v169_v25  }
  0x43   :  { %98 = vperm.xlu0 %973, %v57_v26   ;;  %101 = vperm.xlu2 %975, %v58_v27   ;;  %v510_v27 = vld [vmem:[%s1461_s5 + $0x70] sm:$0xff] }
  0x44   :  { %594 = vmatpush.msrb.mxu3 %v510_v27 }
  0x4a   :  { %104 = vperm.xlu1 %974, %v59_v28   ;;  %v509_v28 = vld [vmem:[%s1461_s5 + $0x68] sm:$0xff] }
  0x4b   :  { %213 = vperm.xlu0 %973, %v170_v29   ;;  %216 = vperm.xlu2 %975, %v171_v30   ;;  %v508_v29 = vld [vmem:[%s1461_s5 + $0x60] sm:$0xff]  ;;  %v507_v30 = vld [vmem:[%s1461_s5 + $0x58] sm:$0xff] }
  0x4c   :  { %595 = vmatpush.msrb.mxu3 %v509_v28 }
  0x4e   :  { %596 = vmatpush.msrb.mxu3 %v508_v29 }
  0x50   :  { %597 = vmatpush.msrb.mxu3 %v507_v30 }
  0x52   :  { %219 = vperm.xlu1 %974, %v172_v31  }
  0x53   :  { %107 = vperm.xlu0 %973, %v60_v34   ;;  %862 = vperm.xlu2 %975, %v856_v35   ;;  %v506_v34 = vld [vmem:[%s1461_s5 + $0x50] sm:$0xff]  ;;  %v505_v35 = vld [vmem:[%s1461_s5 + $0x48] sm:$0xff] }
  0x54   :  { %598 = vmatpush.msrb.mxu3 %v506_v34 }
  0x56   :  { %599 = vmatpush.msrb.mxu3 %v505_v35 }
  0x5b   :  { %867 = vperm.xlu0 %973, %v857_v36   ;;  %v504_v36 = vld [vmem:[%s1461_s5 + $0x40] sm:$0xff] }
  0x5c   :  { %600 = vmatpush.msrb.mxu3 %v504_v36  ;;  %v739_v36 = vld [vmem:[%s1464_s8 + $0x68] sm:$0xff] }
  0x5d   :  { %v63_v39 = vpop.permute.xlu2 %62 }
  0x5e   :  { %vm109_vm0 = vcmp.eq.s32.totalorder %v1148_v38, %v63_v39  ;;  %v503_v39 = vld [vmem:[%s1461_s5 + $0x38] sm:$0xff] }
  0x5f   :  { %v880_v41 = vsel %vm109_vm0, 1.0, %v982_v40  ;;  %601 = vmatpush.msrb.mxu3 %v503_v39  ;;  %v738_v39 = vld [vmem:[%s1464_s8 + $0x60] sm:$0xff] }
  0x60   :  { %912 = vmatmul.msk.f32.vlgmr.msra.gmra.mxu0 %vm269_vm1, %v880_v41 }
  0x65   :  { %v175_v42 = vpop.permute.xlu2 %174 }
  0x66   :  { %vm221_vm8 = vcmp.eq.s32.totalorder %v1148_v38, %v175_v42  ;;  %v502_v42 = vld [vmem:[%s1461_s5 + $0x30] sm:$0xff] }
  0x67   :  { %v896_v1 = vsel %vm221_vm8, 1.0, %v982_v40  ;;  %602 = vmatpush.msrb.mxu3 %v502_v42  ;;  %v736_v42 = vld [vmem:[%s1464_s8 + $0x50] sm:$0xff] }
  0x6d   :  { %v69_v43 = vpop.permute.xlu2 %68 }
  0x6e   :  { %vm111_vm6 = vcmp.eq.s32.totalorder %v1148_v38, %v69_v43  ;;  %v501_v43 = vld [vmem:[%s1461_s5 + $0x28] sm:$0xff] }
  0x6f   :  { %v882_v58 = vsel %vm111_vm6, 1.0, %v982_v40  ;;  %603 = vmatpush.msrb.mxu3 %v501_v43 }
  0x74   :  { %v81_v44 = vpop.permute.xlu1 %80 }
  0x75   :  { %v75_v45 = vpop.permute.xlu0 %74  ;;  %v184_v46 = vpop.permute.xlu2 %183  ;;  %vm115_vm4 = vcmp.eq.s32.totalorder %v1148_v38, %v81_v44  ;;  %v500_v44 = vld [vmem:[%s1461_s5 + $0x20] sm:$0xff] }
  0x76   :  { %vm113_vm2 = vcmp.eq.s32.totalorder %v1148_v38, %v75_v45  ;;  %v886_v53 = vsel %vm115_vm4, 1.0, %v982_v40  ;;  %vm224_vm15 = vcmp.eq.s32.totalorder %v1148_v38, %v184_v46  ;;  %604 = vmatpush.msrb.mxu3 %v500_v44  ;;  %v527_v45 = vld [vmem:[%s1462_s6 + $0x78] sm:$0xff] }
  0x77   :  { %v884_v47 = vsel %vm113_vm2, 1.0, %v982_v40  ;;  %v899_v15 = vsel %vm224_vm15, 1.0, %v982_v40  ;;  %v499_v46 = vld [vmem:[%s1461_s5 + $0x18] sm:$0xff]  ;;  %528 = vmatpush.msrb.mxu2 %v527_v45  ;;  %v735_v45 = vld [vmem:[%s1464_s8 + $0x48] sm:$0xff] }
  0x78   :  { %916 = vmatmul.msk.f32.vlgmr.msra.gmra.mxu1 %vm269_vm1, %v884_v47  ;;  %605 = vmatpush.msrb.mxu3 %v499_v46  ;;  %v734_v46 = vld [vmem:[%s1464_s8 + $0x40] sm:$0xff] }
  0x7c   :  { %v84_v48 = vpop.permute.xlu1 %83 }
  0x7d   :  { %v78_v49 = vpop.permute.xlu0 %77  ;;  %v1156_v50 = vpop.permute.xlu2 %192  ;;  %vm116_vm7 = vcmp.eq.s32.totalorder %v1148_v38, %v84_v48  ;;  %v526_v48 = vld [vmem:[%s1462_s6 + $0x70] sm:$0xff] }
  0x7e   :  { %vm114_vm3 = vcmp.eq.s32.totalorder %v1148_v38, %v78_v49  ;;  %v887_v61 = vsel %vm116_vm7, 1.0, %v982_v40  ;;  %vm227_vm7 = vcmp.eq.s32.totalorder %v1148_v38, %v1156_v50  ;;  %v498_v49 = vld [vmem:[%s1461_s5 + $0x10] sm:$0xff]  ;;  %v525_v50 = vld [vmem:[%s1462_s6 + $0x68] sm:$0xff]  ;;  %529 = vmatpush.msrb.mxu2 %v526_v48 }
  0x7f   :  { %v885_v51 = vsel %vm114_vm3, 1.0, %v982_v40  ;;  %v902_v32 = vsel %vm227_vm7, 1.0, %v982_v40  ;;  %606 = vmatpush.msrb.mxu3 %v498_v49  ;;  %v732_v48 = vld [vmem:[%s1464_s8 + $0x30] sm:$0xff]  ;;  %v731_v49 = vld [vmem:[%s1464_s8 + $0x28] sm:$0xff] }
  0x80   :  { %917 = vmatmul.msk.f32.gmra.mxu1 %vm269_vm1, %v885_v51  ;;  %v497_v51 = vld [vmem:[%s1461_s5 + $0x8] sm:$0xff]  ;;  %530 = vmatpush.msrb.mxu2 %v525_v50 }
  0x81   :  { %607 = vmatpush.msrb.mxu3 %v497_v51 }
  0x84   :  { %v178_v52 = vpop.permute.xlu1 %177 }
  0x85   :  { %v66_v54 = vpop.permute.xlu0 %65  ;;  %v1163_v55 = vpop.permute.xlu2 %198  ;;  %vm222_vm10 = vcmp.eq.s32.totalorder %v1148_v38, %v178_v52  ;;  %v524_v52 = vld [vmem:[%s1462_s6 + $0x60] sm:$0xff] }
  0x86   :  { %vm110_vm5 = vcmp.eq.s32.totalorder %v1148_v38, %v66_v54  ;;  %v897_v7 = vsel %vm222_vm10, 1.0, %v982_v40  ;;  %vm229_vm10 = vcmp.eq.s32.totalorder %v1148_v38, %v1163_v55  ;;  %531 = vmatpush.msrb.mxu2 %v524_v52  ;;  %v523_v55 = vld [vmem:[%s1462_s6 + $0x58] sm:$0xff]  ;;  %v730_v52 = vld [vmem:[%s1464_s8 + $0x20] sm:$0xff] }
  0x87   :  { %v881_v56 = vsel %vm110_vm5, 1.0, %v982_v40  ;;  %v904_v47 = vsel %vm229_vm10, 1.0, %v982_v40 }
  0x88   :  { %913 = vmatmul.msk.f32.gmra.mxu0 %vm269_vm1, %v881_v56  ;;  %918 = vmatmul.msk.f32.gmra.mxu1 %vm269_vm1, %v886_v53  ;;  %v496_v53 = vld [vmem:[%s1461_s5] sm:$0xff] }
  0x89   :  { %608 = vmatpush.msrb.mxu3 %v496_v53  ;;  %532 = vmatpush.msrb.mxu2 %v523_v55  ;;  %v729_v53 = vld [vmem:[%s1464_s8 + $0x18] sm:$0xff]  ;;  %v727_v55 = vld [vmem:[%s1464_s8 + $0x8] sm:$0xff] }
  0x8c   :  { %v72_v57 = vpop.permute.xlu1 %71 }
  0x8d   :  { %v181_v59 = vpop.permute.xlu0 %180  ;;  %v93_v60 = vpop.permute.xlu2 %92  ;;  %vm112_vm9 = vcmp.eq.s32.totalorder %v1148_v38, %v72_v57  ;;  %v522_v57 = vld [vmem:[%s1462_s6 + $0x50] sm:$0xff] }
  0x8e   :  { %v883_v2 = vsel %vm112_vm9, 1.0, %v982_v40  ;;  %vm223_vm13 = vcmp.eq.s32.totalorder %v1148_v38, %v181_v59  ;;  %vm119_vm0 = vcmp.eq.s32.totalorder %v1148_v38, %v93_v60  ;;  %533 = vmatpush.msrb.mxu2 %v522_v57  ;;  %v520_v59 = vld [vmem:[%s1462_s6 + $0x40] sm:$0xff]  ;;  %v519_v60 = vld [vmem:[%s1462_s6 + $0x38] sm:$0xff] }
  0x8f   :  { %v898_v11 = vsel %vm223_vm13, 1.0, %v982_v40  ;;  %v890_v16 = vsel %vm119_vm0, 1.0, %v982_v40  ;;  %v726_v57 = vld [vmem:[%s1464_s8] sm:$0xff] }
  0x90   :  { %914 = vmatmul.msk.f32.gmra.mxu0 %vm269_vm1, %v882_v58  ;;  %919 = vmatmul.msk.f32.gmra.mxu1 %vm269_vm1, %v887_v61  ;;  %v521_v58 = vld [vmem:[%s1462_s6 + $0x48] sm:$0xff] }
  0x91   :  { %534 = vmatpush.msrb.mxu2 %v521_v58 }
  0x93   :  { %535 = vmatpush.msrb.mxu2 %v520_v59 }
  0x94   :  { %v190_v62 = vpop.permute.xlu1 %189 }
  0x95   :  { %v187_v63 = vpop.permute.xlu0 %186  ;;  %v1177_v0 = vpop.permute.xlu2 %207  ;;  %vm226_vm4 = vcmp.eq.s32.totalorder %v1148_v38, %v190_v62  ;;  %536 = vmatpush.msrb.mxu2 %v519_v60  ;;  %v518_v62 = vld [vmem:[%s1462_s6 + $0x30] sm:$0xff] }
  0x96   :  { %vm225_vm2 = vcmp.eq.s32.totalorder %v1148_v38, %v187_v63  ;;  %v901_v25 = vsel %vm226_vm4, 1.0, %v982_v40  ;;  %v517_v63 = vld [vmem:[%s1462_s6 + $0x28] sm:$0xff]  ;;  %vm232_vm13 = vcmp.eq.s32.totalorder %v1148_v38, %v1177_v0 }
  0x97   :  { %v900_v19 = vsel %vm225_vm2, 1.0, %v982_v40  ;;  %537 = vmatpush.msrb.mxu2 %v518_v62  ;;  %v513_v0 = vld [vmem:[%s1462_s6 + $0x8] sm:$0xff] }
  0x98   :  { %915 = vmatmul.msk.f32.gmra.mxu0 %vm269_vm1, %v883_v2  ;;  %928 = vmatmul.msk.f32.vlgmr.msrb.gmra.mxu1 %vm269_vm1, %v896_v1  ;;  %v516_v1 = vld [vmem:[%s1462_s6 + $0x20] sm:$0xff]  ;;  %v515_v2 = vld [vmem:[%s1462_s6 + $0x18] sm:$0xff] }
  0x99   :  { %538 = vmatpush.msrb.mxu2 %v517_v63  ;;  %v1417_v63 = vld [vmem:[%s1463_s7] ss:$0 sm:$0xff] }
  0x9b   :  { %539 = vmatpush.msrb.mxu2 %v516_v1 }
  0x9c   :  { %v87_v3 = vpop.permute.xlu1 %86 }
  0x9d   :  { %vm117_vm11 = vcmp.eq.s32.totalorder %v1148_v38, %v87_v3  ;;  %v1185_v4 = vpop.permute.xlu0 %195  ;;  %v102_v5 = vpop.permute.xlu2 %101  ;;  %v907_v3 = vsel %vm232_vm13, 1.0, %v982_v40  ;;  %540 = vmatpush.msrb.mxu2 %v515_v2 }
  0x9e   :  { %v888_v6 = vsel %vm117_vm11, 1.0, %v982_v40  ;;  %vm122_vm12 = vcmp.eq.s32.totalorder %v1148_v38, %v102_v5  ;;  %vm228_vm9 = vcmp.eq.s32.totalorder %v1148_v38, %v1185_v4  ;;  %v514_v4 = vld [vmem:[%s1462_s6 + $0x10] sm:$0xff]  ;;  %v512_v5 = vld [vmem:[%s1462_s6] sm:$0xff] }
  0x9f   :  { %v893_v8 = vsel %vm122_vm12, 1.0, %v982_v40  ;;  %920 = vmatmul.msk.f32.vlgmr.msra.gmra.mxu2 %vm269_vm1, %v888_v6  ;;  %v903_v41 = vsel %vm228_vm9, 1.0, %v982_v40 }
  0xa0   :  { %925 = vmatmul.msk.f32.vlgmr.msra.gmra.mxu3 %vm269_vm1, %v893_v8  ;;  %929 = vmatmul.msk.f32.gmra.mxu1 %vm269_vm1, %v897_v7 }
  0xa1   :  { %541 = vmatpush.msrb.mxu2 %v514_v4 }
  0xa3   :  { %542 = vmatpush.msrb.mxu2 %v513_v0 }
  0xa4   :  { %v1195_v9 = vpop.permute.xlu1 %201 }
  0xa5   :  { %v90_v10 = vpop.permute.xlu0 %89  ;;  %vm230_vm11 = vcmp.eq.s32.totalorder %v1148_v38, %v1195_v9  ;;  %543 = vmatpush.msrb.mxu2 %v512_v5 }
  0xa6   :  { %vm118_vm14 = vcmp.eq.s32.totalorder %v1148_v38, %v90_v10  ;;  %v905_v56 = vsel %vm230_vm11, 1.0, %v982_v40  ;;  %v217_v10 = vpop.permute.xlu2 %216 }
  0xa7   :  { %v889_v12 = vsel %vm118_vm14, 1.0, %v982_v40  ;;  %vm235_vm0 = vcmp.eq.s32.totalorder %v1148_v38, %v217_v10 }
  0xa8   :  { %921 = vmatmul.msk.f32.gmra.mxu2 %vm269_vm1, %v889_v12  ;;  %930 = vmatmul.msk.f32.gmra.mxu1 %vm269_vm1, %v898_v11 }
  0xac   :  { %v96_v13 = vpop.permute.xlu1 %95 }
  0xad   :  { %v1204_v14 = vpop.permute.xlu0 %204  ;;  %vm120_vm3 = vcmp.eq.s32.totalorder %v1148_v38, %v96_v13  ;;  %v910_v13 = vsel %vm235_vm0, 1.0, %v982_v40 }
  0xae   :  { %v891_v20 = vsel %vm120_vm3, 1.0, %v982_v40  ;;  %vm231_vm12 = vcmp.eq.s32.totalorder %v1148_v38, %v1204_v14 }
  0xaf   :  { %v906_v61 = vsel %vm231_vm12, 1.0, %v982_v40 }
  0xb0   :  { %922 = vmatmul.msk.f32.gmra.mxu2 %vm269_vm1, %v890_v16  ;;  %931 = vmatmul.msk.f32.gmra.mxu1 %vm269_vm1, %v899_v15 }
  0xb4   :  { %v1212_v17 = vpop.permute.xlu1 %210 }
  0xb5   :  { %v99_v18 = vpop.permute.xlu0 %98  ;;  %vm233_vm14 = vcmp.eq.s32.totalorder %v1148_v38, %v1212_v17 }
  0xb6   :  { %vm121_vm5 = vcmp.eq.s32.totalorder %v1148_v38, %v99_v18  ;;  %v908_v7 = vsel %vm233_vm14, 1.0, %v982_v40 }
  0xb7   :  { %v892_v26 = vsel %vm121_vm5, 1.0, %v982_v40 }
  0xb8   :  { %923 = vmatmul.msk.f32.gmra.mxu2 %vm269_vm1, %v891_v20  ;;  %932 = vmatmul.msk.f32.gmra.mxu1 %vm269_vm1, %v900_v19 }
  0xbc   :  { %v105_v22 = vpop.permute.xlu1 %104 }
  0xbd   :  { %vm123_vm6 = vcmp.eq.s32.totalorder %v1148_v38, %v105_v22  ;;  %v1224_v23 = vpop.permute.xlu0 %213 }
  0xbe   :  { %v894_v24 = vsel %vm123_vm6, 1.0, %v982_v40  ;;  %vm234_vm15 = vcmp.eq.s32.totalorder %v1148_v38, %v1224_v23 }
  0xbf   :  { %926 = vmatmul.msk.f32.gmra.mxu3 %vm269_vm1, %v894_v24  ;;  %v909_v9 = vsel %vm234_vm15, 1.0, %v982_v40 }
  0xc0   :  { %924 = vmatmul.msk.f32.gmra.mxu2 %vm269_vm1, %v892_v26  ;;  %933 = vmatmul.msk.f32.gmra.mxu1 %vm269_vm1, %v901_v25 }
  0xc4   :  { %v220_v14 = vpop.permute.xlu1 %219 }
  0xc5   :  { %v108_v31 = vpop.permute.xlu0 %107  ;;  %vm236_vm2 = vcmp.eq.s32.totalorder %v1148_v38, %v220_v14 }
  0xc6   :  { %vm124_vm8 = vcmp.eq.s32.totalorder %v1148_v38, %v108_v31  ;;  %v911_v17 = vsel %vm236_vm2, 1.0, %v982_v40 }
  0xc7   :  { %v895_v33 = vsel %vm124_vm8, 1.0, %v982_v40 }
  0xc8   :  { %927 = vmatmul.msk.f32.gmra.mxu3 %vm269_vm1, %v895_v33  ;;  %934 = vmatmul.msk.f32.gmra.mxu1 %vm269_vm1, %v902_v32  ;;  %v741_v32 = vld [vmem:[%s1464_s8 + $0x78] sm:$0xff]  ;;  %v740_v33 = vld [vmem:[%s1464_s8 + $0x70] sm:$0xff] }
  0xc9   :  { %746 = vmatpush.msrb.mxu0 %v741_v32 }
  0xcb   :  { %747 = vmatpush.msrb.mxu0 %v740_v33 }
  0xcd   :  { %748 = vmatpush.msrb.mxu0 %v739_v36 }
  0xcf   :  { %749 = vmatpush.msrb.mxu0 %v738_v39 }
  0xd0   :  { %935 = vmatmul.msk.f32.gmra.mxu1 %vm269_vm1, %v903_v41  ;;  %v737_v41 = vld [vmem:[%s1464_s8 + $0x58] sm:$0xff] }
  0xd1   :  { %750 = vmatpush.msrb.mxu0 %v737_v41 }
  0xd3   :  { %751 = vmatpush.msrb.mxu0 %v736_v42 }
  0xd5   :  { %752 = vmatpush.msrb.mxu0 %v735_v45 }
  0xd7   :  { %753 = vmatpush.msrb.mxu0 %v734_v46 }
  0xd8   :  { %936 = vmatmul.msk.f32.gmra.mxu1 %vm269_vm1, %v904_v47  ;;  %v733_v47 = vld [vmem:[%s1464_s8 + $0x38] sm:$0xff] }
  0xd9   :  { %754 = vmatpush.msrb.mxu0 %v733_v47 }
  0xdb   :  { %755 = vmatpush.msrb.mxu0 %v732_v48 }
  0xdd   :  { %v335_v54 = vpop.f32.mrf.mxu0  ;;  %756 = vmatpush.msrb.mxu0 %v731_v49 }
  0xde   :  { %609 = vmatmul.f32.vlgmr.msrb.gmra.mxu3 %v335_v54  ;;  %v728_v54 = vld [vmem:[%s1464_s8 + $0x10] sm:$0xff] }
  0xdf   :  { %757 = vmatpush.msrb.mxu0 %v730_v52 }
  0xe0   :  { %937 = vmatmul.msk.f32.gmra.mxu1 %vm269_vm1, %v905_v56 }
  0xe1   :  { %758 = vmatpush.msrb.mxu0 %v729_v53 }
  0xe3   :  { %759 = vmatpush.msrb.mxu0 %v728_v54 }
  0xe5   :  { %760 = vmatpush.msrb.mxu0 %v727_v55 }
  0xe7   :  { %761 = vmatpush.msrb.mxu0 %v726_v57 }
  0xe8   :  { %938 = vmatmul.msk.f32.gmra.mxu1 %vm269_vm1, %v906_v61 }
  0xf0   :  { %939 = vmatmul.msk.f32.gmra.mxu1 %vm269_vm1, %v907_v3 }
  0xf5   :  { %v347_v6 = vpop.f32.mrf.mxu1 }
  0xf8   :  { %940 = vmatmul.msk.f32.gmra.mxu1 %vm269_vm1, %v908_v7 }
  0xfd   :  { %v350_v8 = vpop.f32.mrf.mxu1 }
 0x100   :  { %941 = vmatmul.msk.f32.gmra.mxu1 %vm269_vm1, %v909_v9 }
 0x105   :  { %v338_v11 = vpop.f32.mrf.mxu0  ;;  %v353_v12 = vpop.f32.mrf.mxu1 }
 0x106   :  { %612 = vmatmul.f32.gmra.mxu3 %v338_v11 }
 0x108   :  { %942 = vmatmul.msk.f32.gmra.mxu1 %vm269_vm1, %v910_v13 }
 0x10d   :  { %v341_v15 = vpop.f32.mrf.mxu0  ;;  %v356_v16 = vpop.f32.mrf.mxu1 }
 0x10e   :  { %615 = vmatmul.f32.gmra.mxu3 %v341_v15 }
 0x110   :  { %943 = vmatmul.msk.f32.gmra.mxu1 %vm269_vm1, %v911_v17 }
 0x115   :  { %v344_v18 = vpop.f32.mrf.mxu0  ;;  %v448_v19 = vpop.f32.mrf.mxu1 }
 0x116   :  { %544 = vmatmul.f32.vlgmr.msrb.gmra.mxu2 %v448_v19  ;;  %618 = vmatmul.f32.gmra.mxu3 %v344_v18 }
 0x11d   :  { %v451_v20 = vpop.f32.mrf.mxu1 }
 0x11e   :  { %547 = vmatmul.f32.gmra.mxu2 %v451_v20  ;;  %621 = vmatmul.f32.gmra.mxu3 %v347_v6 }
 0x122   :  { %v359_v38 = vpop.f32.mrf.mxu2 }
 0x123   :  { %v374_v34 = vpop.f32.mrf.mxu3 }
 0x125   :  { %v454_v21 = vpop.f32.mrf.mxu1 }
 0x126   :  { %550 = vmatmul.f32.gmra.mxu2 %v454_v21  ;;  %624 = vmatmul.f32.gmra.mxu3 %v350_v8 }
 0x12b   :  { %v362_v24 = vpop.f32.mrf.mxu2 }
 0x12d   :  { %v457_v22 = vpop.f32.mrf.mxu1 }
 0x12e   :  { %553 = vmatmul.f32.gmra.mxu2 %v457_v22  ;;  %627 = vmatmul.f32.gmra.mxu3 %v353_v12 }
 0x133   :  { %v365_v26 = vpop.f32.mrf.mxu2 }
 0x135   :  { %v460_v23 = vpop.f32.mrf.mxu1 }
 0x136   :  { %556 = vmatmul.f32.gmra.mxu2 %v460_v23  ;;  %630 = vmatmul.f32.gmra.mxu3 %v356_v16 }
 0x13b   :  { %v368_v28 = vpop.f32.mrf.mxu2 }
 0x13d   :  { %v463_v40 = vpop.f32.mrf.mxu1 }
 0x13e   :  { %559 = vmatmul.f32.gmra.mxu2 %v463_v40  ;;  %633 = vmatmul.f32.gmra.mxu3 %v359_v38 }
 0x142   :  { %v377_v43 = vpop.f32.mrf.mxu3 }
 0x143   :  { %v371_v30 = vpop.f32.mrf.mxu2 }
 0x145   :  { %v466_v25 = vpop.f32.mrf.mxu1 }
 0x146   :  { %562 = vmatmul.f32.gmra.mxu2 %v466_v25  ;;  %636 = vmatmul.f32.gmra.mxu3 %v362_v24 }
 0x14b   :  { %v380_v50 = vpop.f32.mrf.mxu3 }
 0x14d   :  { %v469_v27 = vpop.f32.mrf.mxu1 }
 0x14e   :  { %565 = vmatmul.f32.gmra.mxu2 %v469_v27  ;;  %639 = vmatmul.f32.gmra.mxu3 %v365_v26 }
 0x155   :  { %v472_v29 = vpop.f32.mrf.mxu1 }
 0x156   :  { %568 = vmatmul.f32.gmra.mxu2 %v472_v29  ;;  %642 = vmatmul.f32.gmra.mxu3 %v368_v28 }
 0x15d   :  { %v475_v31 = vpop.f32.mrf.mxu1 }
 0x15e   :  { %571 = vmatmul.f32.gmra.mxu2 %v475_v31  ;;  %645 = vmatmul.f32.gmra.mxu3 %v371_v30 }
 0x161   :  { %v610_v58 = vpop.f32.mrf.mxu3 }
 0x165   :  { %v478_v35 = vpop.f32.mrf.mxu1 }
 0x166   :  { %574 = vmatmul.f32.gmra.mxu2 %v478_v35  ;;  %648 = vmatmul.f32.gmra.mxu3 %v374_v34 }
 0x16d   :  { %v481_v44 = vpop.f32.mrf.mxu1 }
 0x16e   :  { %577 = vmatmul.f32.gmra.mxu2 %v481_v44  ;;  %651 = vmatmul.f32.gmra.mxu3 %v377_v43 }
 0x175   :  { %v484_v51 = vpop.f32.mrf.mxu1 }
 0x176   :  { %580 = vmatmul.f32.gmra.mxu2 %v484_v51  ;;  %654 = vmatmul.f32.gmra.mxu3 %v380_v50 }
 0x17d   :  { %v487_v56 = vpop.f32.mrf.mxu1 }
 0x17e   :  { %583 = vmatmul.f32.gmra.mxu2 %v487_v56 }
 0x185   :  { %v490_v59 = vpop.f32.mrf.mxu1 }
 0x186   :  { %586 = vmatmul.f32.gmra.mxu2 %v490_v59 }
 0x189   :  { %v613_v60 = vpop.f32.mrf.mxu3 }
 0x18d   :  { %v493_v61 = vpop.f32.mrf.mxu1 }
 0x18e   :  { %589 = vmatmul.f32.gmra.mxu2 %v493_v61 }
 0x191   :  { %v616_v62 = vpop.f32.mrf.mxu3 }
 0x199   :  { %v545_v1 = vpop.f32.mrf.mxu2  ;;  %v619_v2 = vpop.f32.mrf.mxu3 }
 0x19a   :  { %v611_v3 = vadd.f32 %v610_v58, %v545_v1 }
 0x19c   :  { %v662_v4 = vadd.f32 %v1417_v63, %v611_v3 }
 0x19e   :  { %vm678_vm1 = vcmp.gt.f32.partialorder %v662_v4, 0.0  ;;  %v694_v0 = vmul.f32 0.01, %v662_v4 }
 0x1a0   :  { %v710_v5 = vsel %vm678_vm1, %v662_v4, %v694_v0 }
 0x1a1   :  { %v548_v6 = vpop.f32.mrf.mxu2  ;;  %762 = vmatmul.f32.vlgmr.msrb.gmra.mxu0 %v710_v5  ;;  %v622_v8 = vpop.f32.mrf.mxu3 }
 0x1a2   :  { %v614_v7 = vadd.f32 %v613_v60, %v548_v6 }
 0x1a4   :  { %v663_v9 = vadd.f32 %v1417_v63, %v614_v7 }
 0x1a6   :  { %vm679_vm3 = vcmp.gt.f32.partialorder %v663_v9, 0.0  ;;  %v695_v10 = vmul.f32 0.01, %v663_v9 }
 0x1a8   :  { %v711_v11 = vsel %vm679_vm3, %v663_v9, %v695_v10 }
 0x1a9   :  { %v551_v12 = vpop.f32.mrf.mxu2  ;;  %765 = vmatmul.f32.gmra.mxu0 %v711_v11  ;;  %v625_v15 = vpop.f32.mrf.mxu3 }
 0x1aa   :  { %v617_v13 = vadd.f32 %v616_v62, %v551_v12 }
 0x1ac   :  { %v664_v14 = vadd.f32 %v1417_v63, %v617_v13 }
 0x1ae   :  { %vm680_vm4 = vcmp.gt.f32.partialorder %v664_v14, 0.0  ;;  %v696_v16 = vmul.f32 0.01, %v664_v14 }
 0x1b0   :  { %v712_v17 = vsel %vm680_vm4, %v664_v14, %v696_v16 }
 0x1b1   :  { %v554_v18 = vpop.f32.mrf.mxu2  ;;  %768 = vmatmul.f32.gmra.mxu0 %v712_v17  ;;  %v628_v22 = vpop.f32.mrf.mxu3 }
 0x1b2   :  { %v620_v19 = vadd.f32 %v619_v2, %v554_v18 }
 0x1b4   :  { %v665_v20 = vadd.f32 %v1417_v63, %v620_v19 }
 0x1b6   :  { %vm681_vm5 = vcmp.gt.f32.partialorder %v665_v20, 0.0  ;;  %v697_v21 = vmul.f32 0.01, %v665_v20 }
 0x1b8   :  { %v713_v38 = vsel %vm681_vm5, %v665_v20, %v697_v21 }
 0x1b9   :  { %v557_v23 = vpop.f32.mrf.mxu2  ;;  %771 = vmatmul.f32.gmra.mxu0 %v713_v38  ;;  %v631_v27 = vpop.f32.mrf.mxu3 }
 0x1ba   :  { %v623_v40 = vadd.f32 %v622_v8, %v557_v23 }
 0x1bc   :  { %v666_v24 = vadd.f32 %v1417_v63, %v623_v40 }
 0x1be   :  { %vm682_vm6 = vcmp.gt.f32.partialorder %v666_v24, 0.0  ;;  %v698_v25 = vmul.f32 0.01, %v666_v24 }
 0x1c0   :  { %v714_v26 = vsel %vm682_vm6, %v666_v24, %v698_v25 }
 0x1c1   :  { %v560_v28 = vpop.f32.mrf.mxu2  ;;  %774 = vmatmul.f32.gmra.mxu0 %v714_v26  ;;  %v634_v35 = vpop.f32.mrf.mxu3 }
 0x1c2   :  { %v626_v29 = vadd.f32 %v625_v15, %v560_v28 }
 0x1c4   :  { %v667_v30 = vadd.f32 %v1417_v63, %v626_v29 }
 0x1c6   :  { %vm683_vm7 = vcmp.gt.f32.partialorder %v667_v30, 0.0  ;;  %v699_v31 = vmul.f32 0.01, %v667_v30 }
 0x1c8   :  { %v715_v32 = vsel %vm683_vm7, %v667_v30, %v699_v31 }
 0x1c9   :  { %v563_v33 = vpop.f32.mrf.mxu2  ;;  %777 = vmatmul.f32.gmra.mxu0 %v715_v32  ;;  %v637_v45 = vpop.f32.mrf.mxu3 }
 0x1ca   :  { %v629_v34 = vadd.f32 %v628_v22, %v563_v33 }
 0x1cc   :  { %v668_v36 = vadd.f32 %v1417_v63, %v629_v34 }
 0x1ce   :  { %vm684_vm8 = vcmp.gt.f32.partialorder %v668_v36, 0.0  ;;  %v700_v39 = vmul.f32 0.01, %v668_v36 }
 0x1d0   :  { %v716_v41 = vsel %vm684_vm8, %v668_v36, %v700_v39 }
 0x1d1   :  { %v566_v42 = vpop.f32.mrf.mxu2  ;;  %780 = vmatmul.f32.gmra.mxu0 %v716_v41  ;;  %v640_v52 = vpop.f32.mrf.mxu3 }
 0x1d2   :  { %v632_v43 = vadd.f32 %v631_v27, %v566_v42 }
 0x1d4   :  { %v669_v44 = vadd.f32 %v1417_v63, %v632_v43 }
 0x1d6   :  { %vm685_vm9 = vcmp.gt.f32.partialorder %v669_v44, 0.0  ;;  %v701_v46 = vmul.f32 0.01, %v669_v44 }
 0x1d8   :  { %v717_v47 = vsel %vm685_vm9, %v669_v44, %v701_v46  ;;  %v977_v46 = vld [vmem:[%s1465_s9] ss:$0 sm:$0xff] }
 0x1d9   :  { %v569_v48 = vpop.f32.mrf.mxu2  ;;  %783 = vmatmul.f32.gmra.mxu0 %v717_v47  ;;  %v643_v59 = vpop.f32.mrf.mxu3 }
 0x1da   :  { %v635_v49 = vadd.f32 %v634_v35, %v569_v48 }
 0x1dc   :  { %v670_v50 = vadd.f32 %v1417_v63, %v635_v49 }
 0x1de   :  { %vm686_vm10 = vcmp.gt.f32.partialorder %v670_v50, 0.0  ;;  %v702_v51 = vmul.f32 0.01, %v670_v50 }
 0x1e0   :  { %v718_v53 = vsel %vm686_vm10, %v670_v50, %v702_v51 }
 0x1e1   :  { %v572_v54 = vpop.f32.mrf.mxu2  ;;  %786 = vmatmul.f32.gmra.mxu0 %v718_v53  ;;  %v646_v0 = vpop.f32.mrf.mxu3 }
 0x1e2   :  { %v638_v55 = vadd.f32 %v637_v45, %v572_v54 }
 0x1e4   :  { %v671_v56 = vadd.f32 %v1417_v63, %v638_v55 }
 0x1e6   :  { %vm687_vm11 = vcmp.gt.f32.partialorder %v671_v56, 0.0  ;;  %v703_v57 = vmul.f32 0.01, %v671_v56 }
 0x1e8   :  { %v719_v58 = vsel %vm687_vm11, %v671_v56, %v703_v57 }
 0x1e9   :  { %v575_v60 = vpop.f32.mrf.mxu2  ;;  %789 = vmatmul.f32.gmra.mxu0 %v719_v58  ;;  %v649_v11 = vpop.f32.mrf.mxu3 }
 0x1ea   :  { %v641_v61 = vadd.f32 %v640_v52, %v575_v60  ;;  %v812_v60 = vshrl.u32 %v43_v37, 7  ;;  %v983_v37 = vmov 1.0  }
 0x1ec   :  { %v672_v62 = vadd.f32 %v1417_v63, %v641_v61 }
 0x1ee   :  { %vm688_vm12 = vcmp.gt.f32.partialorder %v672_v62, 0.0  ;;  %v704_v1 = vmul.f32 0.01, %v672_v62 }
 0x1f0   :  { %v720_v2 = vsel %vm688_vm12, %v672_v62, %v704_v1  ;;  %v978_v1 = vld [vmem:[%s1466_s2] ss:$0 sm:$0xff] }
 0x1f1   :  { %v578_v3 = vpop.f32.mrf.mxu2  ;;  %792 = vmatmul.f32.gmra.mxu0 %v720_v2  ;;  %v652_v18 = vpop.f32.mrf.mxu3  ;;  %v813_v2 = vadd.s32 8, %v812_v60  ;;  %vm816_vm1 = vcmp.eq.s32.totalorder %v812_v60, %v978_v1 }
 0x1f2   :  { %v644_v4 = vadd.f32 %v643_v59, %v578_v3 }
 0x1f3   :  { %vm817_vm3 = vcmp.eq.s32.totalorder %v813_v2, %v978_v1 }
 0x1f4   :  { %v673_v5 = vadd.f32 %v1417_v63, %v644_v4 }
 0x1f6   :  { %vm689_vm13 = vcmp.gt.f32.partialorder %v673_v5, 0.0  ;;  %v705_v6 = vmul.f32 0.01, %v673_v5 }
 0x1f8   :  { %v721_v7 = vsel %vm689_vm13, %v673_v5, %v705_v6  ;;  %v863_v6 = vpop.permute.xlu2 %862 }
 0x1f9   :  { %v581_v8 = vpop.f32.mrf.mxu2  ;;  %795 = vmatmul.f32.gmra.mxu0 %v721_v7  ;;  %v655_v40 = vpop.f32.mrf.mxu3 }
 0x1fa   :  { %v647_v9 = vadd.f32 %v646_v0, %v581_v8  ;;  %v868_v7 = vpop.permute.xlu0 %867 }
 0x1fc   :  { %v674_v10 = vadd.f32 %v1417_v63, %v647_v9 }
 0x1fe   :  { %vm690_vm14 = vcmp.gt.f32.partialorder %v674_v10, 0.0  ;;  %v706_v12 = vmul.f32 0.01, %v674_v10 }
 0x200   :  { %v722_v13 = vsel %vm690_vm14, %v674_v10, %v706_v12  ;;  %v979_v10 = vld [vmem:[%s1459_s3] sm:$0xff]  ;;  %v980_v12 = vld [vmem:[%s1459_s3 + $0x8] sm:$0xff] }
 0x201   :  { %v584_v14 = vpop.f32.mrf.mxu2  ;;  %798 = vmatmul.f32.gmra.mxu0 %v722_v13 }
 0x202   :  { %v650_v15 = vadd.f32 %v649_v11, %v584_v14 }
 0x204   :  { %v675_v16 = vadd.f32 %v1417_v63, %v650_v15 }
 0x206   :  { %vm691_vm15 = vcmp.gt.f32.partialorder %v675_v16, 0.0  ;;  %v707_v17 = vmul.f32 0.01, %v675_v16 }
 0x208   :  { %v723_v19 = vsel %vm691_vm15, %v675_v16, %v707_v17 }
 0x209   :  { %v587_v20 = vpop.f32.mrf.mxu2  ;;  %801 = vmatmul.f32.gmra.mxu0 %v723_v19 }
 0x20a   :  { %v653_v21 = vadd.f32 %v652_v18, %v587_v20 }
 0x20c   :  { %v676_v22 = vadd.f32 %v1417_v63, %v653_v21 }
 0x20e   :  { %vm692_vm0 = vcmp.gt.f32.partialorder %v676_v22, 0.0  ;;  %v708_v38 = vmul.f32 0.01, %v676_v22 }
 0x210   :  { %v724_v23 = vsel %vm692_vm0, %v676_v22, %v708_v38 }
 0x211   :  { %v590_v24 = vpop.f32.mrf.mxu2  ;;  %804 = vmatmul.f32.gmra.mxu0 %v724_v23 }
 0x212   :  { %v656_v25 = vadd.f32 %v655_v40, %v590_v24 }
 0x214   :  { %v677_v26 = vadd.f32 %v1417_v63, %v656_v25 }
 0x216   :  { %vm693_vm2 = vcmp.gt.f32.partialorder %v677_v26, 0.0  ;;  %v709_v27 = vmul.f32 0.01, %v677_v26 }
 0x218   :  { %v725_v28 = vsel %vm693_vm2, %v677_v26, %v709_v27 }
 0x219   :  { %807 = vmatmul.f32.gmra.mxu0 %v725_v28 }
 0x21e   :  { %v1435_v29 = vpop.f32.mrf.mxu0 }
 0x21f   :  { %v764_v4 = vadd.f32 %v977_v46, %v1435_v29 }
 0x226   :  { %v766_v30 = vpop.f32.mrf.mxu0 }
 0x227   :  { %v767_v3 = vadd.f32 %v977_v46, %v766_v30 }
 0x22e   :  { %v769_v31 = vpop.f32.mrf.mxu0 }
 0x22f   :  { %v770_v62 = vadd.f32 %v977_v46, %v769_v31 }
 0x236   :  { %v772_v32 = vpop.f32.mrf.mxu0 }
 0x237   :  { %v773_v61 = vadd.f32 %v977_v46, %v772_v32 }
 0x23e   :  { %v775_v33 = vpop.f32.mrf.mxu0 }
 0x23f   :  { %v776_v59 = vadd.f32 %v977_v46, %v775_v33 }
 0x246   :  { %v778_v34 = vpop.f32.mrf.mxu0 }
 0x247   :  { %v779_v58 = vadd.f32 %v977_v46, %v778_v34 }
 0x24e   :  { %v781_v35 = vpop.f32.mrf.mxu0 }
 0x24f   :  { %v782_v57 = vadd.f32 %v977_v46, %v781_v35 }
 0x256   :  { %v784_v36 = vpop.f32.mrf.mxu0 }
 0x257   :  { %v785_v56 = vadd.f32 %v977_v46, %v784_v36 }
 0x25e   :  { %v787_v39 = vpop.f32.mrf.mxu0 }
 0x25f   :  { %v788_v55 = vadd.f32 %v977_v46, %v787_v39 }
 0x266   :  { %v790_v41 = vpop.f32.mrf.mxu0 }
 0x267   :  { %v791_v54 = vadd.f32 %v977_v46, %v790_v41 }
 0x26e   :  { %v793_v42 = vpop.f32.mrf.mxu0 }
 0x26f   :  { %v794_v53 = vadd.f32 %v977_v46, %v793_v42 }
 0x276   :  { %v796_v43 = vpop.f32.mrf.mxu0 }
 0x277   :  { %v797_v52 = vadd.f32 %v977_v46, %v796_v43 }
 0x27e   :  { %v799_v44 = vpop.f32.mrf.mxu0 }
 0x27f   :  { %v800_v51 = vadd.f32 %v977_v46, %v799_v44 }
 0x286   :  { %v802_v45 = vpop.f32.mrf.mxu0 }
 0x287   :  { %v803_v50 = vadd.f32 %v977_v46, %v802_v45 }
 0x28e   :  { %v805_v63 = vpop.f32.mrf.mxu0 }
 0x28f   :  { %v806_v49 = vadd.f32 %v977_v46, %v805_v63 }
 0x296   :  { %v808_v47 = vpop.f32.mrf.mxu0 }
 0x297   :  { %v809_v48 = vadd.f32 %v977_v46, %v808_v47 }
 0x299   :  { %824 = vmatpush.msra.mxu0 %v809_v48  ;;  %954 = vmatpush.msra.mxu1 %v809_v48 }
 0x29b   :  { %825 = vmatpush.msra.mxu0 %v806_v49  ;;  %955 = vmatpush.msra.mxu1 %v806_v49 }
 0x29d   :  { %826 = vmatpush.msra.mxu0 %v803_v50  ;;  %956 = vmatpush.msra.mxu1 %v803_v50 }
 0x29f   :  { %827 = vmatpush.msra.mxu0 %v800_v51  ;;  %957 = vmatpush.msra.mxu1 %v800_v51 }
 0x2a1   :  { %828 = vmatpush.msra.mxu0 %v797_v52  ;;  %958 = vmatpush.msra.mxu1 %v797_v52 }
 0x2a3   :  { %829 = vmatpush.msra.mxu0 %v794_v53  ;;  %959 = vmatpush.msra.mxu1 %v794_v53 }
 0x2a5   :  { %830 = vmatpush.msra.mxu0 %v791_v54  ;;  %960 = vmatpush.msra.mxu1 %v791_v54 }
 0x2a7   :  { %831 = vmatpush.msra.mxu0 %v788_v55  ;;  %961 = vmatpush.msra.mxu1 %v788_v55 }
 0x2a9   :  { %832 = vmatpush.msra.mxu0 %v785_v56  ;;  %962 = vmatpush.msra.mxu1 %v785_v56 }
 0x2ab   :  { %833 = vmatpush.msra.mxu0 %v782_v57  ;;  %963 = vmatpush.msra.mxu1 %v782_v57 }
 0x2ad   :  { %834 = vmatpush.msra.mxu0 %v779_v58  ;;  %964 = vmatpush.msra.mxu1 %v779_v58 }
 0x2af   :  { %835 = vmatpush.msra.mxu0 %v776_v59  ;;  %965 = vmatpush.msra.mxu1 %v776_v59 }
 0x2b1   :  { %836 = vmatpush.msra.mxu0 %v773_v61  ;;  %966 = vmatpush.msra.mxu1 %v773_v61 }
 0x2b3   :  { %837 = vmatpush.msra.mxu0 %v770_v62  ;;  %967 = vmatpush.msra.mxu1 %v770_v62 }
 0x2b5   :  { %838 = vmatpush.msra.mxu0 %v767_v3  ;;  %968 = vmatpush.msra.mxu1 %v767_v3 }
 0x2b7   :  { %839 = vmatpush.msra.mxu0 %v764_v4  ;;  %969 = vmatpush.msra.mxu1 %v764_v4 }
 0x2b8   :  { %946 = vmatmul.msk.f32.vlgmr.msra.gmra.mxu0 %vm816_vm1, %v983_v37  ;;  %947 = vmatmul.msk.f32.vlgmr.msra.gmra.mxu1 %vm817_vm3, %v983_v37 }
 0x335   :  { %v841_v0 = vpop.f32.mrf.mxu0  ;;  %v844_v5 = vpop.f32.mrf.mxu1 }
 0x336   :  { %v870_v8 = vmul.f32 %v863_v6, %v841_v0  ;;  %v871_v9 = vmul.f32 %v868_v7, %v844_v5 }
 0x338   :  { %v872_v11 = vadd.f32 %v979_v10, %v870_v8  ;;  %v873_v13 = vadd.f32 %v980_v12, %v871_v9 }
 0x33a   :  { %874 = vst [vmem:[%s1467_s10] sm:$0xff] %v872_v11 }
 0x33b   :  { %875 = vst [vmem:[%s1467_s10 + $0x8] sm:$0xff] %v873_v13 }

// kernel: global_edge_gcnn_forward.9
= control target key start
LH: loop header
LB: loop body
LE: loop exit
PB: predicated region body
PF: predicated region fallthrough
CT: control target
= control target key end

     0   :  { %v1355_v3 = vmov 0   ;;  %s1880_s0 = inlined_call_operand.vmem [shape: s32[128,1], index: 0, kind: input, shape index: {}]   ;;  %s1881_s1 = inlined_call_operand.vmem [shape: s32[128,1], index: 1, kind: input, shape index: {}]   ;;  %s1882_s2 = inlined_call_operand.vmem [shape: f32[16,128], index: 2, kind: input, shape index: {}]   ;;  %s1883_s3 = inlined_call_operand.vmem [shape: f32[128,128], index: 3, kind: input, shape index: {}]   ;;  %s1884_s4 = inlined_call_operand.vmem [shape: f32[128,128], index: 4, kind: input, shape index: {}]   ;;  %s1885_s5 = inlined_call_operand.vmem [shape: f32[1,128], index: 5, kind: input, shape index: {}]   ;;  %s1886_s6 = inlined_call_operand.vmem [shape: f32[128,128], index: 6, kind: input, shape index: {}]   ;;  %s1887_s7 = inlined_call_operand.vmem [shape: f32[1,128], index: 7, kind: input, shape index: {}]   ;;  %s1888_s8 = inlined_call_operand.vmem [shape: f32[128,128], index: 8, kind: output, shape index: {0}]   ;;  %s1889_s9 = inlined_call_operand.hbm [shape: f32[1,1], index: 9, kind: output, shape index: {1}]  }
   0x1   :  { %v44_v0 = vld [vmem:[%s1880_s0 + $0x10] sm:$0xff]  ;;  %v43_v1 = vld [vmem:[%s1880_s0 + $0x8] sm:$0xff]  ;;  %v42_v2 = vld [vmem:[%s1880_s0] sm:$0xff]  ;;  %1326 = vset.pattern.permute.xlu2 %v1355_v3  ;;  %1325 = vset.pattern.permute.xlu1 %v1355_v3 }
   0x2   :  { %1324 = vset.pattern.permute.xlu0 %v1355_v3  ;;  %65 = vperm.xlu2 %1326, %v44_v0  }
   0x3   :  { %62 = vperm.xlu1 %1325, %v43_v1   ;;  %59 = vperm.xlu0 %1324, %v42_v2  }
   0x4   :  { %15 = vsyncpa [#allocation3], 0  ;;  %v156_v4 = vld [vmem:[%s1881_s1 + $0x10] sm:$0xff]  ;;  %v155_v5 = vld [vmem:[%s1881_s1 + $0x8] sm:$0xff]  ;;  %v40_v37 = vlaneseq  ;;  %vm266_vm0 = vcmask 130048   ;;  %v1356_v42 = vmov 0.0  }
   0x5   :  { %v154_v6 = vld [vmem:[%s1881_s1] sm:$0xff]  ;;  %v157_v8 = vld [vmem:[%s1881_s1 + $0x18] sm:$0xff]  ;;  %v159_v10 = vld [vmem:[%s1881_s1 + $0x28] sm:$0xff]  ;;  %s1214_s15 = sshll.u32 %s1889_s9, 4  ;;  %s1215_s15 = int_to_ptr.hbm [resolvable:$true] %s1214_s15 }
   0x6   :  { %v46_v7 = vld [vmem:[%s1880_s0 + $0x20] sm:$0xff]  ;;  %v45_v9 = vld [vmem:[%s1880_s0 + $0x18] sm:$0xff]  ;;  %v47_v11 = vld [vmem:[%s1880_s0 + $0x28] sm:$0xff]  ;;  %v1519_v39 = vand.u32 127, %v40_v37 }
   0x7   :  { %v158_v12 = vld [vmem:[%s1881_s1 + $0x20] sm:$0xff]  ;;  %v49_v13 = vld [vmem:[%s1880_s0 + $0x38] sm:$0xff]  ;;  %v160_v14 = vld [vmem:[%s1881_s1 + $0x30] sm:$0xff] }
   0x8   :  { %v48_v15 = vld [vmem:[%s1880_s0 + $0x30] sm:$0xff]  ;;  %v162_v16 = vld [vmem:[%s1881_s1 + $0x40] sm:$0xff]  ;;  %v161_v18 = vld [vmem:[%s1881_s1 + $0x38] sm:$0xff] }
   0x9   :  { %v50_v17 = vld [vmem:[%s1880_s0 + $0x40] sm:$0xff]  ;;  %v52_v19 = vld [vmem:[%s1880_s0 + $0x50] sm:$0xff]  ;;  %v163_v20 = vld [vmem:[%s1881_s1 + $0x48] sm:$0xff] }
   0xa   :  { %177 = vperm.xlu2 %1326, %v156_v4   ;;  %v51_v21 = vld [vmem:[%s1880_s0 + $0x48] sm:$0xff]  ;;  %v165_v22 = vld [vmem:[%s1881_s1 + $0x58] sm:$0xff]  ;;  %v164_v24 = vld [vmem:[%s1881_s1 + $0x50] sm:$0xff] }
   0xb   :  { %174 = vperm.xlu1 %1325, %v155_v5   ;;  %171 = vperm.xlu0 %1324, %v154_v6   ;;  %v53_v23 = vld [vmem:[%s1880_s0 + $0x58] sm:$0xff]  ;;  %v55_v25 = vld [vmem:[%s1880_s0 + $0x68] sm:$0xff]  ;;  %v166_v26 = vld [vmem:[%s1881_s1 + $0x60] sm:$0xff] }
   0xc   :  { %v54_v27 = vld [vmem:[%s1880_s0 + $0x60] sm:$0xff]  ;;  %v168_v28 = vld [vmem:[%s1881_s1 + $0x70] sm:$0xff]  ;;  %v167_v30 = vld [vmem:[%s1881_s1 + $0x68] sm:$0xff] }
   0xd   :  { %v56_v29 = vld [vmem:[%s1880_s0 + $0x70] sm:$0xff]  ;;  %v169_v31 = vld [vmem:[%s1881_s1 + $0x78] sm:$0xff]  ;;  %v39_v33 = vld [vmem:[%s1882_s2 + $0x8] sm:$0xff] }
   0xe   :  { %v57_v32 = vld [vmem:[%s1880_s0 + $0x78] sm:$0xff]  ;;  %329 = vmatpush.msra.mxu0 %v39_v33  ;;  %442 = vmatpush.msra.mxu1 %v39_v33  ;;  %v38_v34 = vld [vmem:[%s1882_s2] sm:$0xff]  ;;  %v507_v36 = vld [vmem:[%s1883_s3 + $0x70] sm:$0xff] }
   0xf   :  { %v508_v35 = vld [vmem:[%s1883_s3 + $0x78] sm:$0xff]  ;;  %v506_v38 = vld [vmem:[%s1883_s3 + $0x68] sm:$0xff]  ;;  %v505_v44 = vld [vmem:[%s1883_s3 + $0x60] sm:$0xff] }
  0x10   :  { %330 = vmatpush.msra.mxu0 %v38_v34  ;;  %443 = vmatpush.msra.mxu1 %v38_v34  ;;  %v504_v49 = vld [vmem:[%s1883_s3 + $0x58] sm:$0xff]  ;;  %v503_v53 = vld [vmem:[%s1883_s3 + $0x50] sm:$0xff]  ;;  %v502_v59 = vld [vmem:[%s1883_s3 + $0x48] sm:$0xff] }
  0x11   :  { %v501_v0 = vld [vmem:[%s1883_s3 + $0x40] sm:$0xff]  ;;  %v500_v4 = vld [vmem:[%s1883_s3 + $0x38] sm:$0xff] }
  0x12   :  { %71 = vperm.xlu2 %1326, %v46_v7   ;;  %655 = vmatpush.msrb.mxu0 %v508_v35  ;;  %v517_v34 = vld [vmem:[%s1884_s4 + $0x40] sm:$0xff] }
  0x13   :  { %180 = vperm.xlu1 %1325, %v157_v8   ;;  %68 = vperm.xlu0 %1324, %v45_v9  }
  0x14   :  { %788 = vmatpush.msrb.mxu1 %v508_v35  ;;  %656 = vmatpush.msrb.mxu0 %v507_v36  ;;  %v516_v35 = vld [vmem:[%s1884_s4 + $0x38] sm:$0xff] }
  0x16   :  { %789 = vmatpush.msrb.mxu1 %v507_v36  ;;  %657 = vmatpush.msrb.mxu0 %v506_v38 }
  0x18   :  { %790 = vmatpush.msrb.mxu1 %v506_v38  ;;  %658 = vmatpush.msrb.mxu0 %v505_v44 }
  0x1a   :  { %186 = vperm.xlu2 %1326, %v159_v10   ;;  %791 = vmatpush.msrb.mxu1 %v505_v44  ;;  %v499_v10 = vld [vmem:[%s1883_s3 + $0x30] sm:$0xff] }
  0x1b   :  { %74 = vperm.xlu1 %1325, %v47_v11   ;;  %183 = vperm.xlu0 %1324, %v158_v12  }
  0x1c   :  { %659 = vmatpush.msrb.mxu0 %v504_v49  ;;  %792 = vmatpush.msrb.mxu1 %v504_v49 }
  0x1e   :  { %660 = vmatpush.msrb.mxu0 %v503_v53  ;;  %793 = vmatpush.msrb.mxu1 %v503_v53 }
  0x20   :  { %661 = vmatpush.msrb.mxu0 %v502_v59  ;;  %794 = vmatpush.msrb.mxu1 %v502_v59 }
  0x22   :  { %80 = vperm.xlu2 %1326, %v49_v13   ;;  %662 = vmatpush.msrb.mxu0 %v501_v0 }
  0x23   :  { %189 = vperm.xlu1 %1325, %v160_v14   ;;  %77 = vperm.xlu0 %1324, %v48_v15   ;;  %v498_v15 = vld [vmem:[%s1883_s3 + $0x28] sm:$0xff] }
  0x24   :  { %795 = vmatpush.msrb.mxu1 %v501_v0  ;;  %663 = vmatpush.msrb.mxu0 %v500_v4 }
  0x26   :  { %796 = vmatpush.msrb.mxu1 %v500_v4  ;;  %664 = vmatpush.msrb.mxu0 %v499_v10 }
  0x28   :  { %797 = vmatpush.msrb.mxu1 %v499_v10  ;;  %665 = vmatpush.msrb.mxu0 %v498_v15  ;;  %v931_v10 = vld [vmem:[%s1886_s6 + $0x70] sm:$0xff] }
  0x2a   :  { %195 = vperm.xlu2 %1326, %v162_v16   ;;  %v524_v16 = vld [vmem:[%s1884_s4 + $0x78] sm:$0xff]  ;;  %798 = vmatpush.msrb.mxu1 %v498_v15  ;;  %v929_v15 = vld [vmem:[%s1886_s6 + $0x60] sm:$0xff] }
  0x2b   :  { %83 = vperm.xlu1 %1325, %v50_v17   ;;  %192 = vperm.xlu0 %1324, %v161_v18  }
  0x2c   :  { %525 = vmatpush.msra.mxu2 %v524_v16  ;;  %590 = vmatpush.msra.mxu3 %v524_v16 }
  0x32   :  { %89 = vperm.xlu2 %1326, %v52_v19  }
  0x33   :  { %198 = vperm.xlu1 %1325, %v163_v20   ;;  %86 = vperm.xlu0 %1324, %v51_v21   ;;  %v523_v21 = vld [vmem:[%s1884_s4 + $0x70] sm:$0xff] }
  0x34   :  { %526 = vmatpush.msra.mxu2 %v523_v21  ;;  %591 = vmatpush.msra.mxu3 %v523_v21  ;;  %v927_v21 = vld [vmem:[%s1886_s6 + $0x50] sm:$0xff] }
  0x3a   :  { %204 = vperm.xlu2 %1326, %v165_v22   ;;  %v522_v22 = vld [vmem:[%s1884_s4 + $0x68] sm:$0xff] }
  0x3b   :  { %92 = vperm.xlu1 %1325, %v53_v23   ;;  %201 = vperm.xlu0 %1324, %v164_v24   ;;  %v497_v23 = vld [vmem:[%s1883_s3 + $0x20] sm:$0xff] }
  0x3c   :  { %666 = vmatpush.msrb.mxu0 %v497_v23  ;;  %799 = vmatpush.msrb.mxu1 %v497_v23 }
  0x3d   :  { %527 = vmatpush.msra.mxu2 %v522_v22  ;;  %592 = vmatpush.msra.mxu3 %v522_v22 }
  0x42   :  { %98 = vperm.xlu2 %1326, %v55_v25   ;;  %v521_v25 = vld [vmem:[%s1884_s4 + $0x60] sm:$0xff] }
  0x43   :  { %207 = vperm.xlu1 %1325, %v166_v26   ;;  %95 = vperm.xlu0 %1324, %v54_v27   ;;  %v520_v26 = vld [vmem:[%s1884_s4 + $0x58] sm:$0xff] }
  0x44   :  { %528 = vmatpush.msra.mxu2 %v521_v25  ;;  %593 = vmatpush.msra.mxu3 %v521_v25 }
  0x46   :  { %529 = vmatpush.msra.mxu2 %v520_v26  ;;  %594 = vmatpush.msra.mxu3 %v520_v26 }
  0x4a   :  { %213 = vperm.xlu2 %1326, %v168_v28  }
  0x4b   :  { %101 = vperm.xlu1 %1325, %v56_v29   ;;  %210 = vperm.xlu0 %1324, %v167_v30   ;;  %v519_v30 = vld [vmem:[%s1884_s4 + $0x50] sm:$0xff] }
  0x4c   :  { %530 = vmatpush.msra.mxu2 %v519_v30  ;;  %595 = vmatpush.msra.mxu3 %v519_v30  ;;  %v924_v30 = vld [vmem:[%s1886_s6 + $0x38] sm:$0xff] }
  0x53   :  { %216 = vperm.xlu1 %1325, %v169_v31   ;;  %104 = vperm.xlu0 %1324, %v57_v32   ;;  %v518_v31 = vld [vmem:[%s1884_s4 + $0x48] sm:$0xff]  ;;  %v496_v32 = vld [vmem:[%s1883_s3 + $0x18] sm:$0xff] }
  0x54   :  { %667 = vmatpush.msrb.mxu0 %v496_v32  ;;  %800 = vmatpush.msrb.mxu1 %v496_v32 }
  0x55   :  { %531 = vmatpush.msra.mxu2 %v518_v31  ;;  %596 = vmatpush.msra.mxu3 %v518_v31 }
  0x57   :  { %532 = vmatpush.msra.mxu2 %v517_v34  ;;  %597 = vmatpush.msra.mxu3 %v517_v34 }
  0x59   :  { %533 = vmatpush.msra.mxu2 %v516_v35  ;;  %598 = vmatpush.msra.mxu3 %v516_v35 }
  0x5c   :  { %v66_v47 = vpop.permute.xlu2 %65 }
  0x5d   :  { %vm108_vm4 = vcmp.eq.s32.totalorder %v1519_v39, %v66_v47 }
  0x5e   :  { %v1227_v51 = vsel %vm108_vm4, 1.0, %v1356_v42 }
  0x64   :  { %v178_v54 = vpop.permute.xlu2 %177 }
  0x65   :  { %vm220_vm6 = vcmp.eq.s32.totalorder %v1519_v39, %v178_v54  ;;  %v509_v54 = vld [vmem:[%s1884_s4] sm:$0xff] }
  0x66   :  { %v1243_v56 = vsel %vm220_vm6, 1.0, %v1356_v42 }
  0x6c   :  { %v72_v60 = vpop.permute.xlu2 %71 }
  0x6d   :  { %vm110_vm8 = vcmp.eq.s32.totalorder %v1519_v39, %v72_v60 }
  0x6e   :  { %v1229_v61 = vsel %vm110_vm8, 1.0, %v1356_v42 }
  0x74   :  { %v187_v5 = vpop.permute.xlu2 %186 }
  0x75   :  { %v60_v40 = vpop.permute.xlu0 %59  ;;  %v63_v41 = vpop.permute.xlu1 %62  ;;  %vm223_vm12 = vcmp.eq.s32.totalorder %v1519_v39, %v187_v5 }
  0x76   :  { %vm106_vm1 = vcmp.eq.s32.totalorder %v1519_v39, %v60_v40  ;;  %vm107_vm2 = vcmp.eq.s32.totalorder %v1519_v39, %v63_v41  ;;  %v1246_v7 = vsel %vm223_vm12, 1.0, %v1356_v42  ;;  %v515_v40 = vld [vmem:[%s1884_s4 + $0x30] sm:$0xff]  ;;  %v514_v41 = vld [vmem:[%s1884_s4 + $0x28] sm:$0xff] }
  0x77   :  { %v1225_v43 = vsel %vm106_vm1, 1.0, %v1356_v42  ;;  %v1226_v45 = vsel %vm107_vm2, 1.0, %v1356_v42  ;;  %534 = vmatpush.msra.mxu2 %v515_v40  ;;  %599 = vmatpush.msra.mxu3 %v515_v40  ;;  %v921_v40 = vld [vmem:[%s1886_s6 + $0x20] sm:$0xff] }
  0x78   :  { %1257 = vmatmul.msk.f32.vlgmr.msra.gmra.mxu0 %vm266_vm0, %v1225_v43  ;;  %v495_v43 = vld [vmem:[%s1883_s3 + $0x10] sm:$0xff] }
  0x79   :  { %668 = vmatpush.msrb.mxu0 %v495_v43  ;;  %801 = vmatpush.msrb.mxu1 %v495_v43 }
  0x7a   :  { %535 = vmatpush.msra.mxu2 %v514_v41  ;;  %600 = vmatpush.msra.mxu3 %v514_v41 }
  0x7c   :  { %v81_v11 = vpop.permute.xlu2 %80 }
  0x7d   :  { %v172_v46 = vpop.permute.xlu0 %171  ;;  %v175_v50 = vpop.permute.xlu1 %174  ;;  %vm113_vm14 = vcmp.eq.s32.totalorder %v1519_v39, %v81_v11 }
  0x7e   :  { %vm218_vm3 = vcmp.eq.s32.totalorder %v1519_v39, %v172_v46  ;;  %vm219_vm5 = vcmp.eq.s32.totalorder %v1519_v39, %v175_v50  ;;  %v1232_v12 = vsel %vm113_vm14, 1.0, %v1356_v42  ;;  %v512_v46 = vld [vmem:[%s1884_s4 + $0x18] sm:$0xff]  ;;  %v511_v50 = vld [vmem:[%s1884_s4 + $0x10] sm:$0xff] }
  0x7f   :  { %v1241_v48 = vsel %vm218_vm3, 1.0, %v1356_v42  ;;  %v1242_v52 = vsel %vm219_vm5, 1.0, %v1356_v42 }
  0x80   :  { %1258 = vmatmul.msk.f32.gmra.mxu0 %vm266_vm0, %v1226_v45  ;;  %1273 = vmatmul.msk.f32.vlgmr.msra.gmra.mxu1 %vm266_vm0, %v1241_v48  ;;  %v513_v45 = vld [vmem:[%s1884_s4 + $0x20] sm:$0xff] }
  0x81   :  { %536 = vmatpush.msra.mxu2 %v513_v45  ;;  %601 = vmatpush.msra.mxu3 %v513_v45 }
  0x83   :  { %537 = vmatpush.msra.mxu2 %v512_v46  ;;  %602 = vmatpush.msra.mxu3 %v512_v46 }
  0x84   :  { %v196_v18 = vpop.permute.xlu2 %195 }
  0x85   :  { %v69_v55 = vpop.permute.xlu0 %68  ;;  %v181_v57 = vpop.permute.xlu1 %180  ;;  %vm226_vm3 = vcmp.eq.s32.totalorder %v1519_v39, %v196_v18  ;;  %538 = vmatpush.msra.mxu2 %v511_v50  ;;  %603 = vmatpush.msra.mxu3 %v511_v50  ;;  %v928_v18 = vld [vmem:[%s1886_s6 + $0x58] sm:$0xff]  ;;  %v918_v50 = vld [vmem:[%s1886_s6 + $0x8] sm:$0xff] }
  0x86   :  { %vm109_vm7 = vcmp.eq.s32.totalorder %v1519_v39, %v69_v55  ;;  %vm221_vm9 = vcmp.eq.s32.totalorder %v1519_v39, %v181_v57  ;;  %v1249_v27 = vsel %vm226_vm3, 1.0, %v1356_v42  ;;  %v493_v55 = vld [vmem:[%s1883_s3] sm:$0xff] }
  0x87   :  { %v1228_v58 = vsel %vm109_vm7, 1.0, %v1356_v42  ;;  %v1244_v62 = vsel %vm221_vm9, 1.0, %v1356_v42 }
  0x88   :  { %1259 = vmatmul.msk.f32.gmra.mxu0 %vm266_vm0, %v1227_v51  ;;  %1274 = vmatmul.msk.f32.gmra.mxu1 %vm266_vm0, %v1242_v52  ;;  %v510_v51 = vld [vmem:[%s1884_s4 + $0x8] sm:$0xff] }
  0x89   :  { %v494_v52 = vld [vmem:[%s1883_s3 + $0x8] sm:$0xff]  ;;  %539 = vmatpush.msra.mxu2 %v510_v51  ;;  %604 = vmatpush.msra.mxu3 %v510_v51  ;;  %v917_v51 = vld [vmem:[%s1886_s6] sm:$0xff] }
  0x8a   :  { %669 = vmatpush.msrb.mxu0 %v494_v52  ;;  %802 = vmatpush.msrb.mxu1 %v494_v52 }
  0x8b   :  { %540 = vmatpush.msra.mxu2 %v509_v54  ;;  %605 = vmatpush.msra.mxu3 %v509_v54 }
  0x8c   :  { %v90_v33 = vpop.permute.xlu2 %89  ;;  %670 = vmatpush.msrb.mxu0 %v493_v55  ;;  %803 = vmatpush.msrb.mxu1 %v493_v55 }
  0x8d   :  { %v184_v63 = vpop.permute.xlu0 %183  ;;  %v75_v1 = vpop.permute.xlu1 %74  ;;  %vm116_vm5 = vcmp.eq.s32.totalorder %v1519_v39, %v90_v33  ;;  %v923_v33 = vld [vmem:[%s1886_s6 + $0x30] sm:$0xff] }
  0x8e   :  { %vm111_vm10 = vcmp.eq.s32.totalorder %v1519_v39, %v75_v1  ;;  %vm222_vm11 = vcmp.eq.s32.totalorder %v1519_v39, %v184_v63  ;;  %v1235_v36 = vsel %vm116_vm5, 1.0, %v1356_v42 }
  0x8f   :  { %v1230_v2 = vsel %vm111_vm10, 1.0, %v1356_v42  ;;  %v1245_v3 = vsel %vm222_vm11, 1.0, %v1356_v42 }
  0x90   :  { %1260 = vmatmul.msk.f32.gmra.mxu0 %vm266_vm0, %v1228_v58  ;;  %1275 = vmatmul.msk.f32.gmra.mxu1 %vm266_vm0, %v1243_v56 }
  0x94   :  { %v205_v47 = vpop.permute.xlu2 %204 }
  0x95   :  { %v78_v6 = vpop.permute.xlu0 %77  ;;  %v190_v8 = vpop.permute.xlu1 %189  ;;  %vm229_vm9 = vcmp.eq.s32.totalorder %v1519_v39, %v205_v47  ;;  %v919_v47 = vld [vmem:[%s1886_s6 + $0x10] sm:$0xff] }
  0x96   :  { %vm112_vm13 = vcmp.eq.s32.totalorder %v1519_v39, %v78_v6  ;;  %vm224_vm15 = vcmp.eq.s32.totalorder %v1519_v39, %v190_v8  ;;  %v1252_v56 = vsel %vm229_vm9, 1.0, %v1356_v42  ;;  %v932_v6 = vld [vmem:[%s1886_s6 + $0x78] sm:$0xff] }
  0x97   :  { %v1231_v9 = vsel %vm112_vm13, 1.0, %v1356_v42  ;;  %v1247_v13 = vsel %vm224_vm15, 1.0, %v1356_v42  ;;  %1289 = vmatpush.msrb.mxu2 %v932_v6  ;;  %1305 = vmatpush.msrb.mxu3 %v932_v6 }
  0x98   :  { %1261 = vmatmul.msk.f32.gmra.mxu0 %vm266_vm0, %v1229_v61  ;;  %1276 = vmatmul.msk.f32.gmra.mxu1 %vm266_vm0, %v1244_v62 }
  0x99   :  { %937 = vmatpush.msra.mxu0 %v932_v6  ;;  %1002 = vmatpush.msra.mxu1 %v932_v6 }
  0x9a   :  { %1290 = vmatpush.msrb.mxu2 %v931_v10  ;;  %1306 = vmatpush.msrb.mxu3 %v931_v10 }
  0x9b   :  { %938 = vmatpush.msra.mxu0 %v931_v10  ;;  %1003 = vmatpush.msra.mxu1 %v931_v10 }
  0x9c   :  { %v99_v59 = vpop.permute.xlu2 %98 }
  0x9d   :  { %v193_v14 = vpop.permute.xlu0 %192  ;;  %v84_v17 = vpop.permute.xlu1 %83  ;;  %vm119_vm11 = vcmp.eq.s32.totalorder %v1519_v39, %v99_v59  ;;  %v1755_v59 = vld [vmem:[%s1885_s5] ss:$0 sm:$0xff] }
  0x9e   :  { %vm114_vm1 = vcmp.eq.s32.totalorder %v1519_v39, %v84_v17  ;;  %vm225_vm2 = vcmp.eq.s32.totalorder %v1519_v39, %v193_v14  ;;  %v1238_v60 = vsel %vm119_vm11, 1.0, %v1356_v42 }
  0x9f   :  { %v1233_v19 = vsel %vm114_vm1, 1.0, %v1356_v42  ;;  %v1248_v20 = vsel %vm225_vm2, 1.0, %v1356_v42 }
  0xa0   :  { %1262 = vmatmul.msk.f32.gmra.mxu0 %vm266_vm0, %v1230_v2  ;;  %1277 = vmatmul.msk.f32.gmra.mxu1 %vm266_vm0, %v1245_v3 }
  0xa4   :  { %v214_v2 = vpop.permute.xlu2 %213 }
  0xa5   :  { %v87_v24 = vpop.permute.xlu0 %86  ;;  %v199_v28 = vpop.permute.xlu1 %198  ;;  %vm232_vm15 = vcmp.eq.s32.totalorder %v1519_v39, %v214_v2 }
  0xa6   :  { %vm115_vm4 = vcmp.eq.s32.totalorder %v1519_v39, %v87_v24  ;;  %vm227_vm6 = vcmp.eq.s32.totalorder %v1519_v39, %v199_v28  ;;  %v1255_v4 = vsel %vm232_vm15, 1.0, %v1356_v42  ;;  %v926_v24 = vld [vmem:[%s1886_s6 + $0x48] sm:$0xff] }
  0xa7   :  { %v1234_v29 = vsel %vm115_vm4, 1.0, %v1356_v42  ;;  %v1250_v37 = vsel %vm227_vm6, 1.0, %v1356_v42 }
  0xa8   :  { %1263 = vmatmul.msk.f32.gmra.mxu0 %vm266_vm0, %v1231_v9  ;;  %1278 = vmatmul.msk.f32.gmra.mxu1 %vm266_vm0, %v1246_v7 }
  0xad   :  { %v202_v38 = vpop.permute.xlu0 %201  ;;  %v93_v44 = vpop.permute.xlu1 %92 }
  0xae   :  { %vm117_vm7 = vcmp.eq.s32.totalorder %v1519_v39, %v93_v44  ;;  %vm228_vm8 = vcmp.eq.s32.totalorder %v1519_v39, %v202_v38  ;;  %v920_v44 = vld [vmem:[%s1886_s6 + $0x18] sm:$0xff] }
  0xaf   :  { %v1236_v48 = vsel %vm117_vm7, 1.0, %v1356_v42  ;;  %v1251_v49 = vsel %vm228_vm8, 1.0, %v1356_v42 }
  0xb0   :  { %1264 = vmatmul.msk.f32.gmra.mxu0 %vm266_vm0, %v1232_v12  ;;  %1279 = vmatmul.msk.f32.gmra.mxu1 %vm266_vm0, %v1247_v13 }
  0xb5   :  { %v96_v53 = vpop.permute.xlu0 %95  ;;  %v208_v57 = vpop.permute.xlu1 %207 }
  0xb6   :  { %vm118_vm10 = vcmp.eq.s32.totalorder %v1519_v39, %v96_v53  ;;  %vm230_vm12 = vcmp.eq.s32.totalorder %v1519_v39, %v208_v57 }
  0xb7   :  { %v1237_v58 = vsel %vm118_vm10, 1.0, %v1356_v42  ;;  %v1253_v61 = vsel %vm230_vm12, 1.0, %v1356_v42 }
  0xb8   :  { %1265 = vmatmul.msk.f32.gmra.mxu0 %vm266_vm0, %v1233_v19  ;;  %1280 = vmatmul.msk.f32.gmra.mxu1 %vm266_vm0, %v1248_v20 }
  0xbd   :  { %v211_v62 = vpop.permute.xlu0 %210  ;;  %v102_v63 = vpop.permute.xlu1 %101 }
  0xbe   :  { %vm120_vm13 = vcmp.eq.s32.totalorder %v1519_v39, %v102_v63  ;;  %vm231_vm14 = vcmp.eq.s32.totalorder %v1519_v39, %v211_v62 }
  0xbf   :  { %v1239_v0 = vsel %vm120_vm13, 1.0, %v1356_v42  ;;  %v1254_v1 = vsel %vm231_vm14, 1.0, %v1356_v42 }
  0xc0   :  { %1266 = vmatmul.msk.f32.gmra.mxu0 %vm266_vm0, %v1234_v29  ;;  %1281 = vmatmul.msk.f32.gmra.mxu1 %vm266_vm0, %v1249_v27  ;;  %v925_v27 = vld [vmem:[%s1886_s6 + $0x40] sm:$0xff] }
  0xc5   :  { %v105_v3 = vpop.permute.xlu0 %104  ;;  %v217_v7 = vpop.permute.xlu1 %216 }
  0xc6   :  { %vm121_vm1 = vcmp.eq.s32.totalorder %v1519_v39, %v105_v3  ;;  %vm233_vm2 = vcmp.eq.s32.totalorder %v1519_v39, %v217_v7  ;;  %v930_v39 = vld [vmem:[%s1886_s6 + $0x68] sm:$0xff] }
  0xc7   :  { %v1240_v5 = vsel %vm121_vm1, 1.0, %v1356_v42  ;;  %v1256_v9 = vsel %vm233_vm2, 1.0, %v1356_v42  ;;  %1291 = vmatpush.msrb.mxu2 %v930_v39  ;;  %1307 = vmatpush.msrb.mxu3 %v930_v39 }
  0xc8   :  { %1267 = vmatmul.msk.f32.gmra.mxu0 %vm266_vm0, %v1235_v36  ;;  %1282 = vmatmul.msk.f32.gmra.mxu1 %vm266_vm0, %v1250_v37  ;;  %v922_v36 = vld [vmem:[%s1886_s6 + $0x28] sm:$0xff] }
  0xc9   :  { %1004 = vmatpush.msra.mxu1 %v930_v39  ;;  %939 = vmatpush.msra.mxu0 %v930_v39 }
  0xca   :  { %1292 = vmatpush.msrb.mxu2 %v929_v15  ;;  %1308 = vmatpush.msrb.mxu3 %v929_v15 }
  0xcb   :  { %1005 = vmatpush.msra.mxu1 %v929_v15  ;;  %940 = vmatpush.msra.mxu0 %v929_v15 }
  0xcc   :  { %1293 = vmatpush.msrb.mxu2 %v928_v18  ;;  %1309 = vmatpush.msrb.mxu3 %v928_v18 }
  0xcd   :  { %1006 = vmatpush.msra.mxu1 %v928_v18  ;;  %941 = vmatpush.msra.mxu0 %v928_v18 }
  0xce   :  { %1294 = vmatpush.msrb.mxu2 %v927_v21  ;;  %1310 = vmatpush.msrb.mxu3 %v927_v21 }
  0xcf   :  { %1007 = vmatpush.msra.mxu1 %v927_v21  ;;  %942 = vmatpush.msra.mxu0 %v927_v21 }
  0xd0   :  { %1268 = vmatmul.msk.f32.gmra.mxu0 %vm266_vm0, %v1236_v48  ;;  %1283 = vmatmul.msk.f32.gmra.mxu1 %vm266_vm0, %v1251_v49 }
  0xd1   :  { %1295 = vmatpush.msrb.mxu2 %v926_v24  ;;  %1311 = vmatpush.msrb.mxu3 %v926_v24 }
  0xd2   :  { %1008 = vmatpush.msra.mxu1 %v926_v24  ;;  %943 = vmatpush.msra.mxu0 %v926_v24 }
  0xd3   :  { %1296 = vmatpush.msrb.mxu2 %v925_v27  ;;  %1312 = vmatpush.msrb.mxu3 %v925_v27 }
  0xd4   :  { %1009 = vmatpush.msra.mxu1 %v925_v27  ;;  %944 = vmatpush.msra.mxu0 %v925_v27 }
  0xd5   :  { %1297 = vmatpush.msrb.mxu2 %v924_v30  ;;  %1313 = vmatpush.msrb.mxu3 %v924_v30 }
  0xd6   :  { %1010 = vmatpush.msra.mxu1 %v924_v30  ;;  %945 = vmatpush.msra.mxu0 %v924_v30 }
  0xd7   :  { %1298 = vmatpush.msrb.mxu2 %v923_v33  ;;  %1314 = vmatpush.msrb.mxu3 %v923_v33 }
  0xd8   :  { %1269 = vmatmul.msk.f32.gmra.mxu0 %vm266_vm0, %v1237_v58  ;;  %1284 = vmatmul.msk.f32.gmra.mxu1 %vm266_vm0, %v1252_v56 }
  0xd9   :  { %1011 = vmatpush.msra.mxu1 %v923_v33  ;;  %946 = vmatpush.msra.mxu0 %v923_v33 }
  0xda   :  { %1299 = vmatpush.msrb.mxu2 %v922_v36  ;;  %1315 = vmatpush.msrb.mxu3 %v922_v36 }
  0xdb   :  { %1012 = vmatpush.msra.mxu1 %v922_v36  ;;  %947 = vmatpush.msra.mxu0 %v922_v36 }
  0xdc   :  { %1300 = vmatpush.msrb.mxu2 %v921_v40  ;;  %1316 = vmatpush.msrb.mxu3 %v921_v40 }
  0xdd   :  { %1013 = vmatpush.msra.mxu1 %v921_v40  ;;  %948 = vmatpush.msra.mxu0 %v921_v40 }
  0xde   :  { %1301 = vmatpush.msrb.mxu2 %v920_v44  ;;  %1317 = vmatpush.msrb.mxu3 %v920_v44 }
  0xdf   :  { %1014 = vmatpush.msra.mxu1 %v920_v44  ;;  %949 = vmatpush.msra.mxu0 %v920_v44 }
  0xe0   :  { %1270 = vmatmul.msk.f32.gmra.mxu0 %vm266_vm0, %v1238_v60  ;;  %1285 = vmatmul.msk.f32.gmra.mxu1 %vm266_vm0, %v1253_v61 }
  0xe1   :  { %1302 = vmatpush.msrb.mxu2 %v919_v47  ;;  %1318 = vmatpush.msrb.mxu3 %v919_v47 }
  0xe2   :  { %1015 = vmatpush.msra.mxu1 %v919_v47  ;;  %950 = vmatpush.msra.mxu0 %v919_v47 }
  0xe3   :  { %1303 = vmatpush.msrb.mxu2 %v918_v50  ;;  %1319 = vmatpush.msrb.mxu3 %v918_v50 }
  0xe4   :  { %1016 = vmatpush.msra.mxu1 %v918_v50  ;;  %951 = vmatpush.msra.mxu0 %v918_v50 }
  0xe5   :  { %1304 = vmatpush.msrb.mxu2 %v917_v51  ;;  %1320 = vmatpush.msrb.mxu3 %v917_v51 }
  0xe6   :  { %1017 = vmatpush.msra.mxu1 %v917_v51  ;;  %952 = vmatpush.msra.mxu0 %v917_v51 }
  0xe8   :  { %1271 = vmatmul.msk.f32.gmra.mxu0 %vm266_vm0, %v1239_v0  ;;  %1286 = vmatmul.msk.f32.gmra.mxu1 %vm266_vm0, %v1254_v1 }
  0xf0   :  { %1272 = vmatmul.msk.f32.gmra.mxu0 %vm266_vm0, %v1240_v5  ;;  %1287 = vmatmul.msk.f32.gmra.mxu1 %vm266_vm0, %v1255_v4 }
  0xf5   :  { %v332_v8 = vpop.f32.mrf.mxu0 }
  0xf6   :  { %541 = vmatmul.f32.vlgmr.msra.gmra.mxu2 %v332_v8 }
  0xf8   :  { %1288 = vmatmul.msk.f32.gmra.mxu1 %vm266_vm0, %v1256_v9  ;;  %671 = vmatmul.f32.vlgmr.msrb.gmra.mxu0 %v332_v8 }
  0xfd   :  { %v335_v11 = vpop.f32.mrf.mxu0  ;;  %v445_v12 = vpop.f32.mrf.mxu1 }
  0xfe   :  { %544 = vmatmul.f32.gmra.mxu2 %v335_v11  ;;  %606 = vmatmul.f32.vlgmr.msra.gmra.mxu3 %v445_v12 }
 0x100   :  { %674 = vmatmul.f32.gmra.mxu0 %v335_v11  ;;  %804 = vmatmul.f32.vlgmr.msrb.gmra.mxu1 %v445_v12 }
 0x105   :  { %v338_v13 = vpop.f32.mrf.mxu0  ;;  %v448_v14 = vpop.f32.mrf.mxu1 }
 0x106   :  { %547 = vmatmul.f32.gmra.mxu2 %v338_v13  ;;  %609 = vmatmul.f32.gmra.mxu3 %v448_v14 }
 0x108   :  { %677 = vmatmul.f32.gmra.mxu0 %v338_v13  ;;  %807 = vmatmul.f32.gmra.mxu1 %v448_v14 }
 0x10d   :  { %v341_v16 = vpop.f32.mrf.mxu0  ;;  %v451_v17 = vpop.f32.mrf.mxu1 }
 0x10e   :  { %550 = vmatmul.f32.gmra.mxu2 %v341_v16  ;;  %612 = vmatmul.f32.gmra.mxu3 %v451_v17 }
 0x110   :  { %680 = vmatmul.f32.gmra.mxu0 %v341_v16  ;;  %810 = vmatmul.f32.gmra.mxu1 %v451_v17 }
 0x115   :  { %v344_v19 = vpop.f32.mrf.mxu0  ;;  %v454_v20 = vpop.f32.mrf.mxu1 }
 0x116   :  { %553 = vmatmul.f32.gmra.mxu2 %v344_v19  ;;  %615 = vmatmul.f32.gmra.mxu3 %v454_v20 }
 0x118   :  { %683 = vmatmul.f32.gmra.mxu0 %v344_v19  ;;  %813 = vmatmul.f32.gmra.mxu1 %v454_v20 }
 0x11d   :  { %v347_v22 = vpop.f32.mrf.mxu0  ;;  %v457_v23 = vpop.f32.mrf.mxu1 }
 0x11e   :  { %556 = vmatmul.f32.gmra.mxu2 %v347_v22  ;;  %618 = vmatmul.f32.gmra.mxu3 %v457_v23 }
 0x120   :  { %686 = vmatmul.f32.gmra.mxu0 %v347_v22  ;;  %816 = vmatmul.f32.gmra.mxu1 %v457_v23 }
 0x125   :  { %v350_v25 = vpop.f32.mrf.mxu0  ;;  %v460_v26 = vpop.f32.mrf.mxu1 }
 0x126   :  { %559 = vmatmul.f32.gmra.mxu2 %v350_v25  ;;  %621 = vmatmul.f32.gmra.mxu3 %v460_v26 }
 0x128   :  { %689 = vmatmul.f32.gmra.mxu0 %v350_v25  ;;  %819 = vmatmul.f32.gmra.mxu1 %v460_v26 }
 0x12d   :  { %v353_v28 = vpop.f32.mrf.mxu0  ;;  %v463_v29 = vpop.f32.mrf.mxu1 }
 0x12e   :  { %562 = vmatmul.f32.gmra.mxu2 %v353_v28  ;;  %624 = vmatmul.f32.gmra.mxu3 %v463_v29 }
 0x130   :  { %692 = vmatmul.f32.gmra.mxu0 %v353_v28  ;;  %822 = vmatmul.f32.gmra.mxu1 %v463_v29 }
 0x135   :  { %v356_v31 = vpop.f32.mrf.mxu0  ;;  %v466_v32 = vpop.f32.mrf.mxu1 }
 0x136   :  { %565 = vmatmul.f32.gmra.mxu2 %v356_v31  ;;  %627 = vmatmul.f32.gmra.mxu3 %v466_v32 }
 0x138   :  { %695 = vmatmul.f32.gmra.mxu0 %v356_v31  ;;  %825 = vmatmul.f32.gmra.mxu1 %v466_v32 }
 0x13d   :  { %v359_v34 = vpop.f32.mrf.mxu0  ;;  %v469_v35 = vpop.f32.mrf.mxu1 }
 0x13e   :  { %568 = vmatmul.f32.gmra.mxu2 %v359_v34  ;;  %630 = vmatmul.f32.gmra.mxu3 %v469_v35 }
 0x140   :  { %698 = vmatmul.f32.gmra.mxu0 %v359_v34  ;;  %828 = vmatmul.f32.gmra.mxu1 %v469_v35 }
 0x145   :  { %v362_v37 = vpop.f32.mrf.mxu0  ;;  %v472_v38 = vpop.f32.mrf.mxu1 }
 0x146   :  { %571 = vmatmul.f32.gmra.mxu2 %v362_v37  ;;  %633 = vmatmul.f32.gmra.mxu3 %v472_v38 }
 0x148   :  { %701 = vmatmul.f32.gmra.mxu0 %v362_v37  ;;  %831 = vmatmul.f32.gmra.mxu1 %v472_v38 }
 0x14d   :  { %v365_v41 = vpop.f32.mrf.mxu0  ;;  %v475_v43 = vpop.f32.mrf.mxu1 }
 0x14e   :  { %574 = vmatmul.f32.gmra.mxu2 %v365_v41  ;;  %636 = vmatmul.f32.gmra.mxu3 %v475_v43 }
 0x150   :  { %704 = vmatmul.f32.gmra.mxu0 %v365_v41  ;;  %834 = vmatmul.f32.gmra.mxu1 %v475_v43 }
 0x155   :  { %v368_v45 = vpop.f32.mrf.mxu0  ;;  %v478_v46 = vpop.f32.mrf.mxu1 }
 0x156   :  { %577 = vmatmul.f32.gmra.mxu2 %v368_v45  ;;  %639 = vmatmul.f32.gmra.mxu3 %v478_v46 }
 0x158   :  { %707 = vmatmul.f32.gmra.mxu0 %v368_v45  ;;  %837 = vmatmul.f32.gmra.mxu1 %v478_v46 }
 0x15d   :  { %v371_v48 = vpop.f32.mrf.mxu0  ;;  %v481_v49 = vpop.f32.mrf.mxu1 }
 0x15e   :  { %580 = vmatmul.f32.gmra.mxu2 %v371_v48  ;;  %642 = vmatmul.f32.gmra.mxu3 %v481_v49 }
 0x160   :  { %710 = vmatmul.f32.gmra.mxu0 %v371_v48  ;;  %840 = vmatmul.f32.gmra.mxu1 %v481_v49 }
 0x165   :  { %v374_v52 = vpop.f32.mrf.mxu0  ;;  %v484_v53 = vpop.f32.mrf.mxu1 }
 0x166   :  { %583 = vmatmul.f32.gmra.mxu2 %v374_v52  ;;  %645 = vmatmul.f32.gmra.mxu3 %v484_v53 }
 0x168   :  { %713 = vmatmul.f32.gmra.mxu0 %v374_v52  ;;  %843 = vmatmul.f32.gmra.mxu1 %v484_v53 }
 0x16d   :  { %v377_v54 = vpop.f32.mrf.mxu0  ;;  %v487_v55 = vpop.f32.mrf.mxu1 }
 0x16e   :  { %586 = vmatmul.f32.gmra.mxu2 %v377_v54  ;;  %648 = vmatmul.f32.gmra.mxu3 %v487_v55 }
 0x170   :  { %716 = vmatmul.f32.gmra.mxu0 %v377_v54  ;;  %846 = vmatmul.f32.gmra.mxu1 %v487_v55 }
 0x175   :  { %v490_v56 = vpop.f32.mrf.mxu1  ;;  %v672_v57 = vpop.f32.mrf.mxu0 }
 0x176   :  { %651 = vmatmul.f32.gmra.mxu3 %v490_v56 }
 0x178   :  { %849 = vmatmul.f32.gmra.mxu1 %v490_v56 }
 0x179   :  { %v542_v58 = vpop.f32.mrf.mxu2 }
 0x17d   :  { %v675_v60 = vpop.f32.mrf.mxu0  ;;  %v805_v61 = vpop.f32.mrf.mxu1 }
 0x17e   :  { %v806_v62 = vadd.f32 %v805_v61, %v542_v58 }
 0x180   :  { %v853_v63 = vadd.f32 %v1755_v59, %v806_v62 }
 0x181   :  { %v545_v0 = vpop.f32.mrf.mxu2  ;;  %v607_v1 = vpop.f32.mrf.mxu3 }
 0x182   :  { %vm869_vm0 = vcmp.gt.f32.partialorder %v853_v63, 0.0  ;;  %v885_v2 = vmul.f32 0.01, %v853_v63  ;;  %v673_v3 = vadd.f32 %v672_v57, %v607_v1 }
 0x184   :  { %v724_v4 = vadd.f32 %v1755_v59, %v673_v3  ;;  %v901_v5 = vsel %vm869_vm0, %v853_v63, %v885_v2 }
 0x185   :  { %v678_v6 = vpop.f32.mrf.mxu0  ;;  %v808_v7 = vpop.f32.mrf.mxu1  ;;  %1018 = vmatmul.f32.vlgmr.msra.gmra.mxu1 %v901_v5 }
 0x186   :  { %v756_v8 = vmul.f32 0.01, %v724_v4  ;;  %v809_v9 = vadd.f32 %v808_v7, %v545_v0  ;;  %vm740_vm3 = vcmp.gt.f32.partialorder %v724_v4, 0.0 }
 0x188   :  { %v854_v10 = vadd.f32 %v1755_v59, %v809_v9  ;;  %v772_v11 = vsel %vm740_vm3, %v724_v4, %v756_v8 }
 0x189   :  { %v548_v12 = vpop.f32.mrf.mxu2  ;;  %v610_v39 = vpop.f32.mrf.mxu3  ;;  %953 = vmatmul.f32.vlgmr.msra.gmra.mxu0 %v772_v11 }
 0x18a   :  { %v676_v13 = vadd.f32 %v675_v60, %v610_v39  ;;  %vm870_vm4 = vcmp.gt.f32.partialorder %v854_v10, 0.0  ;;  %v886_v14 = vmul.f32 0.01, %v854_v10 }
 0x18c   :  { %v725_v15 = vadd.f32 %v1755_v59, %v676_v13  ;;  %v902_v16 = vsel %vm870_vm4, %v854_v10, %v886_v14 }
 0x18d   :  { %v681_v17 = vpop.f32.mrf.mxu0  ;;  %v811_v18 = vpop.f32.mrf.mxu1  ;;  %1021 = vmatmul.f32.vlgmr.msrb.gmra.mxu3 %v902_v16 }
 0x18e   :  { %v812_v19 = vadd.f32 %v811_v18, %v548_v12  ;;  %vm741_vm5 = vcmp.gt.f32.partialorder %v725_v15, 0.0  ;;  %v757_v20 = vmul.f32 0.01, %v725_v15 }
 0x190   :  { %v855_v21 = vadd.f32 %v1755_v59, %v812_v19  ;;  %v773_v22 = vsel %vm741_vm5, %v725_v15, %v757_v20 }
 0x191   :  { %v551_v23 = vpop.f32.mrf.mxu2  ;;  %v613_v24 = vpop.f32.mrf.mxu3  ;;  %956 = vmatmul.f32.vlgmr.msrb.gmra.mxu2 %v773_v22 }
 0x192   :  { %v679_v25 = vadd.f32 %v678_v6, %v613_v24  ;;  %vm871_vm6 = vcmp.gt.f32.partialorder %v855_v21, 0.0  ;;  %v887_v26 = vmul.f32 0.01, %v855_v21 }
 0x194   :  { %v726_v27 = vadd.f32 %v1755_v59, %v679_v25  ;;  %v903_v28 = vsel %vm871_vm6, %v855_v21, %v887_v26 }
 0x195   :  { %v684_v29 = vpop.f32.mrf.mxu0  ;;  %v814_v30 = vpop.f32.mrf.mxu1  ;;  %1024 = vmatmul.f32.gmra.mxu3 %v903_v28 }
 0x196   :  { %v815_v31 = vadd.f32 %v814_v30, %v551_v23  ;;  %vm742_vm7 = vcmp.gt.f32.partialorder %v726_v27, 0.0  ;;  %v758_v32 = vmul.f32 0.01, %v726_v27 }
 0x198   :  { %v856_v33 = vadd.f32 %v1755_v59, %v815_v31  ;;  %v774_v34 = vsel %vm742_vm7, %v726_v27, %v758_v32 }
 0x199   :  { %v554_v35 = vpop.f32.mrf.mxu2  ;;  %v616_v36 = vpop.f32.mrf.mxu3  ;;  %959 = vmatmul.f32.gmra.mxu2 %v774_v34 }
 0x19a   :  { %v682_v37 = vadd.f32 %v681_v17, %v616_v36  ;;  %vm872_vm8 = vcmp.gt.f32.partialorder %v856_v33, 0.0  ;;  %v888_v38 = vmul.f32 0.01, %v856_v33 }
 0x19c   :  { %v727_v40 = vadd.f32 %v1755_v59, %v682_v37  ;;  %v904_v41 = vsel %vm872_vm8, %v856_v33, %v888_v38 }
 0x19d   :  { %v687_v43 = vpop.f32.mrf.mxu0  ;;  %v817_v44 = vpop.f32.mrf.mxu1  ;;  %1027 = vmatmul.f32.gmra.mxu3 %v904_v41 }
 0x19e   :  { %v818_v45 = vadd.f32 %v817_v44, %v554_v35  ;;  %vm743_vm9 = vcmp.gt.f32.partialorder %v727_v40, 0.0  ;;  %v759_v46 = vmul.f32 0.01, %v727_v40 }
 0x1a0   :  { %v857_v47 = vadd.f32 %v1755_v59, %v818_v45  ;;  %v775_v48 = vsel %vm743_vm9, %v727_v40, %v759_v46 }
 0x1a1   :  { %v557_v49 = vpop.f32.mrf.mxu2  ;;  %v619_v50 = vpop.f32.mrf.mxu3  ;;  %962 = vmatmul.f32.gmra.mxu2 %v775_v48 }
 0x1a2   :  { %v685_v51 = vadd.f32 %v684_v29, %v619_v50  ;;  %vm873_vm10 = vcmp.gt.f32.partialorder %v857_v47, 0.0  ;;  %v889_v52 = vmul.f32 0.01, %v857_v47 }
 0x1a4   :  { %v728_v53 = vadd.f32 %v1755_v59, %v685_v51  ;;  %v905_v54 = vsel %vm873_vm10, %v857_v47, %v889_v52 }
 0x1a5   :  { %v690_v55 = vpop.f32.mrf.mxu0  ;;  %v820_v56 = vpop.f32.mrf.mxu1  ;;  %1030 = vmatmul.f32.gmra.mxu3 %v905_v54 }
 0x1a6   :  { %v821_v57 = vadd.f32 %v820_v56, %v557_v49  ;;  %vm744_vm11 = vcmp.gt.f32.partialorder %v728_v53, 0.0  ;;  %v760_v58 = vmul.f32 0.01, %v728_v53 }
 0x1a8   :  { %v858_v60 = vadd.f32 %v1755_v59, %v821_v57  ;;  %v776_v61 = vsel %vm744_vm11, %v728_v53, %v760_v58 }
 0x1a9   :  { %v560_v62 = vpop.f32.mrf.mxu2  ;;  %v622_v63 = vpop.f32.mrf.mxu3  ;;  %965 = vmatmul.f32.gmra.mxu2 %v776_v61 }
 0x1aa   :  { %v688_v0 = vadd.f32 %v687_v43, %v622_v63  ;;  %vm874_vm12 = vcmp.gt.f32.partialorder %v858_v60, 0.0  ;;  %v890_v1 = vmul.f32 0.01, %v858_v60 }
 0x1ac   :  { %v729_v2 = vadd.f32 %v1755_v59, %v688_v0  ;;  %v906_v3 = vsel %vm874_vm12, %v858_v60, %v890_v1 }
 0x1ad   :  { %v693_v4 = vpop.f32.mrf.mxu0  ;;  %v823_v5 = vpop.f32.mrf.mxu1  ;;  %1033 = vmatmul.f32.gmra.mxu3 %v906_v3 }
 0x1ae   :  { %v824_v6 = vadd.f32 %v823_v5, %v560_v62  ;;  %vm745_vm13 = vcmp.gt.f32.partialorder %v729_v2, 0.0  ;;  %v761_v7 = vmul.f32 0.01, %v729_v2 }
 0x1b0   :  { %v859_v8 = vadd.f32 %v1755_v59, %v824_v6  ;;  %v777_v9 = vsel %vm745_vm13, %v729_v2, %v761_v7 }
 0x1b1   :  { %v563_v10 = vpop.f32.mrf.mxu2  ;;  %v625_v11 = vpop.f32.mrf.mxu3  ;;  %968 = vmatmul.f32.gmra.mxu2 %v777_v9 }
 0x1b2   :  { %v691_v12 = vadd.f32 %v690_v55, %v625_v11  ;;  %vm875_vm14 = vcmp.gt.f32.partialorder %v859_v8, 0.0  ;;  %v891_v39 = vmul.f32 0.01, %v859_v8 }
 0x1b4   :  { %v730_v13 = vadd.f32 %v1755_v59, %v691_v12  ;;  %v907_v14 = vsel %vm875_vm14, %v859_v8, %v891_v39 }
 0x1b5   :  { %v696_v15 = vpop.f32.mrf.mxu0  ;;  %v826_v16 = vpop.f32.mrf.mxu1  ;;  %1036 = vmatmul.f32.gmra.mxu3 %v907_v14 }
 0x1b6   :  { %v827_v17 = vadd.f32 %v826_v16, %v563_v10  ;;  %vm746_vm15 = vcmp.gt.f32.partialorder %v730_v13, 0.0  ;;  %v762_v18 = vmul.f32 0.01, %v730_v13 }
 0x1b8   :  { %v860_v19 = vadd.f32 %v1755_v59, %v827_v17  ;;  %v778_v20 = vsel %vm746_vm15, %v730_v13, %v762_v18 }
 0x1b9   :  { %v566_v21 = vpop.f32.mrf.mxu2  ;;  %v628_v22 = vpop.f32.mrf.mxu3  ;;  %971 = vmatmul.f32.gmra.mxu2 %v778_v20 }
 0x1ba   :  { %v694_v23 = vadd.f32 %v693_v4, %v628_v22  ;;  %vm876_vm1 = vcmp.gt.f32.partialorder %v860_v19, 0.0  ;;  %v892_v24 = vmul.f32 0.01, %v860_v19 }
 0x1bc   :  { %v731_v25 = vadd.f32 %v1755_v59, %v694_v23  ;;  %v908_v26 = vsel %vm876_vm1, %v860_v19, %v892_v24 }
 0x1bd   :  { %v699_v27 = vpop.f32.mrf.mxu0  ;;  %v829_v28 = vpop.f32.mrf.mxu1  ;;  %1039 = vmatmul.f32.gmra.mxu3 %v908_v26 }
 0x1be   :  { %v830_v29 = vadd.f32 %v829_v28, %v566_v21  ;;  %vm747_vm2 = vcmp.gt.f32.partialorder %v731_v25, 0.0  ;;  %v763_v30 = vmul.f32 0.01, %v731_v25 }
 0x1c0   :  { %v861_v31 = vadd.f32 %v1755_v59, %v830_v29  ;;  %v779_v32 = vsel %vm747_vm2, %v731_v25, %v763_v30 }
 0x1c1   :  { %v569_v33 = vpop.f32.mrf.mxu2  ;;  %v631_v34 = vpop.f32.mrf.mxu3  ;;  %974 = vmatmul.f32.gmra.mxu2 %v779_v32 }
 0x1c2   :  { %v697_v35 = vadd.f32 %v696_v15, %v631_v34  ;;  %vm877_vm0 = vcmp.gt.f32.partialorder %v861_v31, 0.0  ;;  %v893_v36 = vmul.f32 0.01, %v861_v31 }
 0x1c4   :  { %v732_v37 = vadd.f32 %v1755_v59, %v697_v35  ;;  %v909_v38 = vsel %vm877_vm0, %v861_v31, %v893_v36  ;;  %vm36_vm0 = vcmask 0  }
 0x1c5   :  { %v832_v40 = vpop.f32.mrf.mxu1  ;;  %1042 = vmatmul.f32.gmra.mxu3 %v909_v38  ;;  %v702_v41 = vpop.f32.mrf.mxu0  ;;  %37 = vst.msk [vmem:[#allocation2] sm:$0x1] %vm36_vm0, %v1356_v42 }
 0x1c6   :  { %v833_v43 = vadd.f32 %v832_v40, %v569_v33  ;;  %vm748_vm3 = vcmp.gt.f32.partialorder %v732_v37, 0.0  ;;  %v764_v44 = vmul.f32 0.01, %v732_v37 }
 0x1c8   :  { %v862_v45 = vadd.f32 %v1755_v59, %v833_v43  ;;  %v780_v46 = vsel %vm748_vm3, %v732_v37, %v764_v44 }
 0x1c9   :  { %v572_v47 = vpop.f32.mrf.mxu2  ;;  %v634_v48 = vpop.f32.mrf.mxu3  ;;  %977 = vmatmul.f32.gmra.mxu2 %v780_v46 }
 0x1ca   :  { %v700_v49 = vadd.f32 %v699_v27, %v634_v48  ;;  %vm878_vm4 = vcmp.gt.f32.partialorder %v862_v45, 0.0  ;;  %v894_v50 = vmul.f32 0.01, %v862_v45 }
 0x1cc   :  { %v733_v51 = vadd.f32 %v1755_v59, %v700_v49  ;;  %v910_v52 = vsel %vm878_vm4, %v862_v45, %v894_v50 }
 0x1cd   :  { %v835_v53 = vpop.f32.mrf.mxu1  ;;  %1045 = vmatmul.f32.gmra.mxu3 %v910_v52  ;;  %v705_v56 = vpop.f32.mrf.mxu0 }
 0x1ce   :  { %v836_v54 = vadd.f32 %v835_v53, %v572_v47  ;;  %vm749_vm5 = vcmp.gt.f32.partialorder %v733_v51, 0.0  ;;  %v765_v55 = vmul.f32 0.01, %v733_v51 }
 0x1d0   :  { %v863_v57 = vadd.f32 %v1755_v59, %v836_v54  ;;  %v781_v58 = vsel %vm749_vm5, %v733_v51, %v765_v55 }
 0x1d1   :  { %v575_v60 = vpop.f32.mrf.mxu2  ;;  %v637_v61 = vpop.f32.mrf.mxu3  ;;  %980 = vmatmul.f32.gmra.mxu2 %v781_v58 }
 0x1d2   :  { %v703_v62 = vadd.f32 %v702_v41, %v637_v61  ;;  %vm879_vm6 = vcmp.gt.f32.partialorder %v863_v57, 0.0  ;;  %v895_v63 = vmul.f32 0.01, %v863_v57 }
 0x1d4   :  { %v734_v0 = vadd.f32 %v1755_v59, %v703_v62  ;;  %v911_v1 = vsel %vm879_vm6, %v863_v57, %v895_v63 }
 0x1d5   :  { %v838_v2 = vpop.f32.mrf.mxu1  ;;  %1048 = vmatmul.f32.gmra.mxu3 %v911_v1  ;;  %v708_v11 = vpop.f32.mrf.mxu0 }
 0x1d6   :  { %v839_v3 = vadd.f32 %v838_v2, %v575_v60  ;;  %vm750_vm7 = vcmp.gt.f32.partialorder %v734_v0, 0.0  ;;  %v766_v4 = vmul.f32 0.01, %v734_v0 }
 0x1d8   :  { %v864_v5 = vadd.f32 %v1755_v59, %v839_v3  ;;  %v782_v6 = vsel %vm750_vm7, %v734_v0, %v766_v4  ;;  %v1792_v0 = vld [vmem:[%s1887_s7] ss:$0 sm:$0xff] }
 0x1d9   :  { %v578_v7 = vpop.f32.mrf.mxu2  ;;  %v640_v8 = vpop.f32.mrf.mxu3  ;;  %983 = vmatmul.f32.gmra.mxu2 %v782_v6 }
 0x1da   :  { %v706_v9 = vadd.f32 %v705_v56, %v640_v8  ;;  %vm880_vm8 = vcmp.gt.f32.partialorder %v864_v5, 0.0  ;;  %v896_v10 = vmul.f32 0.01, %v864_v5 }
 0x1dc   :  { %v735_v12 = vadd.f32 %v1755_v59, %v706_v9  ;;  %v912_v39 = vsel %vm880_vm8, %v864_v5, %v896_v10 }
 0x1dd   :  { %v841_v13 = vpop.f32.mrf.mxu1  ;;  %1051 = vmatmul.f32.gmra.mxu3 %v912_v39  ;;  %v711_v24 = vpop.f32.mrf.mxu0 }
 0x1de   :  { %v842_v14 = vadd.f32 %v841_v13, %v578_v7  ;;  %vm751_vm9 = vcmp.gt.f32.partialorder %v735_v12, 0.0  ;;  %v767_v15 = vmul.f32 0.01, %v735_v12 }
 0x1e0   :  { %v865_v16 = vadd.f32 %v1755_v59, %v842_v14  ;;  %v783_v17 = vsel %vm751_vm9, %v735_v12, %v767_v15 }
 0x1e1   :  { %v581_v18 = vpop.f32.mrf.mxu2  ;;  %v643_v19 = vpop.f32.mrf.mxu3  ;;  %986 = vmatmul.f32.gmra.mxu2 %v783_v17 }
 0x1e2   :  { %v709_v20 = vadd.f32 %v708_v11, %v643_v19  ;;  %vm881_vm10 = vcmp.gt.f32.partialorder %v865_v16, 0.0  ;;  %v897_v21 = vmul.f32 0.01, %v865_v16 }
 0x1e4   :  { %v736_v22 = vadd.f32 %v1755_v59, %v709_v20  ;;  %v913_v23 = vsel %vm881_vm10, %v865_v16, %v897_v21 }
 0x1e5   :  { %v844_v25 = vpop.f32.mrf.mxu1  ;;  %1054 = vmatmul.f32.gmra.mxu3 %v913_v23  ;;  %v714_v40 = vpop.f32.mrf.mxu0 }
 0x1e6   :  { %v845_v26 = vadd.f32 %v844_v25, %v581_v18  ;;  %vm752_vm11 = vcmp.gt.f32.partialorder %v736_v22, 0.0  ;;  %v768_v27 = vmul.f32 0.01, %v736_v22 }
 0x1e8   :  { %v866_v28 = vadd.f32 %v1755_v59, %v845_v26  ;;  %v784_v29 = vsel %vm752_vm11, %v736_v22, %v768_v27 }
 0x1e9   :  { %v646_v30 = vpop.f32.mrf.mxu3  ;;  %989 = vmatmul.f32.gmra.mxu2 %v784_v29  ;;  %v584_v33 = vpop.f32.mrf.mxu2 }
 0x1ea   :  { %v712_v31 = vadd.f32 %v711_v24, %v646_v30  ;;  %vm882_vm12 = vcmp.gt.f32.partialorder %v866_v28, 0.0  ;;  %v898_v32 = vmul.f32 0.01, %v866_v28 }
 0x1ec   :  { %v737_v34 = vadd.f32 %v1755_v59, %v712_v31  ;;  %v914_v35 = vsel %vm882_vm12, %v866_v28, %v898_v32 }
 0x1ed   :  { %v847_v36 = vpop.f32.mrf.mxu1  ;;  %1057 = vmatmul.f32.gmra.mxu3 %v914_v35  ;;  %v717_v55 = vpop.f32.mrf.mxu0 }
 0x1ee   :  { %v848_v37 = vadd.f32 %v847_v36, %v584_v33  ;;  %vm753_vm13 = vcmp.gt.f32.partialorder %v737_v34, 0.0  ;;  %v769_v38 = vmul.f32 0.01, %v737_v34 }
 0x1f0   :  { %v867_v41 = vadd.f32 %v1755_v59, %v848_v37  ;;  %v785_v43 = vsel %vm753_vm13, %v737_v34, %v769_v38 }
 0x1f1   :  { %v649_v44 = vpop.f32.mrf.mxu3  ;;  %992 = vmatmul.f32.gmra.mxu2 %v785_v43  ;;  %v587_v49 = vpop.f32.mrf.mxu2 }
 0x1f2   :  { %v715_v45 = vadd.f32 %v714_v40, %v649_v44  ;;  %vm883_vm14 = vcmp.gt.f32.partialorder %v867_v41, 0.0  ;;  %v899_v46 = vmul.f32 0.01, %v867_v41 }
 0x1f4   :  { %v738_v47 = vadd.f32 %v1755_v59, %v715_v45  ;;  %v915_v48 = vsel %vm883_vm14, %v867_v41, %v899_v46 }
 0x1f5   :  { %v850_v50 = vpop.f32.mrf.mxu1  ;;  %1060 = vmatmul.f32.gmra.mxu3 %v915_v48 }
 0x1f6   :  { %v851_v51 = vadd.f32 %v850_v50, %v587_v49  ;;  %vm754_vm15 = vcmp.gt.f32.partialorder %v738_v47, 0.0  ;;  %v770_v52 = vmul.f32 0.01, %v738_v47 }
 0x1f8   :  { %v868_v53 = vadd.f32 %v1755_v59, %v851_v51  ;;  %v786_v54 = vsel %vm754_vm15, %v738_v47, %v770_v52 }
 0x1f9   :  { %v652_v56 = vpop.f32.mrf.mxu3  ;;  %995 = vmatmul.f32.gmra.mxu2 %v786_v54 }
 0x1fa   :  { %v718_v57 = vadd.f32 %v717_v55, %v652_v56  ;;  %vm884_vm1 = vcmp.gt.f32.partialorder %v868_v53, 0.0  ;;  %v900_v58 = vmul.f32 0.01, %v868_v53 }
 0x1fc   :  { %v739_v60 = vadd.f32 %v1755_v59, %v718_v57  ;;  %v916_v61 = vsel %vm884_vm1, %v868_v53, %v900_v58 }
 0x1fd   :  { %1063 = vmatmul.f32.gmra.mxu3 %v916_v61 }
 0x1fe   :  { %vm755_vm2 = vcmp.gt.f32.partialorder %v739_v60, 0.0  ;;  %v771_v62 = vmul.f32 0.01, %v739_v60 }
 0x200   :  { %v787_v63 = vsel %vm755_vm2, %v739_v60, %v771_v62 }
 0x201   :  { %998 = vmatmul.f32.gmra.mxu2 %v787_v63 }
 0x202   :  { %v1019_v1 = vpop.f32.mrf.mxu1 }
 0x203   :  { %v1020_v3 = vadd.f32 %v1792_v0, %v1019_v1 }
 0x206   :  { %v954_v2 = vpop.f32.mrf.mxu0 }
 0x207   :  { %v955_v4 = vadd.f32 %v1792_v0, %v954_v2 }
 0x209   :  { %v1067_v5 = vadd.f32 %v1020_v3, %v955_v4  ;;  %v1115_v6 = vsub.f32 %v955_v4, %v1020_v3 }
 0x20b   :  { %v1083_v59 = vmul.f32 0.5, %v1067_v5  ;;  %v1131_v7 = vmul.f32 %v1115_v6, %v1115_v6 }
 0x20d   :  { %1099 = vst [vmem:[%s1888_s8] sm:$0xff] %v1083_v59  ;;  %1147 = vadd.xlane.f32.xlu2 %v1131_v7 }
 0x210   :  { %v1022_v8 = vpop.f32.mrf.mxu3 }
 0x211   :  { %v1023_v10 = vadd.f32 %v1792_v0, %v1022_v8 }
 0x214   :  { %v957_v9 = vpop.f32.mrf.mxu2 }
 0x215   :  { %v958_v11 = vadd.f32 %v1792_v0, %v957_v9 }
 0x217   :  { %v1068_v12 = vadd.f32 %v1023_v10, %v958_v11  ;;  %v1116_v39 = vsub.f32 %v958_v11, %v1023_v10 }
 0x218   :  { %v1025_v13 = vpop.f32.mrf.mxu3 }
 0x219   :  { %v1084_v14 = vmul.f32 0.5, %v1068_v12  ;;  %v1132_v15 = vmul.f32 %v1116_v39, %v1116_v39  ;;  %v1026_v17 = vadd.f32 %v1792_v0, %v1025_v13 }
 0x21b   :  { %1100 = vst [vmem:[%s1888_s8 + $0x8] sm:$0xff] %v1084_v14  ;;  %1149 = vadd.xlane.f32.xlu0 %v1132_v15 }
 0x21c   :  { %v960_v16 = vpop.f32.mrf.mxu2 }
 0x21d   :  { %v961_v18 = vadd.f32 %v1792_v0, %v960_v16 }
 0x21f   :  { %v1069_v19 = vadd.f32 %v1026_v17, %v961_v18  ;;  %v1117_v20 = vsub.f32 %v961_v18, %v1026_v17 }
 0x220   :  { %v1028_v21 = vpop.f32.mrf.mxu3 }
 0x221   :  { %v1085_v22 = vmul.f32 0.5, %v1069_v19  ;;  %v1133_v23 = vmul.f32 %v1117_v20, %v1117_v20  ;;  %v1029_v25 = vadd.f32 %v1792_v0, %v1028_v21 }
 0x223   :  { %1101 = vst [vmem:[%s1888_s8 + $0x10] sm:$0xff] %v1085_v22  ;;  %1151 = vadd.xlane.f32.xlu1 %v1133_v23 }
 0x224   :  { %v963_v24 = vpop.f32.mrf.mxu2 }
 0x225   :  { %v964_v26 = vadd.f32 %v1792_v0, %v963_v24 }
 0x227   :  { %v1070_v27 = vadd.f32 %v1029_v25, %v964_v26  ;;  %v1118_v28 = vsub.f32 %v964_v26, %v1029_v25 }
 0x228   :  { %v1031_v29 = vpop.f32.mrf.mxu3 }
 0x229   :  { %v1086_v30 = vmul.f32 0.5, %v1070_v27  ;;  %v1134_v31 = vmul.f32 %v1118_v28, %v1118_v28  ;;  %v1032_v33 = vadd.f32 %v1792_v0, %v1031_v29 }
 0x22b   :  { %1102 = vst [vmem:[%s1888_s8 + $0x18] sm:$0xff] %v1086_v30  ;;  %1153 = vadd.xlane.f32.xlu2 %v1134_v31 }
 0x22c   :  { %v966_v32 = vpop.f32.mrf.mxu2 }
 0x22d   :  { %v967_v34 = vadd.f32 %v1792_v0, %v966_v32 }
 0x22f   :  { %v1071_v35 = vadd.f32 %v1032_v33, %v967_v34  ;;  %v1119_v36 = vsub.f32 %v967_v34, %v1032_v33 }
 0x230   :  { %v1034_v37 = vpop.f32.mrf.mxu3 }
 0x231   :  { %v1087_v38 = vmul.f32 0.5, %v1071_v35  ;;  %v1135_v40 = vmul.f32 %v1119_v36, %v1119_v36  ;;  %v1035_v43 = vadd.f32 %v1792_v0, %v1034_v37 }
 0x233   :  { %1103 = vst [vmem:[%s1888_s8 + $0x20] sm:$0xff] %v1087_v38  ;;  %1155 = vadd.xlane.f32.xlu2 %v1135_v40 }
 0x234   :  { %v969_v41 = vpop.f32.mrf.mxu2 }
 0x235   :  { %v970_v44 = vadd.f32 %v1792_v0, %v969_v41 }
 0x237   :  { %v1072_v45 = vadd.f32 %v1035_v43, %v970_v44  ;;  %v1120_v46 = vsub.f32 %v970_v44, %v1035_v43 }
 0x238   :  { %v1037_v47 = vpop.f32.mrf.mxu3 }
 0x239   :  { %v1088_v48 = vmul.f32 0.5, %v1072_v45  ;;  %v1136_v49 = vmul.f32 %v1120_v46, %v1120_v46  ;;  %v1038_v51 = vadd.f32 %v1792_v0, %v1037_v47 }
 0x23b   :  { %1104 = vst [vmem:[%s1888_s8 + $0x28] sm:$0xff] %v1088_v48  ;;  %1157 = vadd.xlane.f32.xlu0 %v1136_v49 }
 0x23c   :  { %v972_v50 = vpop.f32.mrf.mxu2 }
 0x23d   :  { %v973_v52 = vadd.f32 %v1792_v0, %v972_v50 }
 0x23f   :  { %v1073_v53 = vadd.f32 %v1038_v51, %v973_v52  ;;  %v1121_v54 = vsub.f32 %v973_v52, %v1038_v51 }
 0x240   :  { %v1040_v55 = vpop.f32.mrf.mxu3 }
 0x241   :  { %v1089_v56 = vmul.f32 0.5, %v1073_v53  ;;  %v1137_v57 = vmul.f32 %v1121_v54, %v1121_v54  ;;  %v1041_v60 = vadd.f32 %v1792_v0, %v1040_v55 }
 0x243   :  { %1105 = vst [vmem:[%s1888_s8 + $0x30] sm:$0xff] %v1089_v56  ;;  %1159 = vadd.xlane.f32.xlu1 %v1137_v57 }
 0x244   :  { %v975_v58 = vpop.f32.mrf.mxu2 }
 0x245   :  { %v976_v61 = vadd.f32 %v1792_v0, %v975_v58 }
 0x247   :  { %v1074_v62 = vadd.f32 %v1041_v60, %v976_v61  ;;  %v1122_v63 = vsub.f32 %v976_v61, %v1041_v60 }
 0x248   :  { %v1043_v1 = vpop.f32.mrf.mxu3 }
 0x249   :  { %v1090_v2 = vmul.f32 0.5, %v1074_v62  ;;  %v1138_v3 = vmul.f32 %v1122_v63, %v1122_v63  ;;  %v1044_v5 = vadd.f32 %v1792_v0, %v1043_v1 }
 0x24b   :  { %1106 = vst [vmem:[%s1888_s8 + $0x38] sm:$0xff] %v1090_v2  ;;  %1161 = vadd.xlane.f32.xlu2 %v1138_v3 }
 0x24c   :  { %v978_v4 = vpop.f32.mrf.mxu2 }
 0x24d   :  { %v979_v6 = vadd.f32 %v1792_v0, %v978_v4 }
 0x24f   :  { %v1075_v59 = vadd.f32 %v1044_v5, %v979_v6  ;;  %v1123_v7 = vsub.f32 %v979_v6, %v1044_v5 }
 0x250   :  { %v1046_v8 = vpop.f32.mrf.mxu3 }
 0x251   :  { %v1091_v9 = vmul.f32 0.5, %v1075_v59  ;;  %v1139_v10 = vmul.f32 %v1123_v7, %v1123_v7  ;;  %v1047_v12 = vadd.f32 %v1792_v0, %v1046_v8 }
 0x253   :  { %1107 = vst [vmem:[%s1888_s8 + $0x40] sm:$0xff] %v1091_v9  ;;  %1163 = vadd.xlane.f32.xlu0 %v1139_v10 }
 0x254   :  { %v981_v11 = vpop.f32.mrf.mxu2 }
 0x255   :  { %v982_v39 = vadd.f32 %v1792_v0, %v981_v11 }
 0x257   :  { %v1076_v13 = vadd.f32 %v1047_v12, %v982_v39  ;;  %v1124_v14 = vsub.f32 %v982_v39, %v1047_v12 }
 0x258   :  { %v1049_v15 = vpop.f32.mrf.mxu3 }
 0x259   :  { %v1092_v16 = vmul.f32 0.5, %v1076_v13  ;;  %v1140_v17 = vmul.f32 %v1124_v14, %v1124_v14  ;;  %v1050_v19 = vadd.f32 %v1792_v0, %v1049_v15 }
 0x25b   :  { %1108 = vst [vmem:[%s1888_s8 + $0x48] sm:$0xff] %v1092_v16  ;;  %1165 = vadd.xlane.f32.xlu1 %v1140_v17 }
 0x25c   :  { %v984_v18 = vpop.f32.mrf.mxu2 }
 0x25d   :  { %v985_v20 = vadd.f32 %v1792_v0, %v984_v18 }
 0x25f   :  { %v1077_v21 = vadd.f32 %v1050_v19, %v985_v20  ;;  %v1125_v22 = vsub.f32 %v985_v20, %v1050_v19 }
 0x260   :  { %v1052_v23 = vpop.f32.mrf.mxu3 }
 0x261   :  { %v1093_v24 = vmul.f32 0.5, %v1077_v21  ;;  %v1141_v25 = vmul.f32 %v1125_v22, %v1125_v22  ;;  %v1053_v27 = vadd.f32 %v1792_v0, %v1052_v23 }
 0x263   :  { %1109 = vst [vmem:[%s1888_s8 + $0x50] sm:$0xff] %v1093_v24  ;;  %1167 = vadd.xlane.f32.xlu2 %v1141_v25 }
 0x264   :  { %v987_v26 = vpop.f32.mrf.mxu2 }
 0x265   :  { %v988_v28 = vadd.f32 %v1792_v0, %v987_v26 }
 0x267   :  { %v1078_v29 = vadd.f32 %v1053_v27, %v988_v28  ;;  %v1126_v30 = vsub.f32 %v988_v28, %v1053_v27 }
 0x268   :  { %v1055_v31 = vpop.f32.mrf.mxu3 }
 0x269   :  { %v1094_v32 = vmul.f32 0.5, %v1078_v29  ;;  %v1142_v33 = vmul.f32 %v1126_v30, %v1126_v30  ;;  %v1056_v35 = vadd.f32 %v1792_v0, %v1055_v31 }
 0x26b   :  { %1110 = vst [vmem:[%s1888_s8 + $0x58] sm:$0xff] %v1094_v32  ;;  %1169 = vadd.xlane.f32.xlu0 %v1142_v33 }
 0x26c   :  { %v990_v34 = vpop.f32.mrf.mxu2 }
 0x26d   :  { %v991_v36 = vadd.f32 %v1792_v0, %v990_v34 }
 0x26f   :  { %v1079_v37 = vadd.f32 %v1056_v35, %v991_v36  ;;  %v1127_v38 = vsub.f32 %v991_v36, %v1056_v35 }
 0x270   :  { %v1058_v40 = vpop.f32.mrf.mxu3 }
 0x271   :  { %v1095_v41 = vmul.f32 0.5, %v1079_v37  ;;  %v1143_v43 = vmul.f32 %v1127_v38, %v1127_v38  ;;  %v1059_v45 = vadd.f32 %v1792_v0, %v1058_v40  ;;  %v1200_v38 = vld [vmem:[#allocation2] sm:$0x1] }
 0x273   :  { %1111 = vst [vmem:[%s1888_s8 + $0x60] sm:$0xff] %v1095_v41  ;;  %1171 = vadd.xlane.f32.xlu1 %v1143_v43 }
 0x274   :  { %v993_v44 = vpop.f32.mrf.mxu2 }
 0x275   :  { %v994_v46 = vadd.f32 %v1792_v0, %v993_v44 }
 0x277   :  { %v1080_v47 = vadd.f32 %v1059_v45, %v994_v46  ;;  %v1128_v48 = vsub.f32 %v994_v46, %v1059_v45 }
 0x278   :  { %v1061_v49 = vpop.f32.mrf.mxu3 }
 0x279   :  { %v1096_v50 = vmul.f32 0.5, %v1080_v47  ;;  %v1144_v51 = vmul.f32 %v1128_v48, %v1128_v48  ;;  %v1062_v53 = vadd.f32 %v1792_v0, %v1061_v49 }
 0x27b   :  { %1112 = vst [vmem:[%s1888_s8 + $0x68] sm:$0xff] %v1096_v50  ;;  %1173 = vadd.xlane.f32.xlu2 %v1144_v51 }
 0x27c   :  { %v996_v52 = vpop.f32.mrf.mxu2 }
 0x27d   :  { %v997_v54 = vadd.f32 %v1792_v0, %v996_v52 }
 0x27f   :  { %v1081_v55 = vadd.f32 %v1062_v53, %v997_v54  ;;  %v1129_v56 = vsub.f32 %v997_v54, %v1062_v53 }
 0x280   :  { %v1064_v60 = vpop.f32.mrf.mxu3  ;;  %v1148_v5 = vpop.xlane.xlu2 %1147 }
 0x281   :  { %v1097_v57 = vmul.f32 0.5, %v1081_v55  ;;  %v1145_v58 = vmul.f32 %v1129_v56, %v1129_v56  ;;  %v1065_v62 = vadd.f32 %v1792_v0, %v1064_v60 }
 0x283   :  { %1113 = vst [vmem:[%s1888_s8 + $0x70] sm:$0xff] %v1097_v57  ;;  %1175 = vadd.xlane.f32.xlu0 %v1145_v58 }
 0x284   :  { %v999_v61 = vpop.f32.mrf.mxu2 }
 0x285   :  { %v1000_v63 = vadd.f32 %v1792_v0, %v999_v61 }
 0x287   :  { %v1082_v1 = vadd.f32 %v1065_v62, %v1000_v63  ;;  %v1130_v2 = vsub.f32 %v1000_v63, %v1065_v62 }
 0x289   :  { %v1098_v3 = vmul.f32 0.5, %v1082_v1  ;;  %v1146_v4 = vmul.f32 %v1130_v2, %v1130_v2 }
 0x28b   :  { %1114 = vst [vmem:[%s1888_s8 + $0x78] sm:$0xff] %v1098_v3  ;;  %1177 = vadd.xlane.f32.xlu1 %v1146_v4  ;;  %s1357_s8 = smov [#allocation2]  }
 0x28c   :  { %s1212_s14 = sshll.u32 %s1357_s8, 4  ;;  %s1213_s14 = int_to_ptr.vmem [resolvable:$true] %s1212_s14 }
 0x28e   :  { %v1150_v59 = vpop.xlane.xlu0 %1149 }
 0x28f   :  { %v1179_v10 = vadd.f32 %v1150_v59, %v1148_v5 }
 0x296   :  { %v1152_v7 = vpop.xlane.xlu1 %1151 }
 0x297   :  { %v1180_v11 = vadd.f32 %v1179_v10, %v1152_v7 }
 0x29e   :  { %v1154_v6 = vpop.xlane.xlu2 %1153 }
 0x29f   :  { %v1181_v0 = vadd.f32 %v1180_v11, %v1154_v6 }
 0x2a6   :  { %v1156_v8 = vpop.xlane.xlu2 %1155 }
 0x2a7   :  { %v1182_v13 = vadd.f32 %v1181_v0, %v1156_v8 }
 0x2ae   :  { %v1158_v9 = vpop.xlane.xlu0 %1157 }
 0x2af   :  { %v1183_v15 = vadd.f32 %v1182_v13, %v1158_v9 }
 0x2b6   :  { %v1160_v12 = vpop.xlane.xlu1 %1159 }
 0x2b7   :  { %v1184_v16 = vadd.f32 %v1183_v15, %v1160_v12 }
 0x2be   :  { %v1162_v39 = vpop.xlane.xlu2 %1161 }
 0x2bf   :  { %v1185_v18 = vadd.f32 %v1184_v16, %v1162_v39 }
 0x2c6   :  { %v1164_v14 = vpop.xlane.xlu0 %1163 }
 0x2c7   :  { %v1186_v20 = vadd.f32 %v1185_v18, %v1164_v14 }
 0x2ce   :  { %v1166_v17 = vpop.xlane.xlu1 %1165 }
 0x2cf   :  { %v1187_v22 = vadd.f32 %v1186_v20, %v1166_v17 }
 0x2d6   :  { %v1168_v19 = vpop.xlane.xlu2 %1167 }
 0x2d7   :  { %v1188_v23 = vadd.f32 %v1187_v22, %v1168_v19 }
 0x2de   :  { %v1170_v21 = vpop.xlane.xlu0 %1169 }
 0x2df   :  { %v1189_v25 = vadd.f32 %v1188_v23, %v1170_v21 }
 0x2e6   :  { %v1172_v24 = vpop.xlane.xlu1 %1171 }
 0x2e7   :  { %v1190_v27 = vadd.f32 %v1189_v25, %v1172_v24 }
 0x2ee   :  { %v1174_v26 = vpop.xlane.xlu2 %1173 }
 0x2ef   :  { %v1191_v29 = vadd.f32 %v1190_v27, %v1174_v26 }
 0x2f6   :  { %v1176_v28 = vpop.xlane.xlu0 %1175 }
 0x2f7   :  { %v1192_v30 = vadd.f32 %v1191_v29, %v1176_v28 }
 0x2fe   :  { %v1178_v42 = vpop.xlane.xlu1 %1177 }
 0x2ff   :  { %v1193_v31 = vadd.f32 %v1192_v30, %v1178_v42 }
 0x301   :  { %v1194_v32 = vrot.slane %v1193_v31, 4 }
 0x303   :  { %v1195_v33 = vadd.f32 %v1194_v32, %v1193_v31 }
 0x305   :  { %v1196_v34 = vrot.slane %v1195_v33, 2 }
 0x307   :  { %v1197_v35 = vadd.f32 %v1196_v34, %v1195_v33 }
 0x309   :  { %v1198_v36 = vrot.slane %v1197_v35, 1 }
 0x30b   :  { %v1199_v37 = vadd.f32 %v1198_v36, %v1197_v35 }
 0x30d   :  { %v1201_v40 = vmul.f32 0.00390625, %v1199_v37 }
 0x30f   :  { %v1202_v41 = vadd.f32 %v1201_v40, %v1200_v38 }
 0x311   :  { %1204 = vst.msk [vmem:[#allocation2] sm:$0x1] %vm36_vm0, %v1202_v41 }
 0x312   :  { %1217 = dma.vmem_to_hbm [thread:$0]  %s1213_s14, 16, %s1215_s15, [#allocation3]  }
 0x313   :  { %1353 = dma.done.wait [#allocation3], 16  }
 0x314   :  { %1354 = vsyncadd [#allocation3], 4294967280 }
 0x315   :  { %1224 = vsyncpa [#allocation3], 1 }

</bundles_post_ra>
